<compile_context>
chip_gen: v7x
topology: tpu7x:2x2x1
jax: 0.10.0
libtpu: 0.0.40
codegen_flags: <defaults>
</compile_context>

<pallas_src>
import math
from functools import partial

import jax
import jax.numpy as jnp
from jax.experimental import pallas as pl
from jax.experimental.pallas import tpu as pltpu


def _round_up(n, m):
    return -(-n // m) * m


def _silu(x):
    return x * (1.0 / (1.0 + jnp.exp(-x)))


def _layernorm(x, gamma, beta, eps=1e-5):
    # two-pass variance in f32 (matches nn.LayerNorm; no E[x^2]-mu^2 cancellation)
    mu = jnp.mean(x, axis=-1, keepdims=True)
    xc = x - mu
    var = jnp.mean(xc * xc, axis=-1, keepdims=True)
    return xc * jax.lax.rsqrt(var + eps) * gamma + beta


def diffusion_prior_kernel(
    t_ref, freqs_ref, c_ref, x_ref,
    te_w1c_ref, te_w1s_ref, te_b1_ref,
    te_w2_ref, cw_ref, tc_b_ref,
    iw_ref, ib_ref, ig_ref, ibt_ref,
    hw_ref, hv_ref,
    ow_ref, ob_ref,
    o_ref,
    x_sc, tc_sc,
    *, resident,
):
    f32 = jnp.float32
    bf16 = jnp.bfloat16
    l = pl.program_id(1)

    @pl.when(l == 0)
    def _prologue():
        # Timesteps(time_embed_dim, flip_sin_to_cos=True, shift=0):
        #   temb = [cos(t*f), sin(t*f)]
        # temb @ te_w1 == cos(arg) @ te_w1[:half] + sin(arg) @ te_w1[half:]
        # (sum of two dots avoids a lane-dim concat / relayout copy).
        arg = t_ref[...] * freqs_ref[...]                          # (bt, half)
        h = (jnp.dot(jnp.cos(arg).astype(bf16), te_w1c_ref[...],
                     preferred_element_type=f32)
             + jnp.dot(jnp.sin(arg).astype(bf16), te_w1s_ref[...],
                       preferred_element_type=f32)
             + te_b1_ref[...])
        h = _silu(h)
        # tvec + cvec == h @ te_w2 + c_pad @ cw_pad + (te_b2 + cb)
        tc_sc[...] = (jnp.dot(h.astype(bf16), te_w2_ref[...],
                              preferred_element_type=f32)
                      + jnp.dot(c_ref[...].astype(bf16), cw_ref[...],
                                preferred_element_type=f32)
                      + tc_b_ref[...])
        # input layer: Linear -> LayerNorm -> SiLU
        xi = jnp.dot(x_ref[...].astype(bf16), iw_ref[...],
                     preferred_element_type=f32) + ib_ref[...]
        x_sc[...] = _silu(_layernorm(xi, ig_ref[...], ibt_ref[...]))

    # residual block l (Dropout(p=0.0) == identity)
    li = l if resident else 0
    w = hw_ref[li]                           # (H, H) bf16
    v = hv_ref[li]                           # (3, H) f32: [bias, gamma, beta]
    xin = x_sc[...] + tc_sc[...]
    y = jnp.dot(xin.astype(bf16), w, preferred_element_type=f32) + v[0:1, :]
    y = _silu(_layernorm(y, v[1:2, :], v[2:3, :]))
    x_sc[...] = y + xin

    @pl.when(l == pl.num_programs(1) - 1)
    def _epilogue():
        o_ref[...] = (jnp.dot(x_sc[...].astype(bf16), ow_ref[...],
                              preferred_element_type=f32)
                      + ob_ref[...]).astype(o_ref.dtype)


def _tpu_vmem_capacity():
    try:
        return int(pltpu.get_tpu_info().vmem_capacity_bytes)
    except Exception:
        return 64 * 1024 * 1024   # conservative (v7x-sized) -> streaming path


def _const_spec(shape, single_buffer):
    nd = len(shape)
    idx = lambda b, l, _n=nd: (0,) * _n
    if single_buffer:
        try:
            # Block index never changes -> second pipeline buffer is pure waste.
            return pl.BlockSpec(shape, idx, pipeline_mode=pl.Buffered(1))
        except Exception:
            pass
    return pl.BlockSpec(shape, idx)


def diffusion_prior_forward(kparams, x, t, c, *, batch_tile=None,
                            resident_weights=None, single_buffer_consts=True,
                            vmem_limit_bytes=None):
    f32 = jnp.float32
    B, E = x.shape
    H = kparams["te_b1"].shape[-1]
    half = kparams["freqs"].shape[-1]
    L = kparams["hw"].shape[0]
    cond_pad = kparams["cw"].shape[0]

    vmem_cap = _tpu_vmem_capacity()
    big_vmem = vmem_cap >= 100 * 1024 * 1024          # v5e / v6e (128 MiB / TC)

    # ---- batch tiling: big tiles hide the streamed-weight DMA + step overhead
    if batch_tile is None:
        batch_tile = 512 if big_vmem else 256
    bt = _round_up(B, 8) if B <= batch_tile else batch_tile
    if not big_vmem and B >= 16:
        # v7x has 2 TensorCores: keep >= 2 batch tiles so the "parallel" axis
        # gives both cores work.
        bt = min(bt, _round_up(-(-B // 2), 8))
    B_pad = _round_up(B, bt)
    n_bt = B_pad // bt

    # ---- layer-weight residency
    hw_bytes = int(kparams["hw"].size) * kparams["hw"].dtype.itemsize
    hv_bytes = int(kparams["hv"].size) * kparams["hv"].dtype.itemsize
    if resident_weights is None:
        # Hold the whole hidden stack in VMEM on 128-MiB chips so extra batch
        # tiles don't re-stream it; keep streaming on v7x (64 MiB / fast HBM).
        resident_weights = big_vmem and hw_bytes <= 24 * 1024 * 1024
    if vmem_limit_bytes is None:
        vmem_limit_bytes = (96 if big_vmem else 48) * 1024 * 1024

    def pad_rows(a):
        return jnp.pad(a, ((0, B_pad - B), (0, 0))) if B_pad != B else a

    t2 = pad_rows(t.astype(f32).reshape(B, 1))
    c_p = pad_rows(jnp.pad(c.astype(f32), ((0, 0), (0, cond_pad - c.shape[1]))))
    x_p = pad_rows(x.astype(f32))

    inputs = (
        t2, kparams["freqs"], c_p, x_p,
        kparams["te_w1c"], kparams["te_w1s"], kparams["te_b1"],
        kparams["te_w2"], kparams["cw"], kparams["tc_b"],
        kparams["iw"], kparams["ib"], kparams["ig"], kparams["ibt"],
        kparams["hw"], kparams["hv"],
        kparams["ow"], kparams["ob"],
    )

    def const(shape):
        return _const_spec(shape, single_buffer_consts)

    if resident_weights:
        hw_spec = const((L, H, H))
        hv_spec = const((L, 3, H))
    else:
        hw_spec = pl.BlockSpec((1, H, H), lambda b, l: (l, 0, 0))
        hv_spec = pl.BlockSpec((1, 3, H), lambda b, l: (l, 0, 0))

    in_specs = [
        pl.BlockSpec((bt, 1), lambda b, l: (b, 0)),             # t
        const((1, half)),                                       # freqs
        pl.BlockSpec((bt, cond_pad), lambda b, l: (b, 0)),      # c (lane-padded)
        pl.BlockSpec((bt, E), lambda b, l: (b, 0)),             # x
        const((half, H)), const((half, H)), const((1, H)),      # te_w1 cos/sin, b1
        const((H, H)), const((cond_pad, H)), const((1, H)),     # te_w2, cw, tc_b
        const((E, H)), const((1, H)), const((1, H)), const((1, H)),  # iw,ib,ig,ibt
        hw_spec, hv_spec,                                       # layer weights
        const((H, E)), const((1, E)),                           # ow, ob
    ]
    out_specs = pl.BlockSpec((bt, E), lambda b, l: (b, 0))

    # Advisory cost: constants counted once; activations + (re-)streamed layer
    # weights scale with n_bt.
    T = 2 * half
    flops = 2 * B_pad * (T * H + H * H + cond_pad * H + E * H + L * H * H + H * E)
    transcendentals = B_pad * (T + H * (L + 2))
    const_names = ("freqs", "te_w1c", "te_w1s", "te_b1", "te_w2", "cw", "tc_b",
                   "iw", "ib", "ig", "ibt", "ow", "ob")
    const_bytes = sum(int(kparams[n].size) * kparams[n].dtype.itemsize
                      for n in const_names)
    act_bytes = (int(t2.size) + int(c_p.size) + int(x_p.size) + B_pad * E) * 4
    layer_bytes = (hw_bytes + hv_bytes) * (1 if resident_weights else n_bt)
    cost = pl.CostEstimate(flops=int(flops),
                           transcendentals=int(transcendentals),
                           bytes_accessed=int(const_bytes + act_bytes + layer_bytes))

    out = pl.pallas_call(
        partial(diffusion_prior_kernel, resident=resident_weights),
        out_shape=jax.ShapeDtypeStruct((B_pad, E), f32),
        grid_spec=pltpu.PrefetchScalarGridSpec(
            num_scalar_prefetch=0,
            grid=(n_bt, L),                 # batch tiles (parallel), layers (carry)
            in_specs=in_specs,
            out_specs=out_specs,
            scratch_shapes=[pltpu.VMEM((bt, H), f32),    # residual state x
                            pltpu.VMEM((bt, H), f32)],   # tvec + cvec
        ),
        compiler_params=pltpu.CompilerParams(
            dimension_semantics=("parallel", "arbitrary"),
            vmem_limit_bytes=int(vmem_limit_bytes),
        ),
        cost_estimate=cost,
    )(*inputs)
    return out[:B]


def make_params(key, embed_dim, cond_dim, hidden_dim, time_embed_dim, layers):
    """f32 master parameters mirroring the PyTorch module structure."""
    ks = iter(jax.random.split(key, 4 * layers + 16))

    def lin_w(fan_in, fan_out):
        return (jax.random.normal(next(ks), (fan_in, fan_out), jnp.float32)
                / math.sqrt(fan_in))

    def lin_b(fan_out):
        return 0.01 * jax.random.normal(next(ks), (1, fan_out), jnp.float32)

    half = time_embed_dim // 2
    exponent = -math.log(10000.0) * jnp.arange(half, dtype=jnp.float32) / half
    freqs = jnp.exp(exponent).reshape(1, half)

    return {
        "freqs": freqs,
        "te_w1": lin_w(time_embed_dim, hidden_dim), "te_b1": lin_b(hidden_dim),
        "te_w2": lin_w(hidden_dim, hidden_dim),     "te_b2": lin_b(hidden_dim),
        "cw": lin_w(cond_dim, hidden_dim), "cb": lin_b(hidden_dim),
        "iw": lin_w(embed_dim, hidden_dim), "ib": lin_b(hidden_dim),
        "ig": jnp.ones((1, hidden_dim), jnp.float32),
        "ibt": jnp.zeros((1, hidden_dim), jnp.float32),
        "hw": jnp.stack([lin_w(hidden_dim, hidden_dim) for _ in range(layers)]),
        "hb": jnp.stack([lin_b(hidden_dim) for _ in range(layers)]),
        "hg": jnp.ones((layers, 1, hidden_dim), jnp.float32),
        "hbt": jnp.zeros((layers, 1, hidden_dim), jnp.float32),
        "ow": lin_w(hidden_dim, embed_dim), "ob": lin_b(embed_dim),
    }


def prepare_kernel_params(params, lane=128):
    """bf16 weights at the MXU boundary + prologue/epilogue fusions.

    * te_w1 split into cos/sin halves (temb concat -> sum of two dots).
    * te_w2 / cw kept separate (two dots summed) with fused bias te_b2 + cb;
      cond_dim zero-padded to a lane multiple for an aligned contraction.
    * per-layer (bias, gamma, beta) packed into one (L, 3, H) f32 array so the
      layer step issues one small DMA instead of three.
    All transformations are mathematically identical to the module forward.
    """
    bf16 = jnp.bfloat16
    half = params["freqs"].shape[-1]
    cond_dim = params["cw"].shape[0]
    cond_pad = _round_up(cond_dim, lane)
    cw_pad = jnp.pad(params["cw"], ((0, cond_pad - cond_dim), (0, 0)))
    hv = jnp.concatenate([params["hb"], params["hg"], params["hbt"]], axis=1)
    return {
        "freqs": params["freqs"],
        "te_w1c": params["te_w1"][:half].astype(bf16),
        "te_w1s": params["te_w1"][half:].astype(bf16),
        "te_b1": params["te_b1"],
        "te_w2": params["te_w2"].astype(bf16),
        "cw": cw_pad.astype(bf16),
        "tc_b": params["te_b2"] + params["cb"],
        "iw": params["iw"].astype(bf16), "ib": params["ib"],
        "ig": params["ig"], "ibt": params["ibt"],
        "hw": params["hw"].astype(bf16),
        "hv": hv,                                   # (L, 3, H) f32
        "ow": params["ow"].astype(bf16), "ob": params["ob"],
    }


def reference_forward(params, x, t, c, dot_dtype=None):
    """Pure-JAX reference mirroring the PyTorch forward.

    dot_dtype=None      -> f32 HIGHEST precision (module semantics).
    dot_dtype=bfloat16  -> same numeric policy as the Pallas kernel.
    """
    f32 = jnp.float32

    def dot(a, b):
        if dot_dtype is None:
            return jnp.dot(a, b, precision=jax.lax.Precision.HIGHEST,
                           preferred_element_type=f32)
        return jnp.dot(a.astype(dot_dtype), b.astype(dot_dtype),
                       preferred_element_type=f32)

    def ln(v, g, bta, eps=1e-5):
        mu = jnp.mean(v, axis=-1, keepdims=True)
        var = jnp.mean((v - mu) ** 2, axis=-1, keepdims=True)
        return (v - mu) * jax.lax.rsqrt(var + eps) * g + bta

    arg = t.astype(f32)[:, None] * params["freqs"]
    temb = jnp.concatenate([jnp.cos(arg), jnp.sin(arg)], axis=-1)
    h = _silu(dot(temb, params["te_w1"]) + params["te_b1"])
    tvec = dot(h, params["te_w2"]) + params["te_b2"]
    cvec = dot(c, params["cw"]) + params["cb"]
    xx = _silu(ln(dot(x, params["iw"]) + params["ib"],
                  params["ig"], params["ibt"]))
    for l in range(params["hw"].shape[0]):
        xx = xx + tvec + cvec
        y = _silu(ln(dot(xx, params["hw"][l]) + params["hb"][l],
                     params["hg"][l], params["hbt"][l]))
        xx = y + xx  # Dropout(p=0.0) == identity
    return dot(xx, params["ow"]) + params["ob"]


if __name__ == "__main__":
    # Small shapes consistent with the module (scaled down from 1024/512).
    EMBED_DIM = 256
    COND_DIM = 42
    HIDDEN_DIM = 256
    TIME_EMBED_DIM = 256
    LAYERS = 4
    BATCH = 8

    key = jax.random.PRNGKey(0)
    k_param, k_x, k_c, k_t = jax.random.split(key, 4)

    params = make_params(k_param, EMBED_DIM, COND_DIM, HIDDEN_DIM,
                         TIME_EMBED_DIM, LAYERS)
    kparams = prepare_kernel_params(params)

    x = jax.random.normal(k_x, (BATCH, EMBED_DIM), jnp.float32)
    c = jax.random.normal(k_c, (BATCH, COND_DIM), jnp.float32)
    t = jax.random.randint(k_t, (BATCH,), 0, 1000).astype(jnp.float32)

    try:
        out = jax.block_until_ready(diffusion_prior_forward(kparams, x, t, c))
    except Exception:
        # Conservative fallback: stream layer weights, default double-buffering.
        out = jax.block_until_ready(
            diffusion_prior_forward(kparams, x, t, c,
                                    resident_weights=False,
                                    single_buffer_consts=False))
    assert out.shape == (BATCH, EMBED_DIM)

    # Matched numeric policy (bf16 operands, f32 accumulation): tight check.
    ref_bf16 = reference_forward(params, x, t, c, dot_dtype=jnp.bfloat16)
    assert jnp.allclose(out, ref_bf16, rtol=2e-2, atol=2e-2), \
        "mismatch vs bf16-policy reference"
    # Full-f32 module semantics: loose check quantifying bf16 drift.
    ref_f32 = reference_forward(params, x, t, c)
    assert jnp.allclose(out, ref_f32, rtol=1e-1, atol=1e-1), \
        "mismatch vs f32 reference"

    # TODO(synk): the c=None branch of the PyTorch forward (cvec = 0) is not
    # exercised here; it would just drop the cw dot from the fused tc path.
    print("KERNEL_OK")
</pallas_src>

<mosaic_0001>
module attributes {stable_mosaic.version = 11 : i64} {
  func.func @diffusion_prior_kernel(%arg0: i32, %arg1: i32, %arg2: memref<8x1xf32, #tpu.memory_space<vmem>>, %arg3: memref<1x128xf32, #tpu.memory_space<vmem>>, %arg4: memref<8x128xf32, #tpu.memory_space<vmem>>, %arg5: memref<8x256xf32, #tpu.memory_space<vmem>>, %arg6: memref<128x256xbf16, #tpu.memory_space<vmem>>, %arg7: memref<128x256xbf16, #tpu.memory_space<vmem>>, %arg8: memref<1x256xf32, #tpu.memory_space<vmem>>, %arg9: memref<256x256xbf16, #tpu.memory_space<vmem>>, %arg10: memref<128x256xbf16, #tpu.memory_space<vmem>>, %arg11: memref<1x256xf32, #tpu.memory_space<vmem>>, %arg12: memref<256x256xbf16, #tpu.memory_space<vmem>>, %arg13: memref<1x256xf32, #tpu.memory_space<vmem>>, %arg14: memref<1x256xf32, #tpu.memory_space<vmem>>, %arg15: memref<1x256xf32, #tpu.memory_space<vmem>>, %arg16: memref<1x256x256xbf16, #tpu.memory_space<vmem>>, %arg17: memref<1x3x256xf32, #tpu.memory_space<vmem>>, %arg18: memref<256x256xbf16, #tpu.memory_space<vmem>>, %arg19: memref<1x256xf32, #tpu.memory_space<vmem>>, %arg20: memref<8x256xf32, #tpu.memory_space<vmem>>, %arg21: memref<8x256xf32, #tpu.memory_space<vmem>>, %arg22: memref<8x256xf32, #tpu.memory_space<vmem>>) attributes {dimension_semantics = [#tpu.dimension_semantics<parallel>, #tpu.dimension_semantics<arbitrary>], iteration_bounds = array<i64: 1, 4>, scalar_prefetch = 0 : i64, scratch_operands = 2 : i64, tpu.core_type = #tpu.core_type<tc>, window_params = [{transform_indices = @transform_0, window_bounds = array<i64: 8, 1>}, {pipeline_mode = #tpu.pipeline_mode<synchronous>, transform_indices = @transform_1, window_bounds = array<i64: 1, 128>}, {transform_indices = @transform_2, window_bounds = array<i64: 8, 128>}, {transform_indices = @transform_3, window_bounds = array<i64: 8, 256>}, {pipeline_mode = #tpu.pipeline_mode<synchronous>, transform_indices = @transform_4, window_bounds = array<i64: 128, 256>}, {pipeline_mode = #tpu.pipeline_mode<synchronous>, transform_indices = @transform_5, window_bounds = array<i64: 128, 256>}, {pipeline_mode = #tpu.pipeline_mode<synchronous>, transform_indices = @transform_6, window_bounds = array<i64: 1, 256>}, {pipeline_mode = #tpu.pipeline_mode<synchronous>, transform_indices = @transform_7, window_bounds = array<i64: 256, 256>}, {pipeline_mode = #tpu.pipeline_mode<synchronous>, transform_indices = @transform_8, window_bounds = array<i64: 128, 256>}, {pipeline_mode = #tpu.pipeline_mode<synchronous>, transform_indices = @transform_9, window_bounds = array<i64: 1, 256>}, {pipeline_mode = #tpu.pipeline_mode<synchronous>, transform_indices = @transform_10, window_bounds = array<i64: 256, 256>}, {pipeline_mode = #tpu.pipeline_mode<synchronous>, transform_indices = @transform_11, window_bounds = array<i64: 1, 256>}, {pipeline_mode = #tpu.pipeline_mode<synchronous>, transform_indices = @transform_12, window_bounds = array<i64: 1, 256>}, {pipeline_mode = #tpu.pipeline_mode<synchronous>, transform_indices = @transform_13, window_bounds = array<i64: 1, 256>}, {transform_indices = @transform_14, window_bounds = array<i64: 1, 256, 256>}, {transform_indices = @transform_15, window_bounds = array<i64: 1, 3, 256>}, {pipeline_mode = #tpu.pipeline_mode<synchronous>, transform_indices = @transform_16, window_bounds = array<i64: 256, 256>}, {pipeline_mode = #tpu.pipeline_mode<synchronous>, transform_indices = @transform_17, window_bounds = array<i64: 1, 256>}, {transform_indices = @transform_18, window_bounds = array<i64: 8, 256>}]} {
    %c0_i32 = arith.constant 0 : i32
    %0 = arith.cmpi eq, %arg1, %c0_i32 : i32
    %1 = arith.extui %0 : i1 to i32
    %c0_i32_0 = arith.constant 0 : i32
    %2 = arith.cmpi ne, %1, %c0_i32_0 : i32
    scf.if %2 {
      %c0_21 = arith.constant 0 : index
      %c0_22 = arith.constant 0 : index
      %50 = vector.load %arg2[%c0_21, %c0_22] : memref<8x1xf32, #tpu.memory_space<vmem>>, vector<8x1xf32>
      %c0_23 = arith.constant 0 : index
      %c0_24 = arith.constant 0 : index
      %51 = vector.load %arg3[%c0_23, %c0_24] : memref<1x128xf32, #tpu.memory_space<vmem>>, vector<1x128xf32>
      %52 = vector.broadcast %50 : vector<8x1xf32> to vector<8x128xf32>
      %53 = vector.broadcast %51 : vector<1x128xf32> to vector<8x128xf32>
      %54 = arith.mulf %52, %53 : vector<8x128xf32>
      %55 = math.cos %54 : vector<8x128xf32>
      %56 = arith.truncf %55 : vector<8x128xf32> to vector<8x128xbf16>
      %c0_25 = arith.constant 0 : index
      %c0_26 = arith.constant 0 : index
      %57 = vector.load %arg6[%c0_25, %c0_26] : memref<128x256xbf16, #tpu.memory_space<vmem>>, vector<128x256xbf16>
      %cst_27 = arith.constant dense<0.000000e+00> : vector<8x256xf32>
      %58 = tpu.matmul %56, %57, %cst_27 {dimension_numbers = #tpu.dot_dimension_numbers<[1], [0], [0], [1], [0, 0, 1, 1], [], []>} : vector<8x128xbf16>, vector<128x256xbf16>, vector<8x256xf32> -> vector<8x256xf32>
      %59 = math.sin %54 : vector<8x128xf32>
      %60 = arith.truncf %59 : vector<8x128xf32> to vector<8x128xbf16>
      %c0_28 = arith.constant 0 : index
      %c0_29 = arith.constant 0 : index
      %61 = vector.load %arg7[%c0_28, %c0_29] : memref<128x256xbf16, #tpu.memory_space<vmem>>, vector<128x256xbf16>
      %cst_30 = arith.constant dense<0.000000e+00> : vector<8x256xf32>
      %62 = tpu.matmul %60, %61, %cst_30 {dimension_numbers = #tpu.dot_dimension_numbers<[1], [0], [0], [1], [0, 0, 1, 1], [], []>} : vector<8x128xbf16>, vector<128x256xbf16>, vector<8x256xf32> -> vector<8x256xf32>
      %63 = arith.addf %58, %62 : vector<8x256xf32>
      %c0_31 = arith.constant 0 : index
      %c0_32 = arith.constant 0 : index
      %64 = vector.load %arg8[%c0_31, %c0_32] : memref<1x256xf32, #tpu.memory_space<vmem>>, vector<1x256xf32>
      %65 = vector.broadcast %64 : vector<1x256xf32> to vector<8x256xf32>
      %66 = arith.addf %63, %65 : vector<8x256xf32>
      %cst_33 = arith.constant 0.000000e+00 : f32
      %67 = vector.broadcast %cst_33 : f32 to vector<8x256xf32>
      %68 = arith.subf %67, %66 : vector<8x256xf32>
      %69 = math.exp %68 : vector<8x256xf32>
      %cst_34 = arith.constant 1.000000e+00 : f32
      %70 = vector.broadcast %cst_34 : f32 to vector<8x256xf32>
      %71 = arith.addf %70, %69 : vector<8x256xf32>
      %cst_35 = arith.constant 1.000000e+00 : f32
      %72 = vector.broadcast %cst_35 : f32 to vector<8x256xf32>
      %73 = arith.divf %72, %71 : vector<8x256xf32>
      %74 = arith.mulf %66, %73 : vector<8x256xf32>
      %75 = arith.truncf %74 : vector<8x256xf32> to vector<8x256xbf16>
      %c0_36 = arith.constant 0 : index
      %c0_37 = arith.constant 0 : index
      %76 = vector.load %arg9[%c0_36, %c0_37] : memref<256x256xbf16, #tpu.memory_space<vmem>>, vector<256x256xbf16>
      %cst_38 = arith.constant dense<0.000000e+00> : vector<8x256xf32>
      %77 = tpu.matmul %75, %76, %cst_38 {dimension_numbers = #tpu.dot_dimension_numbers<[1], [0], [0], [1], [0, 0, 1, 1], [], []>} : vector<8x256xbf16>, vector<256x256xbf16>, vector<8x256xf32> -> vector<8x256xf32>
      %c0_39 = arith.constant 0 : index
      %c0_40 = arith.constant 0 : index
      %78 = vector.load %arg4[%c0_39, %c0_40] : memref<8x128xf32, #tpu.memory_space<vmem>>, vector<8x128xf32>
      %79 = arith.truncf %78 : vector<8x128xf32> to vector<8x128xbf16>
      %c0_41 = arith.constant 0 : index
      %c0_42 = arith.constant 0 : index
      %80 = vector.load %arg10[%c0_41, %c0_42] : memref<128x256xbf16, #tpu.memory_space<vmem>>, vector<128x256xbf16>
      %cst_43 = arith.constant dense<0.000000e+00> : vector<8x256xf32>
      %81 = tpu.matmul %79, %80, %cst_43 {dimension_numbers = #tpu.dot_dimension_numbers<[1], [0], [0], [1], [0, 0, 1, 1], [], []>} : vector<8x128xbf16>, vector<128x256xbf16>, vector<8x256xf32> -> vector<8x256xf32>
      %82 = arith.addf %77, %81 : vector<8x256xf32>
      %c0_44 = arith.constant 0 : index
      %c0_45 = arith.constant 0 : index
      %83 = vector.load %arg11[%c0_44, %c0_45] : memref<1x256xf32, #tpu.memory_space<vmem>>, vector<1x256xf32>
      %84 = vector.broadcast %83 : vector<1x256xf32> to vector<8x256xf32>
      %85 = arith.addf %82, %84 : vector<8x256xf32>
      %c0_46 = arith.constant 0 : index
      %c0_47 = arith.constant 0 : index
      %86 = vector.load %arg22[%c0_46, %c0_47] : memref<8x256xf32, #tpu.memory_space<vmem>>, vector<8x256xf32>
      tpu.vector_store %arg22[%c0_46, %c0_47], %85 {strides = array<i32>} : memref<8x256xf32, #tpu.memory_space<vmem>>, vector<8x256xf32>,
      %c0_48 = arith.constant 0 : index
      %c0_49 = arith.constant 0 : index
      %87 = vector.load %arg5[%c0_48, %c0_49] : memref<8x256xf32, #tpu.memory_space<vmem>>, vector<8x256xf32>
      %88 = arith.truncf %87 : vector<8x256xf32> to vector<8x256xbf16>
      %c0_50 = arith.constant 0 : index
      %c0_51 = arith.constant 0 : index
      %89 = vector.load %arg12[%c0_50, %c0_51] : memref<256x256xbf16, #tpu.memory_space<vmem>>, vector<256x256xbf16>
      %cst_52 = arith.constant dense<0.000000e+00> : vector<8x256xf32>
      %90 = tpu.matmul %88, %89, %cst_52 {dimension_numbers = #tpu.dot_dimension_numbers<[1], [0], [0], [1], [0, 0, 1, 1], [], []>} : vector<8x256xbf16>, vector<256x256xbf16>, vector<8x256xf32> -> vector<8x256xf32>
      %c0_53 = arith.constant 0 : index
      %c0_54 = arith.constant 0 : index
      %91 = vector.load %arg13[%c0_53, %c0_54] : memref<1x256xf32, #tpu.memory_space<vmem>>, vector<1x256xf32>
      %92 = vector.broadcast %91 : vector<1x256xf32> to vector<8x256xf32>
      %93 = arith.addf %90, %92 : vector<8x256xf32>
      %c0_55 = arith.constant 0 : index
      %c0_56 = arith.constant 0 : index
      %94 = vector.load %arg14[%c0_55, %c0_56] : memref<1x256xf32, #tpu.memory_space<vmem>>, vector<1x256xf32>
      %c0_57 = arith.constant 0 : index
      %c0_58 = arith.constant 0 : index
      %95 = vector.load %arg15[%c0_57, %c0_58] : memref<1x256xf32, #tpu.memory_space<vmem>>, vector<1x256xf32>
      %cst_59 = arith.constant dense<0.000000e+00> : vector<8xf32>
      %96 = vector.multi_reduction <add>, %93, %cst_59 [1] : vector<8x256xf32> to vector<8xf32>
      %97 = vector.shape_cast %96 : vector<8xf32> to vector<8x1xf32>
      %cst_60 = arith.constant 2.560000e+02 : f32
      %98 = vector.broadcast %cst_60 : f32 to vector<8x1xf32>
      %99 = arith.divf %97, %98 : vector<8x1xf32>
      %100 = vector.broadcast %99 : vector<8x1xf32> to vector<8x256xf32>
      %101 = arith.subf %93, %100 : vector<8x256xf32>
      %102 = arith.mulf %101, %101 : vector<8x256xf32>
      %cst_61 = arith.constant dense<0.000000e+00> : vector<8xf32>
      %103 = vector.multi_reduction <add>, %102, %cst_61 [1] : vector<8x256xf32> to vector<8xf32>
      %104 = vector.shape_cast %103 : vector<8xf32> to vector<8x1xf32>
      %cst_62 = arith.constant 2.560000e+02 : f32
      %105 = vector.broadcast %cst_62 : f32 to vector<8x1xf32>
      %106 = arith.divf %104, %105 : vector<8x1xf32>
      %cst_63 = arith.constant 9.99999974E-6 : f32
      %107 = vector.broadcast %cst_63 : f32 to vector<8x1xf32>
      %108 = arith.addf %106, %107 : vector<8x1xf32>
      %109 = math.rsqrt %108 : vector<8x1xf32>
      %110 = vector.broadcast %109 : vector<8x1xf32> to vector<8x256xf32>
      %111 = arith.mulf %101, %110 : vector<8x256xf32>
      %112 = vector.broadcast %94 : vector<1x256xf32> to vector<8x256xf32>
      %113 = arith.mulf %111, %112 : vector<8x256xf32>
      %114 = vector.broadcast %95 : vector<1x256xf32> to vector<8x256xf32>
      %115 = arith.addf %113, %114 : vector<8x256xf32>
      %cst_64 = arith.constant 0.000000e+00 : f32
      %116 = vector.broadcast %cst_64 : f32 to vector<8x256xf32>
      %117 = arith.subf %116, %115 : vector<8x256xf32>
      %118 = math.exp %117 : vector<8x256xf32>
      %cst_65 = arith.constant 1.000000e+00 : f32
      %119 = vector.broadcast %cst_65 : f32 to vector<8x256xf32>
      %120 = arith.addf %119, %118 : vector<8x256xf32>
      %cst_66 = arith.constant 1.000000e+00 : f32
      %121 = vector.broadcast %cst_66 : f32 to vector<8x256xf32>
      %122 = arith.divf %121, %120 : vector<8x256xf32>
      %123 = arith.mulf %115, %122 : vector<8x256xf32>
      %c0_67 = arith.constant 0 : index
      %c0_68 = arith.constant 0 : index
      %124 = vector.load %arg21[%c0_67, %c0_68] : memref<8x256xf32, #tpu.memory_space<vmem>>, vector<8x256xf32>
      tpu.vector_store %arg21[%c0_67, %c0_68], %123 {strides = array<i32>} : memref<8x256xf32, #tpu.memory_space<vmem>>, vector<8x256xf32>,
    } else {
    }
    %c0 = arith.constant 0 : index
    %c0_1 = arith.constant 0 : index
    %c0_2 = arith.constant 0 : index
    %3 = vector.load %arg16[%c0, %c0_1, %c0_2] : memref<1x256x256xbf16, #tpu.memory_space<vmem>>, vector<1x256x256xbf16>
    %4 = vector.shape_cast %3 : vector<1x256x256xbf16> to vector<256x256xbf16>
    %c0_3 = arith.constant 0 : index
    %c0_4 = arith.constant 0 : index
    %c0_5 = arith.constant 0 : index
    %5 = vector.load %arg17[%c0_3, %c0_4, %c0_5] : memref<1x3x256xf32, #tpu.memory_space<vmem>>, vector<1x3x256xf32>
    %6 = vector.shape_cast %5 : vector<1x3x256xf32> to vector<3x256xf32>
    %c0_6 = arith.constant 0 : index
    %c0_7 = arith.constant 0 : index
    %7 = vector.load %arg21[%c0_6, %c0_7] : memref<8x256xf32, #tpu.memory_space<vmem>>, vector<8x256xf32>
    %c0_8 = arith.constant 0 : index
    %c0_9 = arith.constant 0 : index
    %8 = vector.load %arg22[%c0_8, %c0_9] : memref<8x256xf32, #tpu.memory_space<vmem>>, vector<8x256xf32>
    %9 = arith.addf %7, %8 : vector<8x256xf32>
    %10 = arith.truncf %9 : vector<8x256xf32> to vector<8x256xbf16>
    %cst = arith.constant dense<0.000000e+00> : vector<8x256xf32>
    %11 = tpu.matmul %10, %4, %cst {dimension_numbers = #tpu.dot_dimension_numbers<[1], [0], [0], [1], [0, 0, 1, 1], [], []>} : vector<8x256xbf16>, vector<256x256xbf16>, vector<8x256xf32> -> vector<8x256xf32>
    %12 = vector.extract_strided_slice %6 {offsets = [0, 0], sizes = [1, 256], strides = [1, 1]} : vector<3x256xf32> to vector<1x256xf32>
    %13 = vector.broadcast %12 : vector<1x256xf32> to vector<8x256xf32>
    %14 = arith.addf %11, %13 : vector<8x256xf32>
    %15 = vector.extract_strided_slice %6 {offsets = [1, 0], sizes = [1, 256], strides = [1, 1]} : vector<3x256xf32> to vector<1x256xf32>
    %16 = vector.extract_strided_slice %6 {offsets = [2, 0], sizes = [1, 256], strides = [1, 1]} : vector<3x256xf32> to vector<1x256xf32>
    %cst_10 = arith.constant dense<0.000000e+00> : vector<8xf32>
    %17 = vector.multi_reduction <add>, %14, %cst_10 [1] : vector<8x256xf32> to vector<8xf32>
    %18 = vector.shape_cast %17 : vector<8xf32> to vector<8x1xf32>
    %cst_11 = arith.constant 2.560000e+02 : f32
    %19 = vector.broadcast %cst_11 : f32 to vector<8x1xf32>
    %20 = arith.divf %18, %19 : vector<8x1xf32>
    %21 = vector.broadcast %20 : vector<8x1xf32> to vector<8x256xf32>
    %22 = arith.subf %14, %21 : vector<8x256xf32>
    %23 = arith.mulf %22, %22 : vector<8x256xf32>
    %cst_12 = arith.constant dense<0.000000e+00> : vector<8xf32>
    %24 = vector.multi_reduction <add>, %23, %cst_12 [1] : vector<8x256xf32> to vector<8xf32>
    %25 = vector.shape_cast %24 : vector<8xf32> to vector<8x1xf32>
    %cst_13 = arith.constant 2.560000e+02 : f32
    %26 = vector.broadcast %cst_13 : f32 to vector<8x1xf32>
    %27 = arith.divf %25, %26 : vector<8x1xf32>
    %cst_14 = arith.constant 9.99999974E-6 : f32
    %28 = vector.broadcast %cst_14 : f32 to vector<8x1xf32>
    %29 = arith.addf %27, %28 : vector<8x1xf32>
    %30 = math.rsqrt %29 : vector<8x1xf32>
    %31 = vector.broadcast %30 : vector<8x1xf32> to vector<8x256xf32>
    %32 = arith.mulf %22, %31 : vector<8x256xf32>
    %33 = vector.broadcast %15 : vector<1x256xf32> to vector<8x256xf32>
    %34 = arith.mulf %32, %33 : vector<8x256xf32>
    %35 = vector.broadcast %16 : vector<1x256xf32> to vector<8x256xf32>
    %36 = arith.addf %34, %35 : vector<8x256xf32>
    %cst_15 = arith.constant 0.000000e+00 : f32
    %37 = vector.broadcast %cst_15 : f32 to vector<8x256xf32>
    %38 = arith.subf %37, %36 : vector<8x256xf32>
    %39 = math.exp %38 : vector<8x256xf32>
    %cst_16 = arith.constant 1.000000e+00 : f32
    %40 = vector.broadcast %cst_16 : f32 to vector<8x256xf32>
    %41 = arith.addf %40, %39 : vector<8x256xf32>
    %cst_17 = arith.constant 1.000000e+00 : f32
    %42 = vector.broadcast %cst_17 : f32 to vector<8x256xf32>
    %43 = arith.divf %42, %41 : vector<8x256xf32>
    %44 = arith.mulf %36, %43 : vector<8x256xf32>
    %45 = arith.addf %44, %9 : vector<8x256xf32>
    %c0_18 = arith.constant 0 : index
    %c0_19 = arith.constant 0 : index
    %46 = vector.load %arg21[%c0_18, %c0_19] : memref<8x256xf32, #tpu.memory_space<vmem>>, vector<8x256xf32>
    tpu.vector_store %arg21[%c0_18, %c0_19], %45 {strides = array<i32>} : memref<8x256xf32, #tpu.memory_space<vmem>>, vector<8x256xf32>,
    %c3_i32 = arith.constant 3 : i32
    %47 = arith.cmpi eq, %arg1, %c3_i32 : i32
    %48 = arith.extui %47 : i1 to i32
    %c0_i32_20 = arith.constant 0 : i32
    %49 = arith.cmpi ne, %48, %c0_i32_20 : i32
    scf.if %49 {
      %c0_21 = arith.constant 0 : index
      %c0_22 = arith.constant 0 : index
      %50 = vector.load %arg21[%c0_21, %c0_22] : memref<8x256xf32, #tpu.memory_space<vmem>>, vector<8x256xf32>
      %51 = arith.truncf %50 : vector<8x256xf32> to vector<8x256xbf16>
      %c0_23 = arith.constant 0 : index
      %c0_24 = arith.constant 0 : index
      %52 = vector.load %arg18[%c0_23, %c0_24] : memref<256x256xbf16, #tpu.memory_space<vmem>>, vector<256x256xbf16>
      %cst_25 = arith.constant dense<0.000000e+00> : vector<8x256xf32>
      %53 = tpu.matmul %51, %52, %cst_25 {dimension_numbers = #tpu.dot_dimension_numbers<[1], [0], [0], [1], [0, 0, 1, 1], [], []>} : vector<8x256xbf16>, vector<256x256xbf16>, vector<8x256xf32> -> vector<8x256xf32>
      %c0_26 = arith.constant 0 : index
      %c0_27 = arith.constant 0 : index
      %54 = vector.load %arg19[%c0_26, %c0_27] : memref<1x256xf32, #tpu.memory_space<vmem>>, vector<1x256xf32>
      %55 = vector.broadcast %54 : vector<1x256xf32> to vector<8x256xf32>
      %56 = arith.addf %53, %55 : vector<8x256xf32>
      %c0_28 = arith.constant 0 : index
      %c0_29 = arith.constant 0 : index
      %57 = vector.load %arg20[%c0_28, %c0_29] : memref<8x256xf32, #tpu.memory_space<vmem>>, vector<8x256xf32>
      tpu.vector_store %arg20[%c0_28, %c0_29], %56 {strides = array<i32>} : memref<8x256xf32, #tpu.memory_space<vmem>>, vector<8x256xf32>,
    } else {
    }
    return
  }
  func.func @transform_0(%arg0: i32, %arg1: i32) -> (i32, i32) {
    %c0_i32 = arith.constant 0 : i32
    %c0_i32_0 = arith.constant 0 : i32
    return %arg0, %c0_i32 : i32, i32
  }
  func.func @transform_1(%arg0: i32, %arg1: i32) -> (i32, i32) {
    %c0_i32 = arith.constant 0 : i32
    %c0_i32_0 = arith.constant 0 : i32
    %c0_i32_1 = arith.constant 0 : i32
    return %c0_i32, %c0_i32_0 : i32, i32
  }
  func.func @transform_2(%arg0: i32, %arg1: i32) -> (i32, i32) {
    %c0_i32 = arith.constant 0 : i32
    %c0_i32_0 = arith.constant 0 : i32
    return %arg0, %c0_i32 : i32, i32
  }
  func.func @transform_3(%arg0: i32, %arg1: i32) -> (i32, i32) {
    %c0_i32 = arith.constant 0 : i32
    %c0_i32_0 = arith.constant 0 : i32
    return %arg0, %c0_i32 : i32, i32
  }
  func.func @transform_4(%arg0: i32, %arg1: i32) -> (i32, i32) {
    %c0_i32 = arith.constant 0 : i32
    %c0_i32_0 = arith.constant 0 : i32
    %c0_i32_1 = arith.constant 0 : i32
    return %c0_i32, %c0_i32_0 : i32, i32
  }
  func.func @transform_5(%arg0: i32, %arg1: i32) -> (i32, i32) {
    %c0_i32 = arith.constant 0 : i32
    %c0_i32_0 = arith.constant 0 : i32
    %c0_i32_1 = arith.constant 0 : i32
    return %c0_i32, %c0_i32_0 : i32, i32
  }
  func.func @transform_6(%arg0: i32, %arg1: i32) -> (i32, i32) {
    %c0_i32 = arith.constant 0 : i32
    %c0_i32_0 = arith.constant 0 : i32
    %c0_i32_1 = arith.constant 0 : i32
    return %c0_i32, %c0_i32_0 : i32, i32
  }
  func.func @transform_7(%arg0: i32, %arg1: i32) -> (i32, i32) {
    %c0_i32 = arith.constant 0 : i32
    %c0_i32_0 = arith.constant 0 : i32
    %c0_i32_1 = arith.constant 0 : i32
    return %c0_i32, %c0_i32_0 : i32, i32
  }
  func.func @transform_8(%arg0: i32, %arg1: i32) -> (i32, i32) {
    %c0_i32 = arith.constant 0 : i32
    %c0_i32_0 = arith.constant 0 : i32
    %c0_i32_1 = arith.constant 0 : i32
    return %c0_i32, %c0_i32_0 : i32, i32
  }
  func.func @transform_9(%arg0: i32, %arg1: i32) -> (i32, i32) {
    %c0_i32 = arith.constant 0 : i32
    %c0_i32_0 = arith.constant 0 : i32
    %c0_i32_1 = arith.constant 0 : i32
    return %c0_i32, %c0_i32_0 : i32, i32
  }
  func.func @transform_10(%arg0: i32, %arg1: i32) -> (i32, i32) {
    %c0_i32 = arith.constant 0 : i32
    %c0_i32_0 = arith.constant 0 : i32
    %c0_i32_1 = arith.constant 0 : i32
    return %c0_i32, %c0_i32_0 : i32, i32
  }
  func.func @transform_11(%arg0: i32, %arg1: i32) -> (i32, i32) {
    %c0_i32 = arith.constant 0 : i32
    %c0_i32_0 = arith.constant 0 : i32
    %c0_i32_1 = arith.constant 0 : i32
    return %c0_i32, %c0_i32_0 : i32, i32
  }
  func.func @transform_12(%arg0: i32, %arg1: i32) -> (i32, i32) {
    %c0_i32 = arith.constant 0 : i32
    %c0_i32_0 = arith.constant 0 : i32
    %c0_i32_1 = arith.constant 0 : i32
    return %c0_i32, %c0_i32_0 : i32, i32
  }
  func.func @transform_13(%arg0: i32, %arg1: i32) -> (i32, i32) {
    %c0_i32 = arith.constant 0 : i32
    %c0_i32_0 = arith.constant 0 : i32
    %c0_i32_1 = arith.constant 0 : i32
    return %c0_i32, %c0_i32_0 : i32, i32
  }
  func.func @transform_14(%arg0: i32, %arg1: i32) -> (i32, i32, i32) {
    %c0_i32 = arith.constant 0 : i32
    %c0_i32_0 = arith.constant 0 : i32
    %c0_i32_1 = arith.constant 0 : i32
    return %arg1, %c0_i32, %c0_i32_0 : i32, i32, i32
  }
  func.func @transform_15(%arg0: i32, %arg1: i32) -> (i32, i32, i32) {
    %c0_i32 = arith.constant 0 : i32
    %c0_i32_0 = arith.constant 0 : i32
    %c0_i32_1 = arith.constant 0 : i32
    return %arg1, %c0_i32, %c0_i32_0 : i32, i32, i32
  }
  func.func @transform_16(%arg0: i32, %arg1: i32) -> (i32, i32) {
    %c0_i32 = arith.constant 0 : i32
    %c0_i32_0 = arith.constant 0 : i32
    %c0_i32_1 = arith.constant 0 : i32
    return %c0_i32, %c0_i32_0 : i32, i32
  }
  func.func @transform_17(%arg0: i32, %arg1: i32) -> (i32, i32) {
    %c0_i32 = arith.constant 0 : i32
    %c0_i32_0 = arith.constant 0 : i32
    %c0_i32_1 = arith.constant 0 : i32
    return %c0_i32, %c0_i32_0 : i32, i32
  }
  func.func @transform_18(%arg0: i32, %arg1: i32) -> (i32, i32) {
    %c0_i32 = arith.constant 0 : i32
    %c0_i32_0 = arith.constant 0 : i32
    return %arg0, %c0_i32 : i32, i32
  }
}

module attributes {stable_mosaic.version = 11 : i64} {
  func.func @diffusion_prior_kernel(%arg0: i32, %arg1: i32, %arg2: memref<8x1xf32, #tpu.memory_space<vmem>>, %arg3: memref<1x128xf32, #tpu.memory_space<vmem>>, %arg4: memref<8x128xf32, #tpu.memory_space<vmem>>, %arg5: memref<8x256xf32, #tpu.memory_space<vmem>>, %arg6: memref<128x256xbf16, #tpu.memory_space<vmem>>, %arg7: memref<128x256xbf16, #tpu.memory_space<vmem>>, %arg8: memref<1x256xf32, #tpu.memory_space<vmem>>, %arg9: memref<256x256xbf16, #tpu.memory_space<vmem>>, %arg10: memref<128x256xbf16, #tpu.memory_space<vmem>>, %arg11: memref<1x256xf32, #tpu.memory_space<vmem>>, %arg12: memref<256x256xbf16, #tpu.memory_space<vmem>>, %arg13: memref<1x256xf32, #tpu.memory_space<vmem>>, %arg14: memref<1x256xf32, #tpu.memory_space<vmem>>, %arg15: memref<1x256xf32, #tpu.memory_space<vmem>>, %arg16: memref<1x256x256xbf16, #tpu.memory_space<vmem>>, %arg17: memref<1x3x256xf32, #tpu.memory_space<vmem>>, %arg18: memref<256x256xbf16, #tpu.memory_space<vmem>>, %arg19: memref<1x256xf32, #tpu.memory_space<vmem>>, %arg20: memref<8x256xf32, #tpu.memory_space<vmem>>, %arg21: memref<8x256xf32, #tpu.memory_space<vmem>>, %arg22: memref<8x256xf32, #tpu.memory_space<vmem>>) attributes {dimension_semantics = [#tpu.dimension_semantics<parallel>, #tpu.dimension_semantics<arbitrary>], iteration_bounds = array<i64: 1, 4>, scalar_prefetch = 0 : i64, scratch_operands = 2 : i64, tpu.core_type = #tpu.core_type<tc>, window_params = [{transform_indices = @transform_0, window_bounds = array<i64: 8, 1>}, {pipeline_mode = #tpu.pipeline_mode<synchronous>, transform_indices = @transform_1, window_bounds = array<i64: 1, 128>}, {transform_indices = @transform_2, window_bounds = array<i64: 8, 128>}, {transform_indices = @transform_3, window_bounds = array<i64: 8, 256>}, {pipeline_mode = #tpu.pipeline_mode<synchronous>, transform_indices = @transform_4, window_bounds = array<i64: 128, 256>}, {pipeline_mode = #tpu.pipeline_mode<synchronous>, transform_indices = @transform_5, window_bounds = array<i64: 128, 256>}, {pipeline_mode = #tpu.pipeline_mode<synchronous>, transform_indices = @transform_6, window_bounds = array<i64: 1, 256>}, {pipeline_mode = #tpu.pipeline_mode<synchronous>, transform_indices = @transform_7, window_bounds = array<i64: 256, 256>}, {pipeline_mode = #tpu.pipeline_mode<synchronous>, transform_indices = @transform_8, window_bounds = array<i64: 128, 256>}, {pipeline_mode = #tpu.pipeline_mode<synchronous>, transform_indices = @transform_9, window_bounds = array<i64: 1, 256>}, {pipeline_mode = #tpu.pipeline_mode<synchronous>, transform_indices = @transform_10, window_bounds = array<i64: 256, 256>}, {pipeline_mode = #tpu.pipeline_mode<synchronous>, transform_indices = @transform_11, window_bounds = array<i64: 1, 256>}, {pipeline_mode = #tpu.pipeline_mode<synchronous>, transform_indices = @transform_12, window_bounds = array<i64: 1, 256>}, {pipeline_mode = #tpu.pipeline_mode<synchronous>, transform_indices = @transform_13, window_bounds = array<i64: 1, 256>}, {transform_indices = @transform_14, window_bounds = array<i64: 1, 256, 256>}, {transform_indices = @transform_15, window_bounds = array<i64: 1, 3, 256>}, {pipeline_mode = #tpu.pipeline_mode<synchronous>, transform_indices = @transform_16, window_bounds = array<i64: 256, 256>}, {pipeline_mode = #tpu.pipeline_mode<synchronous>, transform_indices = @transform_17, window_bounds = array<i64: 1, 256>}, {transform_indices = @transform_18, window_bounds = array<i64: 8, 256>}]} {
    %c0_i32 = arith.constant 0 : i32
    %0 = arith.cmpi eq, %arg1, %c0_i32 : i32
    %1 = arith.extui %0 : i1 to i32
    %c0_i32_0 = arith.constant 0 : i32
    %2 = arith.cmpi ne, %1, %c0_i32_0 : i32
    scf.if %2 {
      %c0_21 = arith.constant 0 : index
      %c0_22 = arith.constant 0 : index
      %50 = vector.load %arg2[%c0_21, %c0_22] : memref<8x1xf32, #tpu.memory_space<vmem>>, vector<8x1xf32>
      %c0_23 = arith.constant 0 : index
      %c0_24 = arith.constant 0 : index
      %51 = vector.load %arg3[%c0_23, %c0_24] : memref<1x128xf32, #tpu.memory_space<vmem>>, vector<1x128xf32>
      %52 = vector.broadcast %50 : vector<8x1xf32> to vector<8x128xf32>
      %53 = vector.broadcast %51 : vector<1x128xf32> to vector<8x128xf32>
      %54 = arith.mulf %52, %53 : vector<8x128xf32>
      %55 = math.cos %54 : vector<8x128xf32>
      %56 = arith.truncf %55 : vector<8x128xf32> to vector<8x128xbf16>
      %c0_25 = arith.constant 0 : index
      %c0_26 = arith.constant 0 : index
      %57 = vector.load %arg6[%c0_25, %c0_26] : memref<128x256xbf16, #tpu.memory_space<vmem>>, vector<128x256xbf16>
      %cst_27 = arith.constant dense<0.000000e+00> : vector<8x256xf32>
      %58 = tpu.matmul %56, %57, %cst_27 {dimension_numbers = #tpu.dot_dimension_numbers<[1], [0], [0], [1], [0, 0, 1, 1], [], []>} : vector<8x128xbf16>, vector<128x256xbf16>, vector<8x256xf32> -> vector<8x256xf32>
      %59 = math.sin %54 : vector<8x128xf32>
      %60 = arith.truncf %59 : vector<8x128xf32> to vector<8x128xbf16>
      %c0_28 = arith.constant 0 : index
      %c0_29 = arith.constant 0 : index
      %61 = vector.load %arg7[%c0_28, %c0_29] : memref<128x256xbf16, #tpu.memory_space<vmem>>, vector<128x256xbf16>
      %cst_30 = arith.constant dense<0.000000e+00> : vector<8x256xf32>
      %62 = tpu.matmul %60, %61, %cst_30 {dimension_numbers = #tpu.dot_dimension_numbers<[1], [0], [0], [1], [0, 0, 1, 1], [], []>} : vector<8x128xbf16>, vector<128x256xbf16>, vector<8x256xf32> -> vector<8x256xf32>
      %63 = arith.addf %58, %62 : vector<8x256xf32>
      %c0_31 = arith.constant 0 : index
      %c0_32 = arith.constant 0 : index
      %64 = vector.load %arg8[%c0_31, %c0_32] : memref<1x256xf32, #tpu.memory_space<vmem>>, vector<1x256xf32>
      %65 = vector.broadcast %64 : vector<1x256xf32> to vector<8x256xf32>
      %66 = arith.addf %63, %65 : vector<8x256xf32>
      %cst_33 = arith.constant 0.000000e+00 : f32
      %67 = vector.broadcast %cst_33 : f32 to vector<8x256xf32>
      %68 = arith.subf %67, %66 : vector<8x256xf32>
      %69 = math.exp %68 : vector<8x256xf32>
      %cst_34 = arith.constant 1.000000e+00 : f32
      %70 = vector.broadcast %cst_34 : f32 to vector<8x256xf32>
      %71 = arith.addf %70, %69 : vector<8x256xf32>
      %cst_35 = arith.constant 1.000000e+00 : f32
      %72 = vector.broadcast %cst_35 : f32 to vector<8x256xf32>
      %73 = arith.divf %72, %71 : vector<8x256xf32>
      %74 = arith.mulf %66, %73 : vector<8x256xf32>
      %75 = arith.truncf %74 : vector<8x256xf32> to vector<8x256xbf16>
      %c0_36 = arith.constant 0 : index
      %c0_37 = arith.constant 0 : index
      %76 = vector.load %arg9[%c0_36, %c0_37] : memref<256x256xbf16, #tpu.memory_space<vmem>>, vector<256x256xbf16>
      %cst_38 = arith.constant dense<0.000000e+00> : vector<8x256xf32>
      %77 = tpu.matmul %75, %76, %cst_38 {dimension_numbers = #tpu.dot_dimension_numbers<[1], [0], [0], [1], [0, 0, 1, 1], [], []>} : vector<8x256xbf16>, vector<256x256xbf16>, vector<8x256xf32> -> vector<8x256xf32>
      %c0_39 = arith.constant 0 : index
      %c0_40 = arith.constant 0 : index
      %78 = vector.load %arg4[%c0_39, %c0_40] : memref<8x128xf32, #tpu.memory_space<vmem>>, vector<8x128xf32>
      %79 = arith.truncf %78 : vector<8x128xf32> to vector<8x128xbf16>
      %c0_41 = arith.constant 0 : index
      %c0_42 = arith.constant 0 : index
      %80 = vector.load %arg10[%c0_41, %c0_42] : memref<128x256xbf16, #tpu.memory_space<vmem>>, vector<128x256xbf16>
      %cst_43 = arith.constant dense<0.000000e+00> : vector<8x256xf32>
      %81 = tpu.matmul %79, %80, %cst_43 {dimension_numbers = #tpu.dot_dimension_numbers<[1], [0], [0], [1], [0, 0, 1, 1], [], []>} : vector<8x128xbf16>, vector<128x256xbf16>, vector<8x256xf32> -> vector<8x256xf32>
      %82 = arith.addf %77, %81 : vector<8x256xf32>
      %c0_44 = arith.constant 0 : index
      %c0_45 = arith.constant 0 : index
      %83 = vector.load %arg11[%c0_44, %c0_45] : memref<1x256xf32, #tpu.memory_space<vmem>>, vector<1x256xf32>
      %84 = vector.broadcast %83 : vector<1x256xf32> to vector<8x256xf32>
      %85 = arith.addf %82, %84 : vector<8x256xf32>
      %c0_46 = arith.constant 0 : index
      %c0_47 = arith.constant 0 : index
      %86 = vector.load %arg22[%c0_46, %c0_47] : memref<8x256xf32, #tpu.memory_space<vmem>>, vector<8x256xf32>
      tpu.vector_store %arg22[%c0_46, %c0_47], %85 {strides = array<i32>} : memref<8x256xf32, #tpu.memory_space<vmem>>, vector<8x256xf32>,
      %c0_48 = arith.constant 0 : index
      %c0_49 = arith.constant 0 : index
      %87 = vector.load %arg5[%c0_48, %c0_49] : memref<8x256xf32, #tpu.memory_space<vmem>>, vector<8x256xf32>
      %88 = arith.truncf %87 : vector<8x256xf32> to vector<8x256xbf16>
      %c0_50 = arith.constant 0 : index
      %c0_51 = arith.constant 0 : index
      %89 = vector.load %arg12[%c0_50, %c0_51] : memref<256x256xbf16, #tpu.memory_space<vmem>>, vector<256x256xbf16>
      %cst_52 = arith.constant dense<0.000000e+00> : vector<8x256xf32>
      %90 = tpu.matmul %88, %89, %cst_52 {dimension_numbers = #tpu.dot_dimension_numbers<[1], [0], [0], [1], [0, 0, 1, 1], [], []>} : vector<8x256xbf16>, vector<256x256xbf16>, vector<8x256xf32> -> vector<8x256xf32>
      %c0_53 = arith.constant 0 : index
      %c0_54 = arith.constant 0 : index
      %91 = vector.load %arg13[%c0_53, %c0_54] : memref<1x256xf32, #tpu.memory_space<vmem>>, vector<1x256xf32>
      %92 = vector.broadcast %91 : vector<1x256xf32> to vector<8x256xf32>
      %93 = arith.addf %90, %92 : vector<8x256xf32>
      %c0_55 = arith.constant 0 : index
      %c0_56 = arith.constant 0 : index
      %94 = vector.load %arg14[%c0_55, %c0_56] : memref<1x256xf32, #tpu.memory_space<vmem>>, vector<1x256xf32>
      %c0_57 = arith.constant 0 : index
      %c0_58 = arith.constant 0 : index
      %95 = vector.load %arg15[%c0_57, %c0_58] : memref<1x256xf32, #tpu.memory_space<vmem>>, vector<1x256xf32>
      %cst_59 = arith.constant dense<0.000000e+00> : vector<8xf32>
      %96 = vector.multi_reduction <add>, %93, %cst_59 [1] : vector<8x256xf32> to vector<8xf32>
      %97 = vector.shape_cast %96 : vector<8xf32> to vector<8x1xf32>
      %cst_60 = arith.constant 2.560000e+02 : f32
      %98 = vector.broadcast %cst_60 : f32 to vector<8x1xf32>
      %99 = arith.divf %97, %98 : vector<8x1xf32>
      %100 = vector.broadcast %99 : vector<8x1xf32> to vector<8x256xf32>
      %101 = arith.subf %93, %100 : vector<8x256xf32>
      %102 = arith.mulf %101, %101 : vector<8x256xf32>
      %cst_61 = arith.constant dense<0.000000e+00> : vector<8xf32>
      %103 = vector.multi_reduction <add>, %102, %cst_61 [1] : vector<8x256xf32> to vector<8xf32>
      %104 = vector.shape_cast %103 : vector<8xf32> to vector<8x1xf32>
      %cst_62 = arith.constant 2.560000e+02 : f32
      %105 = vector.broadcast %cst_62 : f32 to vector<8x1xf32>
      %106 = arith.divf %104, %105 : vector<8x1xf32>
      %cst_63 = arith.constant 9.99999974E-6 : f32
      %107 = vector.broadcast %cst_63 : f32 to vector<8x1xf32>
      %108 = arith.addf %106, %107 : vector<8x1xf32>
      %109 = math.rsqrt %108 : vector<8x1xf32>
      %110 = vector.broadcast %109 : vector<8x1xf32> to vector<8x256xf32>
      %111 = arith.mulf %101, %110 : vector<8x256xf32>
      %112 = vector.broadcast %94 : vector<1x256xf32> to vector<8x256xf32>
      %113 = arith.mulf %111, %112 : vector<8x256xf32>
      %114 = vector.broadcast %95 : vector<1x256xf32> to vector<8x256xf32>
      %115 = arith.addf %113, %114 : vector<8x256xf32>
      %cst_64 = arith.constant 0.000000e+00 : f32
      %116 = vector.broadcast %cst_64 : f32 to vector<8x256xf32>
      %117 = arith.subf %116, %115 : vector<8x256xf32>
      %118 = math.exp %117 : vector<8x256xf32>
      %cst_65 = arith.constant 1.000000e+00 : f32
      %119 = vector.broadcast %cst_65 : f32 to vector<8x256xf32>
      %120 = arith.addf %119, %118 : vector<8x256xf32>
      %cst_66 = arith.constant 1.000000e+00 : f32
      %121 = vector.broadcast %cst_66 : f32 to vector<8x256xf32>
      %122 = arith.divf %121, %120 : vector<8x256xf32>
      %123 = arith.mulf %115, %122 : vector<8x256xf32>
      %c0_67 = arith.constant 0 : index
      %c0_68 = arith.constant 0 : index
      %124 = vector.load %arg21[%c0_67, %c0_68] : memref<8x256xf32, #tpu.memory_space<vmem>>, vector<8x256xf32>
      tpu.vector_store %arg21[%c0_67, %c0_68], %123 {strides = array<i32>} : memref<8x256xf32, #tpu.memory_space<vmem>>, vector<8x256xf32>,
    } else {
    }
    %c0 = arith.constant 0 : index
    %c0_1 = arith.constant 0 : index
    %c0_2 = arith.constant 0 : index
    %3 = vector.load %arg16[%c0, %c0_1, %c0_2] : memref<1x256x256xbf16, #tpu.memory_space<vmem>>, vector<1x256x256xbf16>
    %4 = vector.shape_cast %3 : vector<1x256x256xbf16> to vector<256x256xbf16>
    %c0_3 = arith.constant 0 : index
    %c0_4 = arith.constant 0 : index
    %c0_5 = arith.constant 0 : index
    %5 = vector.load %arg17[%c0_3, %c0_4, %c0_5] : memref<1x3x256xf32, #tpu.memory_space<vmem>>, vector<1x3x256xf32>
    %6 = vector.shape_cast %5 : vector<1x3x256xf32> to vector<3x256xf32>
    %c0_6 = arith.constant 0 : index
    %c0_7 = arith.constant 0 : index
    %7 = vector.load %arg21[%c0_6, %c0_7] : memref<8x256xf32, #tpu.memory_space<vmem>>, vector<8x256xf32>
    %c0_8 = arith.constant 0 : index
    %c0_9 = arith.constant 0 : index
    %8 = vector.load %arg22[%c0_8, %c0_9] : memref<8x256xf32, #tpu.memory_space<vmem>>, vector<8x256xf32>
    %9 = arith.addf %7, %8 : vector<8x256xf32>
    %10 = arith.truncf %9 : vector<8x256xf32> to vector<8x256xbf16>
    %cst = arith.constant dense<0.000000e+00> : vector<8x256xf32>
    %11 = tpu.matmul %10, %4, %cst {dimension_numbers = #tpu.dot_dimension_numbers<[1], [0], [0], [1], [0, 0, 1, 1], [], []>} : vector<8x256xbf16>, vector<256x256xbf16>, vector<8x256xf32> -> vector<8x256xf32>
    %12 = vector.extract_strided_slice %6 {offsets = [0, 0], sizes = [1, 256], strides = [1, 1]} : vector<3x256xf32> to vector<1x256xf32>
    %13 = vector.broadcast %12 : vector<1x256xf32> to vector<8x256xf32>
    %14 = arith.addf %11, %13 : vector<8x256xf32>
    %15 = vector.extract_strided_slice %6 {offsets = [1, 0], sizes = [1, 256], strides = [1, 1]} : vector<3x256xf32> to vector<1x256xf32>
    %16 = vector.extract_strided_slice %6 {offsets = [2, 0], sizes = [1, 256], strides = [1, 1]} : vector<3x256xf32> to vector<1x256xf32>
    %cst_10 = arith.constant dense<0.000000e+00> : vector<8xf32>
    %17 = vector.multi_reduction <add>, %14, %cst_10 [1] : vector<8x256xf32> to vector<8xf32>
    %18 = vector.shape_cast %17 : vector<8xf32> to vector<8x1xf32>
    %cst_11 = arith.constant 2.560000e+02 : f32
    %19 = vector.broadcast %cst_11 : f32 to vector<8x1xf32>
    %20 = arith.divf %18, %19 : vector<8x1xf32>
    %21 = vector.broadcast %20 : vector<8x1xf32> to vector<8x256xf32>
    %22 = arith.subf %14, %21 : vector<8x256xf32>
    %23 = arith.mulf %22, %22 : vector<8x256xf32>
    %cst_12 = arith.constant dense<0.000000e+00> : vector<8xf32>
    %24 = vector.multi_reduction <add>, %23, %cst_12 [1] : vector<8x256xf32> to vector<8xf32>
    %25 = vector.shape_cast %24 : vector<8xf32> to vector<8x1xf32>
    %cst_13 = arith.constant 2.560000e+02 : f32
    %26 = vector.broadcast %cst_13 : f32 to vector<8x1xf32>
    %27 = arith.divf %25, %26 : vector<8x1xf32>
    %cst_14 = arith.constant 9.99999974E-6 : f32
    %28 = vector.broadcast %cst_14 : f32 to vector<8x1xf32>
    %29 = arith.addf %27, %28 : vector<8x1xf32>
    %30 = math.rsqrt %29 : vector<8x1xf32>
    %31 = vector.broadcast %30 : vector<8x1xf32> to vector<8x256xf32>
    %32 = arith.mulf %22, %31 : vector<8x256xf32>
    %33 = vector.broadcast %15 : vector<1x256xf32> to vector<8x256xf32>
    %34 = arith.mulf %32, %33 : vector<8x256xf32>
    %35 = vector.broadcast %16 : vector<1x256xf32> to vector<8x256xf32>
    %36 = arith.addf %34, %35 : vector<8x256xf32>
    %cst_15 = arith.constant 0.000000e+00 : f32
    %37 = vector.broadcast %cst_15 : f32 to vector<8x256xf32>
    %38 = arith.subf %37, %36 : vector<8x256xf32>
    %39 = math.exp %38 : vector<8x256xf32>
    %cst_16 = arith.constant 1.000000e+00 : f32
    %40 = vector.broadcast %cst_16 : f32 to vector<8x256xf32>
    %41 = arith.addf %40, %39 : vector<8x256xf32>
    %cst_17 = arith.constant 1.000000e+00 : f32
    %42 = vector.broadcast %cst_17 : f32 to vector<8x256xf32>
    %43 = arith.divf %42, %41 : vector<8x256xf32>
    %44 = arith.mulf %36, %43 : vector<8x256xf32>
    %45 = arith.addf %44, %9 : vector<8x256xf32>
    %c0_18 = arith.constant 0 : index
    %c0_19 = arith.constant 0 : index
    %46 = vector.load %arg21[%c0_18, %c0_19] : memref<8x256xf32, #tpu.memory_space<vmem>>, vector<8x256xf32>
    tpu.vector_store %arg21[%c0_18, %c0_19], %45 {strides = array<i32>} : memref<8x256xf32, #tpu.memory_space<vmem>>, vector<8x256xf32>,
    %c3_i32 = arith.constant 3 : i32
    %47 = arith.cmpi eq, %arg1, %c3_i32 : i32
    %48 = arith.extui %47 : i1 to i32
    %c0_i32_20 = arith.constant 0 : i32
    %49 = arith.cmpi ne, %48, %c0_i32_20 : i32
    scf.if %49 {
      %c0_21 = arith.constant 0 : index
      %c0_22 = arith.constant 0 : index
      %50 = vector.load %arg21[%c0_21, %c0_22] : memref<8x256xf32, #tpu.memory_space<vmem>>, vector<8x256xf32>
      %51 = arith.truncf %50 : vector<8x256xf32> to vector<8x256xbf16>
      %c0_23 = arith.constant 0 : index
      %c0_24 = arith.constant 0 : index
      %52 = vector.load %arg18[%c0_23, %c0_24] : memref<256x256xbf16, #tpu.memory_space<vmem>>, vector<256x256xbf16>
      %cst_25 = arith.constant dense<0.000000e+00> : vector<8x256xf32>
      %53 = tpu.matmul %51, %52, %cst_25 {dimension_numbers = #tpu.dot_dimension_numbers<[1], [0], [0], [1], [0, 0, 1, 1], [], []>} : vector<8x256xbf16>, vector<256x256xbf16>, vector<8x256xf32> -> vector<8x256xf32>
      %c0_26 = arith.constant 0 : index
      %c0_27 = arith.constant 0 : index
      %54 = vector.load %arg19[%c0_26, %c0_27] : memref<1x256xf32, #tpu.memory_space<vmem>>, vector<1x256xf32>
      %55 = vector.broadcast %54 : vector<1x256xf32> to vector<8x256xf32>
      %56 = arith.addf %53, %55 : vector<8x256xf32>
      %c0_28 = arith.constant 0 : index
      %c0_29 = arith.constant 0 : index
      %57 = vector.load %arg20[%c0_28, %c0_29] : memref<8x256xf32, #tpu.memory_space<vmem>>, vector<8x256xf32>
      tpu.vector_store %arg20[%c0_28, %c0_29], %56 {strides = array<i32>} : memref<8x256xf32, #tpu.memory_space<vmem>>, vector<8x256xf32>,
    } else {
    }
    return
  }
  func.func @transform_0(%arg0: i32, %arg1: i32) -> (i32, i32) {
    %c0_i32 = arith.constant 0 : i32
    %c0_i32_0 = arith.constant 0 : i32
    return %arg0, %c0_i32 : i32, i32
  }
  func.func @transform_1(%arg0: i32, %arg1: i32) -> (i32, i32) {
    %c0_i32 = arith.constant 0 : i32
    %c0_i32_0 = arith.constant 0 : i32
    %c0_i32_1 = arith.constant 0 : i32
    return %c0_i32, %c0_i32_0 : i32, i32
  }
  func.func @transform_2(%arg0: i32, %arg1: i32) -> (i32, i32) {
    %c0_i32 = arith.constant 0 : i32
    %c0_i32_0 = arith.constant 0 : i32
    return %arg0, %c0_i32 : i32, i32
  }
  func.func @transform_3(%arg0: i32, %arg1: i32) -> (i32, i32) {
    %c0_i32 = arith.constant 0 : i32
    %c0_i32_0 = arith.constant 0 : i32
    return %arg0, %c0_i32 : i32, i32
  }
  func.func @transform_4(%arg0: i32, %arg1: i32) -> (i32, i32) {
    %c0_i32 = arith.constant 0 : i32
    %c0_i32_0 = arith.constant 0 : i32
    %c0_i32_1 = arith.constant 0 : i32
    return %c0_i32, %c0_i32_0 : i32, i32
  }
  func.func @transform_5(%arg0: i32, %arg1: i32) -> (i32, i32) {
    %c0_i32 = arith.constant 0 : i32
    %c0_i32_0 = arith.constant 0 : i32
    %c0_i32_1 = arith.constant 0 : i32
    return %c0_i32, %c0_i32_0 : i32, i32
  }
  func.func @transform_6(%arg0: i32, %arg1: i32) -> (i32, i32) {
    %c0_i32 = arith.constant 0 : i32
    %c0_i32_0 = arith.constant 0 : i32
    %c0_i32_1 = arith.constant 0 : i32
    return %c0_i32, %c0_i32_0 : i32, i32
  }
  func.func @transform_7(%arg0: i32, %arg1: i32) -> (i32, i32) {
    %c0_i32 = arith.constant 0 : i32
    %c0_i32_0 = arith.constant 0 : i32
    %c0_i32_1 = arith.constant 0 : i32
    return %c0_i32, %c0_i32_0 : i32, i32
  }
  func.func @transform_8(%arg0: i32, %arg1: i32) -> (i32, i32) {
    %c0_i32 = arith.constant 0 : i32
    %c0_i32_0 = arith.constant 0 : i32
    %c0_i32_1 = arith.constant 0 : i32
    return %c0_i32, %c0_i32_0 : i32, i32
  }
  func.func @transform_9(%arg0: i32, %arg1: i32) -> (i32, i32) {
    %c0_i32 = arith.constant 0 : i32
    %c0_i32_0 = arith.constant 0 : i32
    %c0_i32_1 = arith.constant 0 : i32
    return %c0_i32, %c0_i32_0 : i32, i32
  }
  func.func @transform_10(%arg0: i32, %arg1: i32) -> (i32, i32) {
    %c0_i32 = arith.constant 0 : i32
    %c0_i32_0 = arith.constant 0 : i32
    %c0_i32_1 = arith.constant 0 : i32
    return %c0_i32, %c0_i32_0 : i32, i32
  }
  func.func @transform_11(%arg0: i32, %arg1: i32) -> (i32, i32) {
    %c0_i32 = arith.constant 0 : i32
    %c0_i32_0 = arith.constant 0 : i32
    %c0_i32_1 = arith.constant 0 : i32
    return %c0_i32, %c0_i32_0 : i32, i32
  }
  func.func @transform_12(%arg0: i32, %arg1: i32) -> (i32, i32) {
    %c0_i32 = arith.constant 0 : i32
    %c0_i32_0 = arith.constant 0 : i32
    %c0_i32_1 = arith.constant 0 : i32
    return %c0_i32, %c0_i32_0 : i32, i32
  }
  func.func @transform_13(%arg0: i32, %arg1: i32) -> (i32, i32) {
    %c0_i32 = arith.constant 0 : i32
    %c0_i32_0 = arith.constant 0 : i32
    %c0_i32_1 = arith.constant 0 : i32
    return %c0_i32, %c0_i32_0 : i32, i32
  }
  func.func @transform_14(%arg0: i32, %arg1: i32) -> (i32, i32, i32) {
    %c0_i32 = arith.constant 0 : i32
    %c0_i32_0 = arith.constant 0 : i32
    %c0_i32_1 = arith.constant 0 : i32
    return %arg1, %c0_i32, %c0_i32_0 : i32, i32, i32
  }
  func.func @transform_15(%arg0: i32, %arg1: i32) -> (i32, i32, i32) {
    %c0_i32 = arith.constant 0 : i32
    %c0_i32_0 = arith.constant 0 : i32
    %c0_i32_1 = arith.constant 0 : i32
    return %arg1, %c0_i32, %c0_i32_0 : i32, i32, i32
  }
  func.func @transform_16(%arg0: i32, %arg1: i32) -> (i32, i32) {
    %c0_i32 = arith.constant 0 : i32
    %c0_i32_0 = arith.constant 0 : i32
    %c0_i32_1 = arith.constant 0 : i32
    return %c0_i32, %c0_i32_0 : i32, i32
  }
  func.func @transform_17(%arg0: i32, %arg1: i32) -> (i32, i32) {
    %c0_i32 = arith.constant 0 : i32
    %c0_i32_0 = arith.constant 0 : i32
    %c0_i32_1 = arith.constant 0 : i32
    return %c0_i32, %c0_i32_0 : i32, i32
  }
  func.func @transform_18(%arg0: i32, %arg1: i32) -> (i32, i32) {
    %c0_i32 = arith.constant 0 : i32
    %c0_i32_0 = arith.constant 0 : i32
    return %arg0, %c0_i32 : i32, i32
  }
}

</mosaic_0001>

<bundles_post_ra>
// kernel: tpu_custom_call.1
= control target key start
LH: loop header
LB: loop body
LE: loop exit
PB: predicated region body
PF: predicated region fallthrough
CT: control target
= control target key end

     0   :  { %s4303_s0 = inlined_call_operand.vmem [shape: f32[8,1], index: 0, kind: input, shape index: {}]   ;;  %s4304_s1 = inlined_call_operand.vmem [shape: f32[1,128], index: 1, kind: input, shape index: {}]   ;;  %s4305_s2 = inlined_call_operand.vmem [shape: f32[8,128], index: 2, kind: input, shape index: {}]   ;;  %s4306_s3 = inlined_call_operand.vmem [shape: f32[8,256], index: 3, kind: input, shape index: {}]   ;;  %s4307_s4 = inlined_call_operand.hbm [shape: bf16[128,256], index: 4, kind: input, shape index: {}]   ;;  %s4308_s5 = inlined_call_operand.hbm [shape: bf16[128,256], index: 5, kind: input, shape index: {}]   ;;  %s4309_s6 = inlined_call_operand.vmem [shape: f32[1,256], index: 6, kind: input, shape index: {}]   ;;  %s4310_s7 = inlined_call_operand.hbm [shape: bf16[256,256], index: 7, kind: input, shape index: {}]   ;;  %s4311_s8 = inlined_call_operand.hbm [shape: bf16[128,256], index: 8, kind: input, shape index: {}]   ;;  %s4312_s9 = inlined_call_operand.vmem [shape: f32[1,256], index: 9, kind: input, shape index: {}]   ;;  %s4313_s10 = inlined_call_operand.hbm [shape: bf16[256,256], index: 10, kind: input, shape index: {}]   ;;  %s4314_s11 = inlined_call_operand.vmem [shape: f32[1,256], index: 11, kind: input, shape index: {}]   ;;  %s4315_s12 = inlined_call_operand.vmem [shape: f32[1,256], index: 12, kind: input, shape index: {}]   ;;  %s4316_s13 = inlined_call_operand.vmem [shape: f32[1,256], index: 13, kind: input, shape index: {}]   ;;  %s4317_s14 = inlined_call_operand.hbm [shape: bf16[4,256,256], index: 14, kind: input, shape index: {}]   ;;  %s4318_s15 = inlined_call_operand.vmem [shape: f32[4,3,256], index: 15, kind: input, shape index: {}]   ;;  %s4319_s16 = inlined_call_operand.hbm [shape: bf16[256,256], index: 16, kind: input, shape index: {}]   ;;  %s4320_s17 = inlined_call_operand.vmem [shape: f32[1,256], index: 17, kind: input, shape index: {}]   ;;  %s4321_s18 = inlined_call_operand.hbm [shape: f32[8,256], index: 18, kind: output, shape index: {}]  }
   0x1   :  { %4326 = sst [smem:[#allocation23_spill]] %s4303_s0 }
   0x2   :  { %4327 = sst [smem:[#allocation24_spill]] %s4304_s1 }
   0x3   :  { %4328 = sst [smem:[#allocation25_spill]] %s4305_s2 }
   0x4   :  { %4329 = sst [smem:[#allocation26_spill]] %s4306_s3 }
   0x5   :  { %4330 = sst [smem:[#allocation27_spill]] %s4308_s5 }
   0x6   :  { %4331 = sst [smem:[#allocation28_spill]] %s4309_s6 }
   0x7   :  { %4332 = sst [smem:[#allocation29_spill]] %s4312_s9 }
   0x8   :  { %4333 = sst [smem:[#allocation30_spill]] %s4314_s11 }
   0x9   :  { %4334 = sst [smem:[#allocation31_spill]] %s4315_s12 }
   0xa   :  { %4335 = sst [smem:[#allocation32_spill]] %s4316_s13 }
   0xb   :  { %4336 = sst [smem:[#allocation33_spill]] %s4318_s15 }
   0xc   :  { %4337 = sst [smem:[#allocation34_spill]] %s4320_s17 }
   0xd   :  { %4338 = sst [smem:[#allocation35_spill]] %s4321_s18 }
   0xe   :  { %23 = vsyncpa [#allocation5], 0 }
   0xf   :  { %24 = vsyncpa [#allocation8], 0 }
  0x10   :  { %25 = vsyncpa [#allocation11], 0 }
  0x11   :  { %26 = vsyncpa [#allocation14], 0 }
  0x12   :  { %28 = vsyncpa [#allocation14 + $0x1], 0 }
  0x13   :  { %29 = vsyncpa [#allocation6], 0  ;;  %s3827_s27 = smov 0   ;;  %s3829_s28 = smov 0  }
  0x14   :  { %s3831_s29 = smov 0   ;;  %s3833_s30 = smov 0  }
  0x15   :  { %s3835_s0 = smov 0   ;;  %s3837_s19 = smov 0  }
  0x16 LB: > { %s3858_s1 = sadd.s32 4294967295, %s3713_s19   ;;  %p2769_p0 = scmp.ge.s32.totalorder %s3713_s19, 1  ;;  %s3713_s19 = sphi %s3837_s19, %s35_s19   ;;  %s3709_s0 = sphi %s3835_s0, %s4372_s0   ;;  %s3705_s30 = sphi %s3833_s30, %s4371_s30   ;;  %s3701_s29 = sphi %s3831_s29, %s4370_s29   ;;  %s3697_s28 = sphi %s3829_s28, %s4369_s28   ;;  %s3693_s27 = sphi %s3827_s27, %s4368_s27  }
  0x17   : > { %p4324_p1 = scmp.eq.s32.totalorder %s3858_s1, 0  ;;  %p481_p2 = scmp.lt.s32.totalorder %s3713_s19, 5 }
  0x18   : > { %s3715_s21 = smov [#allocation7]   ;;  %s3716_s2 = smov [#allocation10]  }
  0x19   : > { %p3863_p3 = pnand %p2769_p0, %p481_p2  ;;  %s531_s22 = sshll.u32 %s3715_s21, 4  ;;  %s3867_s22 = int_to_ptr.vmem [resolvable:$true] %s531_s22 }
  0x1a   : > { %s560_s23 = sshll.u32 %s3716_s2, 4  ;;  %s3717_s25 = smov [#allocation15]   ;;  %s3877_s23 = int_to_ptr.vmem [resolvable:$true] %s560_s23 }
  0x1b   : > { %s4339_s20 = scalar_select %p3863_p3, 1, 0 }
  0x1c   : > { %p3020_p4 = pneg %p3863_p3  ;;  %s598_s26 = sshll.u32 %s3717_s25, 4  ;;  %s3879_s26 = int_to_ptr.vmem [resolvable:$true] %s598_s26 }
  0x1d   : > { %s4341_s5 = sld [smem:[#allocation27_spill]] }
  0x1e   : > { %p3873_p5 = pnand %p3020_p4, %p4324_p1 }
  0x20   : > { %p3889_p7 = pneg %p3873_p5 }
  0x23   : > { %s3419_s17 = scalar_lea.hbm %s4341_s5, 2048 }
  0x24   : > { %p3420_p6 = scmp.ne.s32.totalorder %s4341_s5, %s3419_s17  ;;  %p3426_p10 = scmp.lt.u32.totalorder %s3419_s17, %s4341_s5 }
  0x26   : > { %p3422_p8 = pnand %p3889_p7, %p3420_p6 }
  0x28   : > { %p3423_p9 = pneg %p3422_p8 }
  0x2a   : > { %p3428_p11 = pnand %p3426_p10, %p3423_p9 }
  0x2c   : > { %3431 = shalt.err (!%p3428_p11)
}
  0x2d   : > { %s3432_s12 = scalar_lea.vmem %s3867_s22, 2048  ;;  %p3440_p2 = scmp.lt.s32.totalorder %s3867_s22, %s3867_s22 }
  0x2e   : > { %p3433_p12 = scmp.ne.s32.totalorder %s3867_s22, %s3432_s12  ;;  %p3441_p4 = scmp.lt.s32.totalorder %s3432_s12, %s3432_s12 }
  0x30   : > { %p3435_p13 = pnand %p3433_p12, %p3889_p7  ;;  %p3442_p6 = por %p3441_p4, %p3440_p2 }
  0x32   : > { %p3436_p0 = pneg %p3435_p13 }
  0x34   : > { %p3443_p8 = pnand %p3442_p6, %p3436_p0 }
  0x36   : > { %3446 = shalt.err (!%p3443_p8)
}
  0x37   : > { %s3718_s13 = smov 128   ;;  %s3719_s9 = smov 8  }
  0x38   : > { %3026 = dma.hbm_to_vmem [thread:$0]  (!%p3873_p5), %s4341_s5, 2048, %s3867_s22, [#allocation8], %s3718_s13, %s3718_s13, %s3719_s9  }
  0x39   : > { %s3447_s12 = scalar_lea.hbm %s4311_s8, 2048 }
  0x3a   : > { %p3448_p9 = scmp.ne.s32.totalorder %s4311_s8, %s3447_s12  ;;  %p3454_p12 = scmp.lt.u32.totalorder %s3447_s12, %s4311_s8 }
  0x3c   : > { %p3450_p10 = pnand %p3448_p9, %p3889_p7 }
  0x3e   : > { %p3451_p11 = pneg %p3450_p10 }
  0x40   : > { %p3456_p13 = pnand %p3454_p12, %p3451_p11 }
  0x42   : > { %3459 = shalt.err (!%p3456_p13)
}
  0x43   : > { %s3460_s22 = scalar_lea.vmem %s3877_s23, 2048  ;;  %p3468_p6 = scmp.lt.s32.totalorder %s3877_s23, %s3877_s23 }
  0x44   : > { %p3461_p0 = scmp.ne.s32.totalorder %s3877_s23, %s3460_s22  ;;  %p3469_p8 = scmp.lt.s32.totalorder %s3460_s22, %s3460_s22 }
  0x46   : > { %p3463_p2 = pnand %p3461_p0, %p3889_p7  ;;  %p3470_p9 = por %p3469_p8, %p3468_p6 }
  0x48   : > { %p3464_p4 = pneg %p3463_p2 }
  0x4a   : > { %p3471_p10 = pnand %p3470_p9, %p3464_p4 }
  0x4c   : > { %3474 = shalt.err (!%p3471_p10)
}
  0x4d   : > { %3032 = dma.hbm_to_vmem [thread:$0]  (!%p3873_p5), %s4311_s8, 2048, %s3877_s23, [#allocation11], %s3718_s13, %s3718_s13, %s3719_s9  }
  0x4e   : > { %s3475_s17 = scalar_lea.hbm %s4319_s16, 4096 }
  0x4f   : > { %p3476_p11 = scmp.ne.s32.totalorder %s4319_s16, %s3475_s17  ;;  %p3482_p0 = scmp.lt.u32.totalorder %s3475_s17, %s4319_s16 }
  0x51   : > { %p3478_p12 = pnand %p3476_p11, %p3889_p7 }
  0x53   : > { %p3479_p13 = pneg %p3478_p12 }
  0x55   : > { %p3484_p2 = pnand %p3482_p0, %p3479_p13 }
  0x57   : > { %3487 = shalt.err (!%p3484_p2)
}
  0x58   : > { %s3488_s23 = scalar_lea.vmem %s3879_s26, 4096  ;;  %p3496_p9 = scmp.lt.s32.totalorder %s3879_s26, %s3879_s26 }
  0x59   : > { %p3489_p4 = scmp.ne.s32.totalorder %s3879_s26, %s3488_s23  ;;  %p3497_p10 = scmp.lt.s32.totalorder %s3488_s23, %s3488_s23 }
  0x5b   : > { %p3491_p6 = pnand %p3489_p4, %p3889_p7  ;;  %p3498_p11 = por %p3497_p10, %p3496_p9 }
  0x5d   : > { %p3492_p8 = pneg %p3491_p6 }
  0x5f   : > { %p3499_p12 = pnand %p3498_p11, %p3492_p8 }
  0x61   : > { %3502 = shalt.err (!%p3499_p12)
}
  0x62   : > { %3038 = dma.hbm_to_vmem [thread:$0]  (!%p3873_p5), %s4319_s16, 4096, %s3879_s26, [#allocation14], %s3718_s13, %s3718_s13, %s3719_s9  }
  0x63   : > { %s3720_s6 = smov [#allocation4]   ;;  %s3721_s15 = smov [#allocation9]  }
  0x64   : > { %s518_s11 = sshll.u32 %s3720_s6, 4  ;;  %s547_s17 = sshll.u32 %s3721_s15, 4  ;;  %s519_s11 = int_to_ptr.vmem [resolvable:$true] %s518_s11  ;;  %s548_s17 = int_to_ptr.vmem [resolvable:$true] %s547_s17 }
  0x65   : > { %s3503_s25 = scalar_lea.hbm %s4307_s4, 2048 }
  0x66   : > { %p3504_p13 = scmp.ne.s32.totalorder %s4307_s4, %s3503_s25  ;;  %p3510_p4 = scmp.lt.u32.totalorder %s3503_s25, %s4307_s4 }
  0x68   : > { %p3506_p0 = pnand %p3504_p13, %p3889_p7 }
  0x6a   : > { %p3507_p2 = pneg %p3506_p0 }
  0x6c   : > { %p3512_p6 = pnand %p3510_p4, %p3507_p2 }
  0x6e   : > { %3515 = shalt.err (!%p3512_p6)
}
  0x6f   : > { %s3516_s26 = scalar_lea.vmem %s519_s11, 2048  ;;  %p3524_p11 = scmp.lt.s32.totalorder %s519_s11, %s519_s11 }
  0x70   : > { %p3517_p8 = scmp.ne.s32.totalorder %s519_s11, %s3516_s26  ;;  %p3525_p12 = scmp.lt.s32.totalorder %s3516_s26, %s3516_s26 }
  0x72   : > { %p3519_p9 = pnand %p3517_p8, %p3889_p7  ;;  %p3526_p1 = por %p3525_p12, %p3524_p11 }
  0x74   : > { %p3520_p10 = pneg %p3519_p9 }
  0x76   : > { %p3527_p3 = pnand %p3526_p1, %p3520_p10 }
  0x78   : > { %3530 = shalt.err (!%p3527_p3)
}
  0x79   : > { %3023 = dma.hbm_to_vmem [thread:$0]  (!%p3873_p5), %s4307_s4, 2048, %s519_s11, [#allocation5], %s3718_s13, %s3718_s13, %s3719_s9  }
  0x7a   : > { %s3531_s18 = scalar_lea.hbm %s4310_s7, 4096 }
  0x7b   : > { %p3532_p1 = scmp.ne.s32.totalorder %s4310_s7, %s3531_s18  ;;  %p3538_p0 = scmp.lt.u32.totalorder %s3531_s18, %s4310_s7 }
  0x7d   : > { %p3534_p3 = pnand %p3532_p1, %p3889_p7 }
  0x7f   : > { %p3535_p13 = pneg %p3534_p3 }
  0x81   : > { %p3540_p2 = pnand %p3538_p0, %p3535_p13 }
  0x83   : > { %3543 = shalt.err (!%p3540_p2)
}
  0x84   : > { %s3544_s22 = scalar_lea.vmem %s548_s17, 4096  ;;  %p3552_p9 = scmp.lt.s32.totalorder %s548_s17, %s548_s17 }
  0x85   : > { %p3545_p4 = scmp.ne.s32.totalorder %s548_s17, %s3544_s22  ;;  %p3553_p10 = scmp.lt.s32.totalorder %s3544_s22, %s3544_s22 }
  0x87   : > { %p3547_p6 = pnand %p3545_p4, %p3889_p7  ;;  %p3554_p11 = por %p3553_p10, %p3552_p9 }
  0x89   : > { %p3548_p8 = pneg %p3547_p6 }
  0x8b   : > { %p3555_p12 = pnand %p3554_p11, %p3548_p8 }
  0x8d   : > { %3558 = shalt.err (!%p3555_p12)
}
  0x8e   : > { %3029 = dma.hbm_to_vmem [thread:$0]  (!%p3873_p5), %s4310_s7, 4096, %s548_s17, [#allocation8], %s3718_s13, %s3718_s13, %s3719_s9  }
  0x8f   : > { %s3722_s5 = smov [#allocation12]   ;;  %s3559_s18 = scalar_lea.hbm %s4313_s10, 4096 }
  0x90   : > { %s576_s3 = sshll.u32 %s3722_s5, 4  ;;  %p3560_p1 = scmp.ne.s32.totalorder %s4313_s10, %s3559_s18  ;;  %s577_s3 = int_to_ptr.vmem [resolvable:$true] %s576_s3 }
  0x91   : > { %p3566_p0 = scmp.lt.u32.totalorder %s3559_s18, %s4313_s10 }
  0x92   : > { %p3562_p3 = pnand %p3560_p1, %p3889_p7 }
  0x94   : > { %p3563_p13 = pneg %p3562_p3 }
  0x96   : > { %p3568_p2 = pnand %p3566_p0, %p3563_p13 }
  0x98   : > { %3571 = shalt.err (!%p3568_p2)
}
  0x99   : > { %s3572_s17 = scalar_lea.vmem %s577_s3, 4096  ;;  %p3580_p9 = scmp.lt.s32.totalorder %s577_s3, %s577_s3 }
  0x9a   : > { %p3573_p4 = scmp.ne.s32.totalorder %s577_s3, %s3572_s17  ;;  %p3581_p10 = scmp.lt.s32.totalorder %s3572_s17, %s3572_s17 }
  0x9c   : > { %p3575_p6 = pnand %p3573_p4, %p3889_p7  ;;  %p3582_p11 = por %p3581_p10, %p3580_p9 }
  0x9e   : > { %p3576_p8 = pneg %p3575_p6 }
  0xa0   : > { %p3583_p12 = pnand %p3582_p11, %p3576_p8 }
  0xa2   : > { %3586 = shalt.err (!%p3583_p12)
}
  0xa3   : > { %3035 = dma.hbm_to_vmem [thread:$0]  (!%p3873_p5), %s4313_s10, 4096, %s577_s3, [#allocation11], %s3718_s13, %s3718_s13, %s3719_s9  }
  0xa4   : > { %s44_s24 = sadd.s32 1, %s3709_s0  ;;  %s363_s2 = sadd.s32 1, %s3701_s29 }
  0xa5   : > { %p45_p7 = scmp.ge.s32.totalorder %s44_s24, 4  ;;  %p370_p1 = scmp.ne.s32.totalorder %s3701_s29, %s3697_s28 }
  0xa6   : > { %p371_p3 = scmp.eq.s32.totalorder %s3713_s19, 0  ;;  %p376_p13 = scmp.ne.s32.totalorder %s3697_s28, %s3693_s27 }
  0xa7   : > { %s4374_s24 = smov (%p45_p7, %s44_s24), 0  ;;  %p4344_p2 = scmp.eq.s32.totalorder %s3858_s1, 0 }
  0xa8   : > { %p4037_p0 = por %p371_p3, %p370_p1  ;;  %s360_s3 = ssub.s32 %s3709_s0, %s4374_s24 }
  0xa9   : > { %p4043_p4 = por %p4344_p2, %p376_p13  ;;  %p3049_p5 = scmp.lt.s32.totalorder %s3713_s19, 4 }
  0xaa   : > { %p361_p6 = scmp.eq.s32.totalorder %s360_s3, 0  ;;  %s615_s6 = sand.u32 1, %s3713_s19  }
  0xab   : > { %s617_s15 = sand.u32 1, %s3701_s29   ;;  %s2984_s21 = sshll.u32 %s3709_s0, 12 }
  0xac   : > { %s4053_s18 = scalar_select %p361_p6, %s3701_s29, %s363_s2  }
  0xad   : > { %s2780_s27 = sshll.u32 %s617_s15, 8  ;;  %s4059_s23 = scalar_lea.hbm %s4317_s14, %s2984_s21 }
  0xae   : > { %s619_s17 = scalar_lea.vmem [#allocation13], %s2780_s27  ;;  %p4063_p8 = pnand %p3049_p5, %p4037_p0 }
  0xaf   : > { %s626_s22 = sshll.u32 %s619_s17, 4  ;;  %s4069_s2 = scalar_lea.sflag [#allocation14], %s615_s6  ;;  %s4067_s22 = int_to_ptr.vmem [resolvable:$true] %s626_s22 }
  0xb0   : > { %s3587_s3 = scalar_lea.hbm %s4059_s23, 4096  ;;  %p3589_p10 = pneg %p4063_p8 }
  0xb1   : > { %p3588_p9 = scmp.ne.s32.totalorder %s4059_s23, %s3587_s3  ;;  %s3592_s27 = scalar_lea.hbm %s4317_s14, 16384 }
  0xb2   : > { %p3593_p7 = scmp.lt.u32.totalorder %s4059_s23, %s4317_s14  ;;  %p3594_p1 = scmp.lt.u32.totalorder %s3592_s27, %s3587_s3 }
  0xb3   : > { %p3590_p11 = pnand %p3589_p10, %p3588_p9  ;;  %p3596_p13 = scmp.lt.u32.totalorder %s3587_s3, %s4059_s23 }
  0xb4   : > { %p3595_p3 = por %p3594_p1, %p3593_p7 }
  0xb5   : > { %p3591_p12 = pneg %p3590_p11 }
  0xb6   : > { %p3597_p0 = por %p3596_p13, %p3595_p3 }
  0xb8   : > { %p3598_p2 = pnand %p3597_p0, %p3591_p12 }
  0xba   : > { %3601 = shalt.err (!%p3598_p2)
}
  0xbb   : > { %s3602_s6 = scalar_lea.vmem %s4067_s22, 4096  ;;  %s3723_s12 = smov [#allocation13]  }
  0xbc   : > { %p3603_p5 = scmp.ne.s32.totalorder %s4067_s22, %s3602_s6  ;;  %s3607_s17 = sshll.u32 %s3723_s12, 4  ;;  %s3608_s17 = int_to_ptr.vmem [resolvable:$false] %s3607_s17 }
  0xbd   : > { %s3609_s15 = scalar_lea.vmem %s3608_s17, 8192  ;;  %p3610_p11 = scmp.lt.s32.totalorder %s4067_s22, %s3608_s17 }
  0xbe   : > { %p3605_p6 = pnand %p3603_p5, %p3589_p10  ;;  %p3611_p7 = scmp.lt.s32.totalorder %s3609_s15, %s3602_s6 }
  0xc0   : > { %p3606_p9 = pneg %p3605_p6  ;;  %p3612_p1 = por %p3611_p7, %p3610_p11 }
  0xc2   : > { %p3613_p3 = pnand %p3612_p1, %p3606_p9 }
  0xc4   : > { %3616 = shalt.err (!%p3613_p3)
}
  0xc5   : > { %3042 = dma.hbm_to_vmem [thread:$0]  (!%p4063_p8), %s4059_s23, 4096, %s4067_s22, %s4069_s2, %s3718_s13, %s3718_s13, %s3719_s9  }
  0xc6   : > { %p4347_p10 = scmp.ne.s32.totalorder %s4339_s20, 0 }
  0xc7   : > { %p4348_p12 = scmp.eq.s32.totalorder (!%p4347_p10), %s3858_s1, 0 }
  0xc8   : > { %646 = sbr.rel (%p4347_p10) target bundleno = 2024 (0x7e8), region = 92 }
  0xcf   : > { %3668 = dma.done.wait (%p4348_p12), [#allocation5], 2048   ;;  %p4349_p13 = pmov %p4348_p12 }
  0xd0   : > { %p4350_p0 = pmov %p4348_p12 }
  0xd1   : > { %3670 = vsyncadd (%p4349_p13), [#allocation5], 4294965248 }
  0xd2   : > { %3672 = dma.done.wait (%p4350_p0), [#allocation8], 6144   ;;  %p4351_p2 = pmov %p4350_p0 }
  0xd3   : > { %p4352_p5 = pmov %p4350_p0 }
  0xd4   : > { %3674 = vsyncadd (%p4351_p2), [#allocation8], 4294961152 }
  0xd5   : > { %3676 = dma.done.wait (%p4352_p5), [#allocation11], 6144   ;;  %p4353_p8 = pmov %p4350_p0 }
  0xd6   : > { %s668_s20 = sand.u32 1, %s3858_s1   ;;  %s670_s13 = sand.u32 1, %s3697_s28  }
  0xd7   : > { %3678 = vsyncadd (%p4353_p8), [#allocation11], 4294961152  ;;  %s2789_s9 = sshll.u32 %s670_s13, 8  ;;  %s669_s23 = scalar_lea.sflag [#allocation14], %s668_s20 }
  0xd8   : > { %s4116_s22 = scalar_lea.vmem [#allocation13], %s2789_s9 }
  0xd9   : > { %3680 = dma.done.wait (%p4043_p4), %s669_s23, 4096  }
  0xda   : > { %3682 = vsyncadd (%p4043_p4), %s669_s23, 4294963200  ;;  %p4354_p6 = pmov %p4350_p0 }
  0xdb   : > { %p4355_p9 = pmov %p4350_p0 }
  0xdc   : > { %3684 = dma.done.wait (%p4354_p6), [#allocation14], 4096  }
  0xdd   : > { %3686 = vsyncadd (%p4355_p9), [#allocation14], 4294963200  ;;  %p755_p11 = scmp.lt.s32.totalorder %s3705_s30, 3  ;;  %s4356_s27 = sld [smem:[#allocation33_spill]] }
  0xde   : > { %p2793_p7 = scmp.ne.s32.totalorder %s3705_s30, 0 }
  0xdf   : > { %s756_s11 = scalar_select %p755_p11, %s3705_s30, 3 }
  0xe0   : > { %764 = sbr.rel (%p2793_p7) target bundleno = 1100 (0x44c), region = 124  ;;  %s4357_s6 = sld [smem:[#allocation23_spill]] (!%p2793_p7)  ;;  %v3724_v1 = vmov (!%p2793_p7), 0   ;;  %v3123_v2 = vld [vmem:[#allocation7 + $0x4] ss:$8 sps:$4 sm:$0xff] (!%p2793_p7)  }
  0xe1   : > { %s2985_s2 = sshll.u32 %s756_s11, 3  ;;  %3122 = vset.pattern.permute.xlu0 (!%p2793_p7), %v3724_v1  ;;  %1132 = vmatprep.mubr.bf16.mxu0 (!%p2793_p7), %v3724_v1  ;;  %v3125_v3 = vld [vmem:[#allocation7] ss:$8 sps:$4 sm:$0xff] (!%p2793_p7)   ;;  %v3126_v4 = vld [vmem:[#allocation4 + $0x4] ss:$8 sps:$4 sm:$0xff] (!%p2793_p7)   ;;  %s4358_s15 = sld [smem:[#allocation24_spill]] (!%p2793_p7) }
  0xe2   : > { %1253 = vmatprep.mubr.bf16.mxu1 (!%p2793_p7), %v3724_v1  ;;  %1100 = vmatprep.subr.bf16.mxu0 (!%p2793_p7), %v3123_v2  ;;  %v3128_v5 = vld [vmem:[#allocation4] ss:$8 sps:$4 sm:$0xff] (!%p2793_p7)   ;;  %v3129_v6 = vld [vmem:[#allocation7 + $0x14] ss:$8 sps:$4 sm:$0xff] (!%p2793_p7)   ;;  %v3131_v7 = vld [vmem:[#allocation7 + $0x10] ss:$8 sps:$4 sm:$0xff] (!%p2793_p7)  }
  0xe3   : > { %s4131_s21 = scalar_lea.vmem %s4356_s27, %s2985_s2  ;;  %1101 = vmatpush1.bf16.msra.mxu0 (!%p2793_p7), %v3125_v3  ;;  %1221 = vmatprep.subr.bf16.mxu1 (!%p2793_p7), %v3126_v4  ;;  %v3132_v8 = vld [vmem:[#allocation4 + $0x14] ss:$8 sps:$4 sm:$0xff] (!%p2793_p7)   ;;  %v3134_v9 = vld [vmem:[#allocation4 + $0x10] ss:$8 sps:$4 sm:$0xff] (!%p2793_p7)   ;;  %v3135_v10 = vld [vmem:[#allocation7 + $0x24] ss:$8 sps:$4 sm:$0xff] (!%p2793_p7)  }
  0xe4   : > { %1222 = vmatpush1.bf16.msra.mxu1 (!%p2793_p7), %v3128_v5  ;;  %1102 = vmatprep.subr.bf16.mxu0 (!%p2793_p7), %v3129_v6  ;;  %v3137_v11 = vld [vmem:[#allocation7 + $0x20] ss:$8 sps:$4 sm:$0xff] (!%p2793_p7)   ;;  %v3138_v12 = vld [vmem:[#allocation4 + $0x24] ss:$8 sps:$4 sm:$0xff] (!%p2793_p7)   ;;  %v3141_v14 = vld [vmem:[#allocation7 + $0x34] ss:$8 sps:$4 sm:$0xff] (!%p2793_p7)  }
  0xe5   : > { %1223 = vmatprep.subr.bf16.mxu1 (!%p2793_p7), %v3132_v8  ;;  %v3140_v13 = vld [vmem:[#allocation4 + $0x20] ss:$8 sps:$4 sm:$0xff] (!%p2793_p7)   ;;  %v3143_v15 = vld [vmem:[#allocation7 + $0x30] ss:$8 sps:$4 sm:$0xff] (!%p2793_p7)   ;;  %v3144_v16 = vld [vmem:[#allocation4 + $0x34] ss:$8 sps:$4 sm:$0xff] (!%p2793_p7)  }
  0xe6   : > { %v765_v0 = vld [vmem:[%s4357_s6] sm:$0xff] (!%p2793_p7)  ;;  %v3146_v17 = vld [vmem:[#allocation4 + $0x30] ss:$8 sps:$4 sm:$0xff] (!%p2793_p7)   ;;  %v3153_v22 = vld [vmem:[#allocation7 + $0x54] ss:$8 sps:$4 sm:$0xff] (!%p2793_p7)   ;;  %s4359_s9 = sld [smem:[#allocation25_spill]] (!%p2793_p7) }
  0xe7   : > { %769 = vperm.xlu0 %3122, %v765_v0   ;;  %1103 = vmatpush1.bf16.msra.mxu0 %v3131_v7  ;;  %v3147_v18 = vld [vmem:[#allocation7 + $0x44] ss:$8 sps:$4 sm:$0xff]   ;;  %v3149_v19 = vld [vmem:[#allocation7 + $0x40] ss:$8 sps:$4 sm:$0xff]   ;;  %v3156_v23 = vld [vmem:[#allocation4 + $0x54] ss:$8 sps:$4 sm:$0xff]  }
  0xe8   : > { %1224 = vmatpush1.bf16.msra.mxu1 %v3134_v9  ;;  %1104 = vmatprep.subr.bf16.mxu0 %v3135_v10  ;;  %v3150_v20 = vld [vmem:[#allocation4 + $0x44] ss:$8 sps:$4 sm:$0xff]   ;;  %v3152_v21 = vld [vmem:[#allocation4 + $0x40] ss:$8 sps:$4 sm:$0xff]   ;;  %v3155_v24 = vld [vmem:[#allocation7 + $0x50] ss:$8 sps:$4 sm:$0xff]  }
  0xe9   : > { %1225 = vmatprep.subr.bf16.mxu1 %v3138_v12  ;;  %v3158_v25 = vld [vmem:[#allocation4 + $0x50] ss:$8 sps:$4 sm:$0xff]   ;;  %v3159_v26 = vld [vmem:[#allocation7 + $0x64] ss:$8 sps:$4 sm:$0xff]   ;;  %v3161_v28 = vld [vmem:[#allocation7 + $0x60] ss:$8 sps:$4 sm:$0xff]  }
  0xea   : > { %v3162_v27 = vld [vmem:[#allocation4 + $0x64] ss:$8 sps:$4 sm:$0xff]   ;;  %v3164_v29 = vld [vmem:[#allocation4 + $0x60] ss:$8 sps:$4 sm:$0xff]   ;;  %v3165_v30 = vld [vmem:[#allocation7 + $0x74] ss:$8 sps:$4 sm:$0xff]  }
  0xeb   : > { %1105 = vmatpush1.bf16.msra.mxu0 %v3137_v11  ;;  %v3168_v31 = vld [vmem:[#allocation4 + $0x74] ss:$8 sps:$4 sm:$0xff]   ;;  %v3167_v32 = vld [vmem:[#allocation7 + $0x70] ss:$8 sps:$4 sm:$0xff]   ;;  %v3173_v34 = vld [vmem:[#allocation10 + $0x4] ss:$8 sps:$4 sm:$0xff]  }
  0xec   : > { %1226 = vmatpush1.bf16.msra.mxu1 %v3140_v13  ;;  %1106 = vmatprep.subr.bf16.mxu0 %v3141_v14  ;;  %v3170_v33 = vld [vmem:[#allocation4 + $0x70] ss:$8 sps:$4 sm:$0xff]   ;;  %v2794_v35 = vld [vmem:[%s4358_s15] ss:$0 sm:$0xff]  ;;  %v3725_v48 = vmov 683565275  }
  0xed   : > { %1227 = vmatprep.subr.bf16.mxu1 %v3144_v16  ;;  %v3726_v50 = vmov 2475754826   ;;  %v3727_v53 = vmov 2131351028   ;;  %v3728_v56 = vmov 2102212464  }
  0xee   : > { %v3729_v59 = vmov 920167782   ;;  %v3730_v62 = vmov 1326507024   ;;  %s4360_s2 = sld [smem:[#allocation26_spill]]  ;;  %s4361_s25 = sld [smem:[#allocation28_spill]] }
  0xef   : > { %1107 = vmatpush1.bf16.msra.mxu0 %v3143_v15  ;;  %s4362_s17 = sld [smem:[#allocation30_spill]]  ;;  %s4363_s13 = sld [smem:[#allocation29_spill]] }
  0xf0   : > { %1228 = vmatpush1.bf16.msra.mxu1 %v3146_v17  ;;  %1108 = vmatprep.subr.bf16.mxu0 %v3147_v18  ;;  %s4364_s11 = sld [smem:[#allocation31_spill]]  ;;  %s4365_s27 = sld [smem:[#allocation32_spill]] }
  0xf1   : > { %1229 = vmatprep.subr.bf16.mxu1 %v3150_v20 }
  0xf3   : > { %1109 = vmatpush1.bf16.msra.mxu0 %v3149_v19 }
  0xf4   : > { %1230 = vmatpush1.bf16.msra.mxu1 %v3152_v21  ;;  %1110 = vmatprep.subr.bf16.mxu0 %v3153_v22 }
  0xf5   : > { %1231 = vmatprep.subr.bf16.mxu1 %v3156_v23 }
  0xf7   : > { %1111 = vmatpush1.bf16.msra.mxu0 %v3155_v24 }
  0xf8   : > { %1232 = vmatpush1.bf16.msra.mxu1 %v3158_v25  ;;  %1112 = vmatprep.subr.bf16.mxu0 %v3159_v26 }
  0xf9   : > { %1233 = vmatprep.subr.bf16.mxu1 %v3162_v27 }
  0xfb   : > { %1113 = vmatpush1.bf16.msra.mxu0 %v3161_v28 }
  0xfc   : > { %1234 = vmatpush1.bf16.msra.mxu1 %v3164_v29  ;;  %1114 = vmatprep.subr.bf16.mxu0 %v3165_v30 }
  0xfd   : > { %1235 = vmatprep.subr.bf16.mxu1 %v3168_v31 }
  0xff   : > { %1115 = vmatpush1.bf16.msra.mxu0 %v3167_v32 }
 0x100   : > { %1236 = vmatpush1.bf16.msra.mxu1 %v3170_v33  ;;  %1422 = vmatprep.subr.bf16.mxu0 %v3173_v34 }
 0x166   : > { %v770_v36 = vpop.permute.xlu0 %769 }
 0x167   : > { %v4143_v37 = vmul.f32 %v2794_v35, %v770_v36 }
 0x169   : > { %v782_v38 = vand.u32 2139095040, %v4143_v37  ;;  %v779_v42 = vand.u32 2147483647, %v4143_v37  ;;  %vm781_vm7 = vcmp.lt.s32.totalorder %v4143_v37, 0  ;;  %vm871_vm15 = vweird.f32 %v4143_v37 }
 0x16b   : > { %v783_v39 = vshrl.u32 %v782_v38, 23  ;;  %v786_v45 = vand.u32 8388607, %v779_v42  ;;  %vm780_vm8 = vcmp.le.f32.partialorder %v779_v42, 0.7853982 }
 0x16d   : > { %v2795_v40 = vadd.s32 4294967169, %v783_v39  ;;  %v787_v0 = vor.u32 8388608, %v786_v45 }
 0x16f   : > { %v789_v41 = vadd.s32 1, %v2795_v40  ;;  %v827_v15 = vshll.u32 %v787_v0, 8 }
 0x171   : > { %vm790_vm0 = vcmp.gt.s32.totalorder %v789_v41, 0 }
 0x172   : > { %v791_v43 = vsel %vm790_vm0, %v789_v41, 0 }
 0x173   : > { %v793_v44 = vand.u32 31, %v791_v43  ;;  %v792_v47 = vshrl.u32 %v791_v43, 5 }
 0x175   : > { %v794_v46 = vsub.s32 32, %v793_v44  ;;  %v796_v49 = vshll.u32 %v3725_v48, %v793_v44  ;;  %v799_v51 = vshll.u32 %v3726_v50, %v793_v44  ;;  %v802_v55 = vshll.u32 %v3727_v53, %v793_v44 }
 0x176   : > { %v805_v58 = vshll.u32 %v3728_v56, %v793_v44  ;;  %v808_v61 = vshll.u32 %v3729_v59, %v793_v44  ;;  %vm811_vm1 = vcmp.lt.s32.totalorder %v792_v47, 1  ;;  %vm814_vm2 = vcmp.lt.s32.totalorder %v792_v47, 4 }
 0x177   : > { %v797_v52 = vshrl.u32 %v3726_v50, %v794_v46  ;;  %v800_v54 = vshrl.u32 %v3727_v53, %v794_v46  ;;  %v803_v57 = vshrl.u32 %v3728_v56, %v794_v46  ;;  %v806_v60 = vshrl.u32 %v3729_v59, %v794_v46 }
 0x178   : > { %v809_v63 = vshrl.u32 %v3730_v62, %v794_v46  ;;  %v795_v10 = vshrl.u32 %v3725_v48, %v794_v46  ;;  %vm813_vm3 = vcmp.lt.s32.totalorder %v792_v47, 3  ;;  %vm812_vm4 = vcmp.lt.s32.totalorder %v792_v47, 2  ;;  %v3245_v46 = vld [vmem:[#allocation9 + $0x4] ss:$8 sps:$4 sm:$0xff]  }
 0x179   : > { %v798_v2 = vor.u32 %v797_v52, %v796_v49  ;;  %v801_v3 = vor.u32 %v800_v54, %v799_v51  ;;  %v804_v4 = vor.u32 %v803_v57, %v802_v55  ;;  %v807_v5 = vor.u32 %v806_v60, %v805_v58  ;;  %1623 = vmatprep.subr.bf16.mxu1 %v3245_v46  ;;  %v3200_v46 = vld [vmem:[#allocation12 + $0x14] ss:$8 sps:$4 sm:$0xff]  }
 0x17a   : > { %v810_v6 = vor.u32 %v809_v63, %v808_v61 }
 0x17b   : > { %v816_v7 = vsel %vm814_vm2, %v804_v4, 2102212464  ;;  %v819_v8 = vsel %vm811_vm1, %v798_v2, %v801_v3  ;;  %v823_v9 = vsel %vm811_vm1, %v801_v3, %v804_v4  ;;  %v820_v11 = vsel %vm814_vm2, %v807_v5, 920167782 }
 0x17c   : > { %v824_v12 = vsel %vm814_vm2, %v810_v6, 1326507024  ;;  %v821_v13 = vsel %vm813_vm3, %v804_v4, %v820_v11  ;;  %v815_v16 = vsel %vm811_vm1, %v795_v10, %v798_v2  ;;  %v817_v17 = vsel %vm813_vm3, %v801_v3, %v816_v7 }
 0x17d   : > { %v825_v14 = vsel %vm813_vm3, %v807_v5, %v824_v12  ;;  %v822_v18 = vsel %vm812_vm4, %v819_v8, %v821_v13  ;;  %v818_v24 = vsel %vm812_vm4, %v815_v16, %v817_v17  ;;  %v3171_v8 = vld [vmem:[#allocation10] ss:$8 sps:$4 sm:$0xff]   ;;  %v3176_v13 = vld [vmem:[#allocation10 + $0x14] ss:$8 sps:$4 sm:$0xff]   ;;  %v3174_v16 = vld [vmem:[#allocation10 + $0x10] ss:$8 sps:$4 sm:$0xff]  }
 0x17e   : > { %v826_v19 = vsel %vm812_vm4, %v823_v9, %v825_v14  ;;  %v4152_v22 = vmul.u32.u64.low %v827_v15, %v822_v18  ;;  %v4153_v23 = vmul.u32.u64.high %v827_v15, %v822_v18, %v4152_v22  ;;  %v834_v26 = vmul.u32 %v827_v15, %v818_v24  ;;  %v3243_v14 = vld [vmem:[#allocation9] ss:$8 sps:$4 sm:$0xff]   ;;  %v3179_v17 = vld [vmem:[#allocation10 + $0x24] ss:$8 sps:$4 sm:$0xff]  }
 0x17f   : > { %v4149_v20 = vmul.u32.u64.low %v827_v15, %v826_v19  ;;  %v4150_v21 = vmul.u32.u64.high %v827_v15, %v826_v19, %v4149_v20  ;;  %v3248_v15 = vld [vmem:[#allocation9 + $0x14] ss:$8 sps:$4 sm:$0xff]   ;;  %v3251_v18 = vld [vmem:[#allocation9 + $0x24] ss:$8 sps:$4 sm:$0xff]   ;;  %v3177_v19 = vld [vmem:[#allocation10 + $0x20] ss:$8 sps:$4 sm:$0xff]  }
 0x180   : > { %v837_v25 = vadd.s32 1, %v4153_v23  ;;  %v3182_v20 = vld [vmem:[#allocation10 + $0x34] ss:$8 sps:$4 sm:$0xff]   ;;  %v3185_v24 = vld [vmem:[#allocation10 + $0x44] ss:$8 sps:$4 sm:$0xff]  }
 0x181   : > { %vm836_vm5 = vc.u32 %v4150_v21, %v4152_v22  ;;  %v835_v39 = vadd.s32 %v4152_v22, %v4150_v21  ;;  %v3249_v21 = vld [vmem:[#allocation9 + $0x20] ss:$8 sps:$4 sm:$0xff]   ;;  %v3254_v22 = vld [vmem:[#allocation9 + $0x34] ss:$8 sps:$4 sm:$0xff]  }
 0x182   : > { %v838_v27 = vsel %vm836_vm5, %v837_v25, %v4153_v23  ;;  %v3180_v23 = vld [vmem:[#allocation10 + $0x30] ss:$8 sps:$4 sm:$0xff]   ;;  %v3257_v25 = vld [vmem:[#allocation9 + $0x44] ss:$8 sps:$4 sm:$0xff]  }
 0x183   : > { %v839_v28 = vadd.s32 %v838_v27, %v834_v26  ;;  %v3183_v26 = vld [vmem:[#allocation10 + $0x40] ss:$8 sps:$4 sm:$0xff]   ;;  %v3188_v27 = vld [vmem:[#allocation10 + $0x54] ss:$8 sps:$4 sm:$0xff]  }
 0x185   : > { %v840_v29 = vadd.s32 536870912, %v839_v28 }
 0x187   : > { %v841_v30 = vshrl.u32 %v840_v29, 30  ;;  %v3260_v29 = vld [vmem:[#allocation9 + $0x54] ss:$8 sps:$4 sm:$0xff]  }
 0x189   : > { %v842_v31 = vshll.u32 %v841_v30, 30  ;;  %v865_v53 = vsub.s32 4, %v841_v30 }
 0x18b   : > { %v843_v32 = vsub.s32 %v839_v28, %v842_v31  ;;  %v866_v56 = vsel %vm781_vm7, %v865_v53, %v841_v30  ;;  %v3255_v28 = vld [vmem:[#allocation9 + $0x40] ss:$8 sps:$4 sm:$0xff]   ;;  %v3186_v30 = vld [vmem:[#allocation10 + $0x50] ss:$8 sps:$4 sm:$0xff]   ;;  %v3191_v31 = vld [vmem:[#allocation10 + $0x64] ss:$8 sps:$4 sm:$0xff]  }
 0x18c   : > { %v868_v58 = vsel %vm780_vm8, 0, %v866_v56  ;;  %v3207_v53 = vld [vmem:[#allocation12 + $0x40] ss:$8 sps:$4 sm:$0xff]   ;;  %v3215_v56 = vld [vmem:[#allocation12 + $0x64] ss:$8 sps:$4 sm:$0xff]  }
 0x18d   : > { %v845_v33 = vsub.s32 0, %v843_v32  ;;  %v992_v59 = vadd.s32 3, %v868_v58  ;;  %v872_v61 = vand.u32 3, %v868_v58  ;;  %v3218_v58 = vld [vmem:[#allocation12 + $0x74] ss:$8 sps:$4 sm:$0xff]  }
 0x18f   : > { %v2796_v34 = vmin.u32 %v845_v33, %v843_v32  ;;  %v993_v60 = vand.u32 3, %v992_v59  ;;  %vm877_vm10 = vcmp.eq.s32.totalorder %v872_v61, 2  ;;  %vm874_vm12 = vcmp.eq.s32.totalorder %v872_v61, 0  ;;  %v3263_v33 = vld [vmem:[#allocation9 + $0x64] ss:$8 sps:$4 sm:$0xff]  }
 0x190   : > { %vm873_vm14 = vcmp.lt.s32.totalorder %v872_v61, 2  ;;  %v3216_v59 = vld [vmem:[#allocation12 + $0x70] ss:$8 sps:$4 sm:$0xff]   ;;  %v3219_v61 = vld [vmem:[#allocation12 + $0x80] ss:$8 sps:$4 sm:$0xff]  }
 0x191   : > { %v847_v35 = vclz %v2796_v34  ;;  %vm998_vm9 = vcmp.eq.s32.totalorder %v993_v60, 2  ;;  %vm995_vm11 = vcmp.eq.s32.totalorder %v993_v60, 0  ;;  %vm994_vm13 = vcmp.lt.s32.totalorder %v993_v60, 2  ;;  %v3189_v34 = vld [vmem:[#allocation10 + $0x60] ss:$8 sps:$4 sm:$0xff]  }
 0x192   : > { %v3221_v60 = vld [vmem:[#allocation12 + $0x84] ss:$8 sps:$4 sm:$0xff]  }
 0x193   : > { %v2797_v36 = vadd.s32 4294967294, %v847_v35  ;;  %v3194_v35 = vld [vmem:[#allocation10 + $0x74] ss:$8 sps:$4 sm:$0xff]  }
 0x195   : > { %vm2798_vm6 = vcmp.lt.s32.totalorder %v2797_v36, 0 }
 0x196   : > { %v850_v38 = vsel %vm2798_vm6, 0, %v2797_v36  ;;  %v3261_v36 = vld [vmem:[#allocation9 + $0x60] ss:$8 sps:$4 sm:$0xff]  }
 0x197   : > { %v851_v40 = vsub.s32 32, %v850_v38  ;;  %v855_v41 = vsub.s32 4294967266, %v850_v38  ;;  %v852_v43 = vshll.u32 %v843_v32, %v850_v38  ;;  %v3258_v32 = vld [vmem:[#allocation9 + $0x50] ss:$8 sps:$4 sm:$0xff]  }
 0x198   : > { %v3192_v38 = vld [vmem:[#allocation10 + $0x70] ss:$8 sps:$4 sm:$0xff]  }
 0x199   : > { %v853_v44 = vshrl.u32 %v835_v39, %v851_v40  ;;  %v856_v45 = vadd.s32 127, %v855_v41  ;;  %v1324_v39 = vld [vmem:[%s4359_s9] sm:$0xff]  ;;  %v1681_v41 = vld [vmem:[%s4360_s2 + $0x8] sm:$0xff] }
 0x19a   : > { %v3197_v40 = vld [vmem:[#allocation12 + $0x4] ss:$8 sps:$4 sm:$0xff]  }
 0x19b   : > { %v854_v47 = vor.u32 %v853_v44, %v852_v43  ;;  %v857_v48 = vshll.u32 %v856_v45, 23  ;;  %v1325_v43 = vpack.c.bf16 %v1324_v39, %v1324_v39  ;;  %v3195_v44 = vld [vmem:[#allocation12] ss:$8 sps:$4 sm:$0xff]   ;;  %v1683_v45 = vpack.c.bf16 %v1681_v41, %v1681_v41 }
 0x19d   : > { %v858_v49 = vor.u32 4788187, %v857_v48  ;;  %v861_v51 = vcvt.s32.f32 %v854_v47  ;;  %v3198_v47 = vld [vmem:[#allocation12 + $0x10] ss:$8 sps:$4 sm:$0xff]   ;;  %v3203_v48 = vld [vmem:[#allocation12 + $0x24] ss:$8 sps:$4 sm:$0xff]  }
 0x19f   : > { %v859_v50 = vand.u32 2147483647, %v858_v49  ;;  %v3201_v49 = vld [vmem:[#allocation12 + $0x20] ss:$8 sps:$4 sm:$0xff]  }
 0x1a1   : > { %v862_v52 = vmul.f32 %v861_v51, %v859_v50  ;;  %v3206_v50 = vld [vmem:[#allocation12 + $0x34] ss:$8 sps:$4 sm:$0xff]   ;;  %v3204_v51 = vld [vmem:[#allocation12 + $0x30] ss:$8 sps:$4 sm:$0xff]  }
 0x1a3   : > { %v863_v54 = vxor.u32 2147483648, %v862_v52 }
 0x1a5   : > { %v864_v55 = vsel %vm781_vm7, %v863_v54, %v862_v52  ;;  %v3209_v52 = vld [vmem:[#allocation12 + $0x44] ss:$8 sps:$4 sm:$0xff]   ;;  %v3212_v54 = vld [vmem:[#allocation12 + $0x54] ss:$8 sps:$4 sm:$0xff]  }
 0x1a6   : > { %v867_v57 = vsel %vm780_vm8, %v4143_v37, %v864_v55  ;;  %v3246_v37 = vld [vmem:[#allocation9 + $0x10] ss:$8 sps:$4 sm:$0xff]  }
 0x1a7   : > { %3291 = vcosq.f32 %v867_v57  ;;  %v3210_v55 = vld [vmem:[#allocation12 + $0x50] ss:$8 sps:$4 sm:$0xff]  }
 0x1a8   : > { %3293 = vsinq.f32 %v867_v57  ;;  %v3213_v57 = vld [vmem:[#allocation12 + $0x60] ss:$8 sps:$4 sm:$0xff]  }
 0x1b1   : > { %v3292_v62 = vpop.eup %3291 }
 0x1b2   : > { %v3294_v63 = vpop.eup %3293  ;;  %v878_v0 = vxor.u32 2147483648, %v3292_v62 }
 0x1b3   : > { %v875_v2 = vxor.u32 2147483648, %v3294_v63 }
 0x1b4   : > { %v1000_v3 = vsel %vm998_vm9, %v878_v0, %v3294_v63  ;;  %v879_v42 = vsel %vm877_vm10, %v878_v0, %v3294_v63  ;;  %v3222_v63 = vld [vmem:[#allocation12 + $0x90] ss:$8 sps:$4 sm:$0xff]   ;;  %v3227_v0 = vld [vmem:[#allocation12 + $0xa4] ss:$8 sps:$4 sm:$0xff]  }
 0x1b5   : > { %v997_v4 = vsel %vm995_vm11, %v3292_v62, %v875_v2  ;;  %v876_v5 = vsel %vm874_vm12, %v3292_v62, %v875_v2  ;;  %v3224_v62 = vld [vmem:[#allocation12 + $0x94] ss:$8 sps:$4 sm:$0xff]   ;;  %v3225_v2 = vld [vmem:[#allocation12 + $0xa0] ss:$8 sps:$4 sm:$0xff]  }
 0x1b6   : > { %v1001_v6 = vsel %vm994_vm13, %v997_v4, %v1000_v3  ;;  %v880_v7 = vsel %vm873_vm14, %v876_v5, %v879_v42  ;;  %v3230_v3 = vld [vmem:[#allocation12 + $0xb4] ss:$8 sps:$4 sm:$0xff]   ;;  %v3228_v42 = vld [vmem:[#allocation12 + $0xb0] ss:$8 sps:$4 sm:$0xff]   ;;  %v3233_v4 = vld [vmem:[#allocation12 + $0xc4] ss:$8 sps:$4 sm:$0xff]  }
 0x1b7   : > { %v1002_v9 = vsel %vm871_vm15, nan, %v1001_v6  ;;  %v881_v10 = vsel %vm871_vm15, nan, %v880_v7  ;;  %v3231_v5 = vld [vmem:[#allocation12 + $0xc0] ss:$8 sps:$4 sm:$0xff]   ;;  %v3236_v6 = vld [vmem:[#allocation12 + $0xd4] ss:$8 sps:$4 sm:$0xff]  }
 0x1b8   : > { %v1003_v11 = vpack.c.bf16 %v1002_v9, %v1002_v9  ;;  %v882_v12 = vpack.c.bf16 %v881_v10, %v881_v10  ;;  %v3234_v7 = vld [vmem:[#allocation12 + $0xd0] ss:$8 sps:$4 sm:$0xff]   ;;  %v3237_v9 = vld [vmem:[#allocation12 + $0xe0] ss:$8 sps:$4 sm:$0xff]   ;;  %v3266_v10 = vld [vmem:[#allocation9 + $0x74] ss:$8 sps:$4 sm:$0xff]  }
 0x1ba   : > { %1133 = vmatmul.mubr.bf16.vlgmr.msra.gmra.mrb[0].mxu0 %v1003_v11  ;;  %1254 = vmatmul.mubr.bf16.vlgmr.msra.gmra.mrb[0].mxu1 %v882_v12  ;;  %v3242_v11 = vld [vmem:[#allocation12 + $0xf4] ss:$8 sps:$4 sm:$0xff]   ;;  %v3264_v12 = vld [vmem:[#allocation9 + $0x70] ss:$8 sps:$4 sm:$0xff]  }
 0x1bb   : > { %1423 = vmatpush1.bf16.msra.mxu0 %v3171_v8  ;;  %1454 = vmatprep.mubr.bf16.mxu0 %v3724_v1  ;;  %v3252_v1 = vld [vmem:[#allocation9 + $0x30] ss:$8 sps:$4 sm:$0xff]   ;;  %v3239_v8 = vld [vmem:[#allocation12 + $0xe4] ss:$8 sps:$4 sm:$0xff]  }
 0x1bc   : > { %1424 = vmatprep.subr.bf16.mxu0 %v3176_v13  ;;  %1624 = vmatpush1.bf16.msra.mxu1 %v3243_v14  ;;  %v3240_v13 = vld [vmem:[#allocation12 + $0xf0] ss:$8 sps:$4 sm:$0xff]   ;;  %v1680_v14 = vld [vmem:[%s4360_s2] sm:$0xff] }
 0x1bd   : > { %1625 = vmatprep.subr.bf16.mxu1 %v3248_v15  ;;  %v3269_v15 = vld [vmem:[#allocation9 + $0x84] ss:$8 sps:$4 sm:$0xff]  }
 0x1bf   : > { %1425 = vmatpush1.bf16.msra.mxu0 %v3174_v16  ;;  %v3267_v16 = vld [vmem:[#allocation9 + $0x80] ss:$8 sps:$4 sm:$0xff]  }
 0x1c0   : > { %1426 = vmatprep.subr.bf16.mxu0 %v3179_v17  ;;  %1626 = vmatpush1.bf16.msra.mxu1 %v3246_v37  ;;  %v1682_v17 = vpack.c.bf16 %v1680_v14, %v1680_v14  ;;  %v3272_v37 = vld [vmem:[#allocation9 + $0x94] ss:$8 sps:$4 sm:$0xff]  }
 0x1c1   : > { %1627 = vmatprep.subr.bf16.mxu1 %v3251_v18  ;;  %v3270_v18 = vld [vmem:[#allocation9 + $0x90] ss:$8 sps:$4 sm:$0xff]  }
 0x1c3   : > { %1427 = vmatpush1.bf16.msra.mxu0 %v3177_v19  ;;  %v3275_v19 = vld [vmem:[#allocation9 + $0xa4] ss:$8 sps:$4 sm:$0xff]  }
 0x1c4   : > { %1428 = vmatprep.subr.bf16.mxu0 %v3182_v20  ;;  %1628 = vmatpush1.bf16.msra.mxu1 %v3249_v21  ;;  %v3273_v20 = vld [vmem:[#allocation9 + $0xa0] ss:$8 sps:$4 sm:$0xff]   ;;  %v3278_v21 = vld [vmem:[#allocation9 + $0xb4] ss:$8 sps:$4 sm:$0xff]  }
 0x1c5   : > { %1629 = vmatprep.subr.bf16.mxu1 %v3254_v22  ;;  %v3276_v22 = vld [vmem:[#allocation9 + $0xb0] ss:$8 sps:$4 sm:$0xff]  }
 0x1c7   : > { %1429 = vmatpush1.bf16.msra.mxu0 %v3180_v23  ;;  %v3281_v23 = vld [vmem:[#allocation9 + $0xc4] ss:$8 sps:$4 sm:$0xff]  }
 0x1c8   : > { %1430 = vmatprep.subr.bf16.mxu0 %v3185_v24  ;;  %1630 = vmatpush1.bf16.msra.mxu1 %v3252_v1  ;;  %v3279_v24 = vld [vmem:[#allocation9 + $0xc0] ss:$8 sps:$4 sm:$0xff]   ;;  %v3284_v1 = vld [vmem:[#allocation9 + $0xd4] ss:$8 sps:$4 sm:$0xff]  }
 0x1c9   : > { %1631 = vmatprep.subr.bf16.mxu1 %v3257_v25  ;;  %v3282_v25 = vld [vmem:[#allocation9 + $0xd0] ss:$8 sps:$4 sm:$0xff]  }
 0x1cb   : > { %1431 = vmatpush1.bf16.msra.mxu0 %v3183_v26  ;;  %v3287_v26 = vld [vmem:[#allocation9 + $0xe4] ss:$8 sps:$4 sm:$0xff]  }
 0x1cc   : > { %1432 = vmatprep.subr.bf16.mxu0 %v3188_v27  ;;  %1632 = vmatpush1.bf16.msra.mxu1 %v3255_v28  ;;  %v3285_v27 = vld [vmem:[#allocation9 + $0xe0] ss:$8 sps:$4 sm:$0xff]   ;;  %v3290_v28 = vld [vmem:[#allocation9 + $0xf4] ss:$8 sps:$4 sm:$0xff]  }
 0x1cd   : > { %1633 = vmatprep.subr.bf16.mxu1 %v3260_v29  ;;  %v3288_v29 = vld [vmem:[#allocation9 + $0xf0] ss:$8 sps:$4 sm:$0xff]  }
 0x1cf   : > { %1433 = vmatpush1.bf16.msra.mxu0 %v3186_v30  ;;  %v1264_v30 = vlaneseq }
 0x1d0   : > { %1434 = vmatprep.subr.bf16.mxu0 %v3191_v31  ;;  %1634 = vmatpush1.bf16.msra.mxu1 %v3258_v32 }
 0x1d1   : > { %1635 = vmatprep.subr.bf16.mxu1 %v3263_v33  ;;  %v1265_v31 = vshrl.u32 %v1264_v30, 7  ;;  %v1262_v33 = vld [vmem:[%s4361_s25] sm:$0x3] }
 0x1d3   : > { %1435 = vmatpush1.bf16.msra.mxu0 %v3189_v34  ;;  %v4174_v32 = vsub.s32 0, %v1265_v31  ;;  %v4179_v34 = vsub.s32 1, %v1265_v31 }
 0x1d4   : > { %1436 = vmatprep.subr.bf16.mxu0 %v3194_v35  ;;  %1636 = vmatpush1.bf16.msra.mxu1 %v3261_v36 }
 0x1d5   : > { %1637 = vmatprep.subr.bf16.mxu1 %v3266_v10  ;;  %v1267_v35 = vrot.slane %v1262_v33, %v4174_v32  ;;  %v1271_v39 = vrot.slane %v1262_v33, %v4179_v34 }
 0x1d7   : > { %1437 = vmatpush1.bf16.msra.mxu0 %v3192_v38 }
 0x1d8   : > { %1888 = vmatprep.subr.bf16.mxu0 %v3197_v40  ;;  %1638 = vmatpush1.bf16.msra.mxu1 %v3264_v12 }
 0x1d9   : > { %1639 = vmatprep.subr.bf16.mxu1 %v3269_v15 }
 0x1da   : > { %1455 = vmatmul.mubr.bf16.vlgmr.msra.gmra.mrb[4].mxu0 %v1325_v43 }
 0x1db   : > { %1889 = vmatpush1.bf16.msra.mxu0 %v3195_v44  ;;  %1920 = vmatprep.mubr.bf16.mxu0 %v1683_v45 }
 0x1dc   : > { %1890 = vmatprep.subr.bf16.mxu0 %v3200_v46  ;;  %1640 = vmatpush1.bf16.msra.mxu1 %v3267_v16 }
 0x1dd   : > { %1641 = vmatprep.subr.bf16.mxu1 %v3272_v37 }
 0x1df   : > { %1891 = vmatpush1.bf16.msra.mxu0 %v3198_v47 }
 0x1e0   : > { %1892 = vmatprep.subr.bf16.mxu0 %v3203_v48  ;;  %1642 = vmatpush1.bf16.msra.mxu1 %v3270_v18  ;;  %v1664_v18 = vld [vmem:[%s4363_s13] sm:$0x3] }
 0x1e1   : > { %1643 = vmatprep.subr.bf16.mxu1 %v3275_v19 }
 0x1e3   : > { %1893 = vmatpush1.bf16.msra.mxu0 %v3201_v49 }
 0x1e4   : > { %1894 = vmatprep.subr.bf16.mxu0 %v3206_v50  ;;  %1644 = vmatpush1.bf16.msra.mxu1 %v3273_v20 }
 0x1e5   : > { %1645 = vmatprep.subr.bf16.mxu1 %v3278_v21  ;;  %v1669_v21 = vrot.slane %v1664_v18, %v4174_v32 }
 0x1e7   : > { %1895 = vmatpush1.bf16.msra.mxu0 %v3204_v51 }
 0x1e8   : > { %1896 = vmatprep.subr.bf16.mxu0 %v3209_v52  ;;  %1646 = vmatpush1.bf16.msra.mxu1 %v3276_v22 }
 0x1e9   : > { %1647 = vmatprep.subr.bf16.mxu1 %v3281_v23 }
 0x1eb   : > { %1897 = vmatpush1.bf16.msra.mxu0 %v3207_v53 }
 0x1ec   : > { %1898 = vmatprep.subr.bf16.mxu0 %v3212_v54  ;;  %1648 = vmatpush1.bf16.msra.mxu1 %v3279_v24  ;;  %v1673_v24 = vrot.slane %v1664_v18, %v4179_v34 }
 0x1ed   : > { %1649 = vmatprep.subr.bf16.mxu1 %v3284_v1 }
 0x1ef   : > { %1899 = vmatpush1.bf16.msra.mxu0 %v3210_v55 }
 0x1f0   : > { %1900 = vmatprep.subr.bf16.mxu0 %v3215_v56  ;;  %1650 = vmatpush1.bf16.msra.mxu1 %v3282_v25 }
 0x1f1   : > { %1651 = vmatprep.subr.bf16.mxu1 %v3287_v26 }
 0x1f3   : > { %1901 = vmatpush1.bf16.msra.mxu0 %v3213_v57 }
 0x1f4   : > { %1902 = vmatprep.subr.bf16.mxu0 %v3218_v58  ;;  %1652 = vmatpush1.bf16.msra.mxu1 %v3285_v27 }
 0x1f5   : > { %1653 = vmatprep.subr.bf16.mxu1 %v3290_v28 }
 0x1f7   : > { %1903 = vmatpush1.bf16.msra.mxu0 %v3216_v59 }
 0x1f8   : > { %1904 = vmatprep.subr.bf16.mxu0 %v3221_v60  ;;  %1654 = vmatpush1.bf16.msra.mxu1 %v3288_v29 }
 0x1fb   : > { %1905 = vmatpush1.bf16.msra.mxu0 %v3219_v61 }
 0x1fc   : > { %1906 = vmatprep.subr.bf16.mxu0 %v3224_v62 }
 0x1ff   : > { %1907 = vmatpush1.bf16.msra.mxu0 %v3222_v63 }
 0x200   : > { %1908 = vmatprep.subr.bf16.mxu0 %v3227_v0 }
 0x203   : > { %1909 = vmatpush1.bf16.msra.mxu0 %v3225_v2 }
 0x204   : > { %1910 = vmatprep.subr.bf16.mxu0 %v3230_v3 }
 0x207   : > { %1911 = vmatpush1.bf16.msra.mxu0 %v3228_v42 }
 0x208   : > { %1912 = vmatprep.subr.bf16.mxu0 %v3233_v4 }
 0x20b   : > { %1913 = vmatpush1.bf16.msra.mxu0 %v3231_v5  ;;  %v1716_v5 = vld [vmem:[%s4362_s17] sm:$0x3] }
 0x20c   : > { %1914 = vmatprep.subr.bf16.mxu0 %v3236_v6  ;;  %v1721_v6 = vrot.slane %v1716_v5, %v4174_v32 }
 0x20f   : > { %1915 = vmatpush1.bf16.msra.mxu0 %v3234_v7  ;;  %v1725_v7 = vrot.slane %v1716_v5, %v4179_v34 }
 0x210   : > { %1916 = vmatprep.subr.bf16.mxu0 %v3239_v8 }
 0x213   : > { %1917 = vmatpush1.bf16.msra.mxu0 %v3237_v9 }
 0x214   : > { %1918 = vmatprep.subr.bf16.mxu0 %v3242_v11 }
 0x217   : > { %1919 = vmatpush1.bf16.msra.mxu0 %v3240_v13 }
 0x21a   : > { %1921 = vmatmul.mubr.bf16.vlgmr.msra.gmra.mrb[8].mxu0 %v1682_v17 }
 0x28d   : > { %v1134_v36 = vpop.f32.mrb[0].mxu0  ;;  %v1255_v38 = vpop.f32.mrb[0].mxu1 }
 0x28e   : > { %v1256_v40 = vadd.f32 %v1255_v38, %v1134_v36  ;;  %v1136_v41 = vpop.f32.mrb[1].mxu0  ;;  %v1257_v43 = vpop.f32.mrb[1].mxu1  ;;  %v1929_v36 = vld [vmem:[%s4364_s11] sm:$0x3] }
 0x28f   : > { %v1258_v44 = vadd.f32 %v1257_v43, %v1136_v41  ;;  %v1138_v45 = vpop.f32.mrb[2].mxu0  ;;  %v1259_v46 = vpop.f32.mrb[2].mxu1  ;;  %v1930_v38 = vld [vmem:[%s4365_s27] sm:$0x3] }
 0x290   : > { %v1274_v47 = vadd.f32 %v1267_v35, %v1256_v40  ;;  %v1139_v48 = vpop.f32.mrb[3].mxu0  ;;  %v1260_v49 = vpop.f32.mrb[3].mxu1  ;;  %v1956_v40 = vrot.slane %v1929_v36, %v4179_v34  ;;  %v1965_v43 = vrot.slane %v1930_v38, %v4174_v32 }
 0x291   : > { %v1275_v50 = vadd.f32 %v1271_v39, %v1258_v44  ;;  %v1952_v39 = vrot.slane %v1929_v36, %v4174_v32  ;;  %v1969_v44 = vrot.slane %v1930_v38, %v4179_v34 }
 0x292   : > { %v1276_v51 = vsub.f32 0.0, %v1274_v47 }
 0x293   : > { %v1277_v52 = vsub.f32 0.0, %v1275_v50 }
 0x294   : > { %v1278_v53 = vmul.f32 1.442695, %v1276_v51 }
 0x295   : > { %v1280_v54 = vmul.f32 1.442695, %v1277_v52 }
 0x296   : > { %3295 = vpow2.f32 %v1278_v53 }
 0x297   : > { %3297 = vpow2.f32 %v1280_v54 }
 0x2a0   : > { %v3296_v55 = vpop.eup %3295 }
 0x2a1   : > { %v3298_v56 = vpop.eup %3297  ;;  %v1282_v57 = vadd.f32 1.0, %v3296_v55 }
 0x2a2   : > { %v1283_v58 = vadd.f32 1.0, %v3298_v56 }
 0x2a3   : > { %3299 = vrcp.f32 %v1282_v57 }
 0x2a4   : > { %3301 = vrcp.f32 %v1283_v58 }
 0x2ad   : > { %v3300_v59 = vpop.eup %3299  ;;  %v1456_v60 = vpop.f32.mrb[4].mxu0 }
 0x2ae   : > { %v3302_v61 = vpop.eup %3301  ;;  %v1288_v62 = vmul.f32 %v3300_v59, %v1274_v47  ;;  %v1458_v63 = vpop.f32.mrb[5].mxu0 }
 0x2af   : > { %v1460_v0 = vpop.f32.mrb[6].mxu0  ;;  %v1289_v2 = vmul.f32 %v3302_v61, %v1275_v50 }
 0x2b0   : > { %v1461_v3 = vpop.f32.mrb[7].mxu0  ;;  %v1290_v4 = vpack.c.bf16 %v1288_v62, %v1288_v62 }
 0x2b1   : > { %v1291_v42 = vpack.c.bf16 %v1289_v2, %v1289_v2 }
 0x2b3   : > { %1655 = vmatprep.mubr.bf16.mxu1 %v1291_v42 }
 0x2b4   : > { %1656 = vmatmul.mubr.bf16.vlgmr.msra.gmra.mrb[4].mxu1 %v1290_v4 }
 0x2ed   : > { %v1922_v8 = vpop.f32.mrb[8].mxu0 }
 0x2ee   : > { %v1923_v9 = vadd.f32 %v1922_v8, %v1721_v6  ;;  %v1924_v10 = vpop.f32.mrb[9].mxu0 }
 0x2ef   : > { %v1925_v11 = vadd.f32 %v1924_v10, %v1725_v7  ;;  %v1926_v12 = vpop.f32.mrb[10].mxu0 }
 0x2f0   : > { %v1927_v13 = vpop.f32.mrb[11].mxu0 }
 0x2f1   : > { %v1931_v14 = vadd.f32 %v1925_v11, %v1923_v9 }
 0x2f3   : > { %1932 = vadd.xlane.f32.xlu0 %v1931_v14 }
 0x380   : > { %v1933_v15 = vpop.xlane.xlu0 %1932 }
 0x381   : > { %v1935_v16 = vmul.f32 0.00390625, %v1933_v15 }
 0x383   : > { %v1936_v17 = vsub.f32 %v1923_v9, %v1935_v16  ;;  %v1937_v37 = vsub.f32 %v1925_v11, %v1935_v16 }
 0x385   : > { %v1938_v19 = vmul.f32 %v1936_v17, %v1936_v17  ;;  %v1939_v20 = vmul.f32 %v1937_v37, %v1937_v37 }
 0x387   : > { %v1657_v22 = vpop.f32.mrb[4].mxu1  ;;  %v1940_v23 = vadd.f32 %v1939_v20, %v1938_v19 }
 0x388   : > { %v1658_v1 = vadd.f32 %v1657_v22, %v1456_v60  ;;  %v1659_v25 = vpop.f32.mrb[5].mxu1 }
 0x389   : > { %1941 = vadd.xlane.f32.xlu1 %v1940_v23  ;;  %v1660_v26 = vadd.f32 %v1659_v25, %v1458_v63  ;;  %v1661_v27 = vpop.f32.mrb[6].mxu1 }
 0x38a   : > { %v1676_v28 = vadd.f32 %v1669_v21, %v1658_v1  ;;  %v1662_v29 = vpop.f32.mrb[7].mxu1 }
 0x38b   : > { %v1677_v30 = vadd.f32 %v1673_v24, %v1660_v26 }
 0x38c   : > { %1678 = vst [vmem:[#allocation3] sm:$0xff] %v1676_v28 }
 0x38d   : > { %1679 = vst [vmem:[#allocation3 + $0x8] sm:$0xff] %v1677_v30 }
 0x416   : > { %v1942_v31 = vpop.xlane.xlu1 %1941 }
 0x417   : > { %v1943_v33 = vmul.f32 0.00390625, %v1942_v31 }
 0x419   : > { %v1944_v35 = vadd.f32 1e-05, %v1943_v33 }
 0x41b   : > { %3303 = vrsqrt.f32 %v1944_v35 }
 0x425   : > { %v3304_v41 = vpop.eup %3303 }
 0x426   : > { %v1946_v45 = vmul.f32 %v3304_v41, %v1936_v17  ;;  %v1947_v46 = vmul.f32 %v3304_v41, %v1937_v37 }
 0x428   : > { %v1959_v47 = vmul.f32 %v1952_v39, %v1946_v45  ;;  %v1960_v48 = vmul.f32 %v1956_v40, %v1947_v46 }
 0x42a   : > { %v1972_v49 = vadd.f32 %v1965_v43, %v1959_v47  ;;  %v1973_v50 = vadd.f32 %v1969_v44, %v1960_v48 }
 0x42c   : > { %v1974_v51 = vsub.f32 0.0, %v1972_v49  ;;  %v1975_v52 = vsub.f32 0.0, %v1973_v50 }
 0x42e   : > { %v1976_v53 = vmul.f32 1.442695, %v1974_v51  ;;  %v1978_v54 = vmul.f32 1.442695, %v1975_v52 }
 0x430   : > { %3305 = vpow2.f32 %v1976_v53 }
 0x431   : > { %3307 = vpow2.f32 %v1978_v54 }
 0x43a   : > { %v3306_v55 = vpop.eup %3305 }
 0x43b   : > { %v3308_v56 = vpop.eup %3307  ;;  %v1980_v57 = vadd.f32 1.0, %v3306_v55 }
 0x43c   : > { %v1981_v58 = vadd.f32 1.0, %v3308_v56 }
 0x43d   : > { %3309 = vrcp.f32 %v1980_v57 }
 0x43e   : > { %3311 = vrcp.f32 %v1981_v58 }
 0x447   : > { %v3310_v32 = vpop.eup %3309 }
 0x448   : > { %v3312_v34 = vpop.eup %3311  ;;  %v1986_v59 = vmul.f32 %v3310_v32, %v1972_v49 }
 0x449   : > { %v1987_v60 = vmul.f32 %v3312_v34, %v1973_v50 }
 0x44a   : > { %1988 = vst [vmem:[#allocation2] sm:$0xff] %v1986_v59 }
 0x44b   : > { %1989 = vst [vmem:[#allocation2 + $0x8] sm:$0xff] %v1987_v60 }
 0x44c PF: > { %v3313_v61 = vld [vmem:[%s4116_s22 + $0x4] ss:$8 sps:$4 sm:$0xff]   ;;  %v3315_v62 = vld [vmem:[%s4116_s22] ss:$8 sps:$4 sm:$0xff]   ;;  %v3316_v63 = vld [vmem:[%s4116_s22 + $0x14] ss:$8 sps:$4 sm:$0xff]   ;;  %v2032_v38 = vlaneseq }
 0x44d   : > { %2210 = vmatprep.subr.bf16.mxu0 %v3313_v61  ;;  %v3318_v0 = vld [vmem:[%s4116_s22 + $0x10] ss:$8 sps:$4 sm:$0xff]   ;;  %v3319_v2 = vld [vmem:[%s4116_s22 + $0x24] ss:$8 sps:$4 sm:$0xff]   ;;  %v3321_v3 = vld [vmem:[%s4116_s22 + $0x20] ss:$8 sps:$4 sm:$0xff]  }
 0x44e   : > { %2211 = vmatpush1.bf16.msra.mxu0 %v3315_v62  ;;  %v3322_v42 = vld [vmem:[%s4116_s22 + $0x34] ss:$8 sps:$4 sm:$0xff]   ;;  %v3324_v4 = vld [vmem:[%s4116_s22 + $0x30] ss:$8 sps:$4 sm:$0xff]   ;;  %v3325_v5 = vld [vmem:[%s4116_s22 + $0x44] ss:$8 sps:$4 sm:$0xff]  }
 0x44f   : > { %2212 = vmatprep.subr.bf16.mxu0 %v3316_v63  ;;  %v3327_v6 = vld [vmem:[%s4116_s22 + $0x40] ss:$8 sps:$4 sm:$0xff]   ;;  %v3328_v7 = vld [vmem:[%s4116_s22 + $0x54] ss:$8 sps:$4 sm:$0xff]   ;;  %v3330_v8 = vld [vmem:[%s4116_s22 + $0x50] ss:$8 sps:$4 sm:$0xff]  }
 0x450   : > { %v3331_v9 = vld [vmem:[%s4116_s22 + $0x64] ss:$8 sps:$4 sm:$0xff]   ;;  %v2026_v11 = vld [vmem:[#allocation3 + $0x8] sm:$0xff]  ;;  %v3333_v13 = vld [vmem:[%s4116_s22 + $0x60] ss:$8 sps:$4 sm:$0xff]   ;;  %v2033_v39 = vshrl.u32 %v2032_v38, 7 }
 0x451   : > { %v3334_v14 = vld [vmem:[%s4116_s22 + $0x74] ss:$8 sps:$4 sm:$0xff]   ;;  %v3336_v16 = vld [vmem:[%s4116_s22 + $0x70] ss:$8 sps:$4 sm:$0xff]   ;;  %v3337_v17 = vld [vmem:[%s4116_s22 + $0x84] ss:$8 sps:$4 sm:$0xff]  }
 0x452   : > { %2213 = vmatpush1.bf16.msra.mxu0 %v3318_v0  ;;  %v2024_v10 = vld [vmem:[#allocation2 + $0x8] sm:$0xff]  ;;  %v3340_v18 = vld [vmem:[%s4116_s22 + $0x94] ss:$8 sps:$4 sm:$0xff]   ;;  %v3342_v19 = vld [vmem:[%s4116_s22 + $0x90] ss:$8 sps:$4 sm:$0xff]   ;;  %v4243_v40 = vsub.s32 0, %v2033_v39 }
 0x453   : > { %2214 = vmatprep.subr.bf16.mxu0 %v3319_v2  ;;  %v4216_v12 = vadd.f32 %v2026_v11, %v2024_v10  ;;  %v3339_v37 = vld [vmem:[%s4116_s22 + $0x80] ss:$8 sps:$4 sm:$0xff]   ;;  %v3343_v20 = vld [vmem:[%s4116_s22 + $0xa4] ss:$8 sps:$4 sm:$0xff]   ;;  %v3346_v22 = vld [vmem:[%s4116_s22 + $0xb4] ss:$8 sps:$4 sm:$0xff]  }
 0x454   : > { %v3345_v21 = vld [vmem:[%s4116_s22 + $0xa0] ss:$8 sps:$4 sm:$0xff]   ;;  %v3348_v23 = vld [vmem:[%s4116_s22 + $0xb0] ss:$8 sps:$4 sm:$0xff]   ;;  %v3349_v24 = vld [vmem:[%s4116_s22 + $0xc4] ss:$8 sps:$4 sm:$0xff]  }
 0x455   : > { %v2030_v15 = vpack.c.bf16 %v4216_v12, %v4216_v12  ;;  %v3351_v1 = vld [vmem:[%s4116_s22 + $0xc0] ss:$8 sps:$4 sm:$0xff]   ;;  %v3352_v25 = vld [vmem:[%s4116_s22 + $0xd4] ss:$8 sps:$4 sm:$0xff]   ;;  %v3354_v26 = vld [vmem:[%s4116_s22 + $0xd0] ss:$8 sps:$4 sm:$0xff]  }
 0x456   : > { %2215 = vmatpush1.bf16.msra.mxu0 %v3321_v3  ;;  %v3355_v27 = vld [vmem:[%s4116_s22 + $0xe4] ss:$8 sps:$4 sm:$0xff]   ;;  %v3357_v28 = vld [vmem:[%s4116_s22 + $0xe0] ss:$8 sps:$4 sm:$0xff]   ;;  %v2025_v30 = vld [vmem:[#allocation3] sm:$0xff]  ;;  %v2038_v43 = vsub.s32 4, %v2033_v39 }
 0x457   : > { %2216 = vmatprep.subr.bf16.mxu0 %v3322_v42  ;;  %2242 = vmatprep.mubr.bf16.mxu0 %v2030_v15  ;;  %v2023_v29 = vld [vmem:[#allocation2] sm:$0xff]  ;;  %v3358_v31 = vld [vmem:[%s4116_s22 + $0xf4] ss:$8 sps:$4 sm:$0xff]   ;;  %v3360_v35 = vld [vmem:[%s4116_s22 + $0xf0] ss:$8 sps:$4 sm:$0xff]   ;;  %v4249_v63 = vsub.s32 1, %v2033_v39 }
 0x458   : > { %v4238_v33 = vadd.f32 %v2025_v30, %v2023_v29  ;;  %v2022_v41 = vld [vmem:[%s4131_s21] sm:$0x77]  ;;  %v2274_v0 = vsub.s32 5, %v2033_v39  ;;  %v2290_v2 = vsub.s32 2, %v2033_v39  ;;  %v2294_v3 = vsub.s32 6, %v2033_v39  ;;  %p2947_p4 = scmp.ne.s32.totalorder %s3705_s30, 3 }
 0x459   : > { %v2035_v44 = vrot.slane %v2022_v41, %v4243_v40  ;;  %v2039_v45 = vrot.slane %v2022_v41, %v2038_v43  ;;  %v2271_v42 = vrot.slane %v2022_v41, %v4249_v63  ;;  %v3376_v38 = vld [vmem:[#allocation15 + $0x10] ss:$8 sps:$4 sm:$0xff] (!%p2947_p4)   ;;  %v3377_v39 = vld [vmem:[#allocation15 + $0x24] ss:$8 sps:$4 sm:$0xff] (!%p2947_p4)   ;;  %v3380_v43 = vld [vmem:[#allocation15 + $0x34] ss:$8 sps:$4 sm:$0xff] (!%p2947_p4)  }
 0x45a   : > { %2217 = vmatpush1.bf16.msra.mxu0 %v3324_v4  ;;  %v2029_v36 = vpack.c.bf16 %v4238_v33, %v4238_v33  ;;  %v2275_v4 = vrot.slane %v2022_v41, %v2274_v0  ;;  %v3413_v0 = vld [vmem:[#allocation15 + $0xe4] ss:$8 sps:$4 sm:$0xff] (!%p2947_p4)   ;;  %s4366_s21 = sld [smem:[#allocation34_spill]] (!%p2947_p4) }
 0x45b   : > { %2218 = vmatprep.subr.bf16.mxu0 %v3325_v5  ;;  %v2045_v46 = vrot.slane %v2035_v44, %v4243_v40  ;;  %v2049_v47 = vrot.slane %v2039_v45, %v4243_v40  ;;  %v2291_v5 = vrot.slane %v2022_v41, %v2290_v2  ;;  %v3385_v44 = vld [vmem:[#allocation15 + $0x40] ss:$8 sps:$4 sm:$0xff] (!%p2947_p4)   ;;  %v3386_v45 = vld [vmem:[#allocation15 + $0x54] ss:$8 sps:$4 sm:$0xff] (!%p2947_p4)  }
 0x45d   : > { %v2301_v10 = vrot.slane %v2291_v5, %v2290_v2 }
 0x45e   : > { %2219 = vmatpush1.bf16.msra.mxu0 %v3327_v6  ;;  %v2295_v6 = vrot.slane %v2022_v41, %v2294_v3  ;;  %v3379_v41 = vld [vmem:[#allocation15 + $0x20] ss:$8 sps:$4 sm:$0xff] (!%p2947_p4)   ;;  %v3416_v3 = vld [vmem:[#allocation15 + $0xf4] ss:$8 sps:$4 sm:$0xff] (!%p2947_p4)  }
 0x45f   : > { %2220 = vmatprep.subr.bf16.mxu0 %v3328_v7  ;;  %v2281_v7 = vrot.slane %v2271_v42, %v4249_v63  ;;  %v3418_v42 = vld [vmem:[#allocation15 + $0xf0] ss:$8 sps:$4 sm:$0xff] (!%p2947_p4)  }
 0x460   : > { %v2305_v11 = vrot.slane %v2295_v6, %v2290_v2  ;;  %v3415_v2 = vld [vmem:[#allocation15 + $0xe0] ss:$8 sps:$4 sm:$0xff] (!%p2947_p4)  }
 0x461   : > { %v2366_v6 = vld [vmem:[%s4366_s21] sm:$0x3] (!%p2947_p4) }
 0x462   : > { %2221 = vmatpush1.bf16.msra.mxu0 %v3330_v8  ;;  %v2285_v8 = vrot.slane %v2275_v4, %v4249_v63 }
 0x463   : > { %2222 = vmatprep.subr.bf16.mxu0 %v3331_v9 }
 0x466   : > { %2223 = vmatpush1.bf16.msra.mxu0 %v3333_v13 }
 0x467   : > { %2224 = vmatprep.subr.bf16.mxu0 %v3334_v14 }
 0x46a   : > { %2225 = vmatpush1.bf16.msra.mxu0 %v3336_v16 }
 0x46b   : > { %2226 = vmatprep.subr.bf16.mxu0 %v3337_v17 }
 0x46e   : > { %2227 = vmatpush1.bf16.msra.mxu0 %v3339_v37 }
 0x46f   : > { %2228 = vmatprep.subr.bf16.mxu0 %v3340_v18 }
 0x472   : > { %2229 = vmatpush1.bf16.msra.mxu0 %v3342_v19 }
 0x473   : > { %2230 = vmatprep.subr.bf16.mxu0 %v3343_v20 }
 0x476   : > { %2231 = vmatpush1.bf16.msra.mxu0 %v3345_v21 }
 0x477   : > { %2232 = vmatprep.subr.bf16.mxu0 %v3346_v22 }
 0x47a   : > { %2233 = vmatpush1.bf16.msra.mxu0 %v3348_v23 }
 0x47b   : > { %2234 = vmatprep.subr.bf16.mxu0 %v3349_v24 }
 0x47e   : > { %2235 = vmatpush1.bf16.msra.mxu0 %v3351_v1 }
 0x47f   : > { %2236 = vmatprep.subr.bf16.mxu0 %v3352_v25 }
 0x482   : > { %2237 = vmatpush1.bf16.msra.mxu0 %v3354_v26 }
 0x483   : > { %2238 = vmatprep.subr.bf16.mxu0 %v3355_v27 }
 0x486   : > { %2239 = vmatpush1.bf16.msra.mxu0 %v3357_v28 }
 0x487   : > { %2240 = vmatprep.subr.bf16.mxu0 %v3358_v31  ;;  %v3371_v31 = vld [vmem:[#allocation15 + $0x4] ss:$8 sps:$4 sm:$0xff] (!%p2947_p4)  }
 0x48a   : > { %2241 = vmatpush1.bf16.msra.mxu0 %v3360_v35  ;;  %v3373_v35 = vld [vmem:[#allocation15] ss:$8 sps:$4 sm:$0xff] (!%p2947_p4)  }
 0x48b   : > { %2538 = vmatprep.subr.bf16.mxu0 (!%p2947_p4), %v3371_v31 }
 0x48d   : > { %2243 = vmatmul.mubr.bf16.vlgmr.msra.gmra.mrb[0].mxu0 %v2029_v36  ;;  %v3374_v36 = vld [vmem:[#allocation15 + $0x14] ss:$8 sps:$4 sm:$0xff] (!%p2947_p4)  }
 0x48e   : > { %2539 = vmatpush1.bf16.msra.mxu0 (!%p2947_p4), %v3373_v35 }
 0x48f   : > { %2540 = vmatprep.subr.bf16.mxu0 (!%p2947_p4), %v3374_v36 }
 0x492   : > { %2541 = vmatpush1.bf16.msra.mxu0 (!%p2947_p4), %v3376_v38 }
 0x493   : > { %2542 = vmatprep.subr.bf16.mxu0 (!%p2947_p4), %v3377_v39 }
 0x496   : > { %2543 = vmatpush1.bf16.msra.mxu0 (!%p2947_p4), %v3379_v41 }
 0x497   : > { %2544 = vmatprep.subr.bf16.mxu0 (!%p2947_p4), %v3380_v43 }
 0x560   : > { %v2244_v48 = vpop.f32.mrb[0].mxu0 }
 0x561   : > { %v2245_v49 = vadd.f32 %v2244_v48, %v2045_v46  ;;  %v2246_v50 = vpop.f32.mrb[1].mxu0  ;;  %v3388_v46 = vld [vmem:[#allocation15 + $0x50] ss:$8 sps:$4 sm:$0xff] (!%p2947_p4)  }
 0x562   : > { %v2247_v51 = vadd.f32 %v2246_v50, %v2049_v47  ;;  %v2248_v52 = vpop.f32.mrb[2].mxu0  ;;  %v3389_v47 = vld [vmem:[#allocation15 + $0x64] ss:$8 sps:$4 sm:$0xff] (!%p2947_p4)   ;;  %v3391_v50 = vld [vmem:[#allocation15 + $0x60] ss:$8 sps:$4 sm:$0xff] (!%p2947_p4)  }
 0x563   : > { %v2249_v53 = vpop.f32.mrb[3].mxu0  ;;  %v3394_v52 = vld [vmem:[#allocation15 + $0x70] ss:$8 sps:$4 sm:$0xff] (!%p2947_p4)  }
 0x564   : > { %v2251_v54 = vadd.f32 %v2247_v51, %v2245_v49  ;;  %v3395_v53 = vld [vmem:[#allocation15 + $0x84] ss:$8 sps:$4 sm:$0xff] (!%p2947_p4)  }
 0x566   : > { %2252 = vadd.xlane.f32.xlu0 %v2251_v54  ;;  %v3397_v54 = vld [vmem:[#allocation15 + $0x80] ss:$8 sps:$4 sm:$0xff] (!%p2947_p4)  }
 0x5f3   : > { %v2253_v55 = vpop.xlane.xlu0 %2252 }
 0x5f4   : > { %v2255_v56 = vmul.f32 0.00390625, %v2253_v55  ;;  %v3398_v55 = vld [vmem:[#allocation15 + $0x94] ss:$8 sps:$4 sm:$0xff] (!%p2947_p4)  }
 0x5f6   : > { %v2256_v57 = vsub.f32 %v2245_v49, %v2255_v56  ;;  %v2257_v58 = vsub.f32 %v2247_v51, %v2255_v56  ;;  %v3392_v51 = vld [vmem:[#allocation15 + $0x74] ss:$8 sps:$4 sm:$0xff] (!%p2947_p4)   ;;  %v3400_v56 = vld [vmem:[#allocation15 + $0x90] ss:$8 sps:$4 sm:$0xff] (!%p2947_p4)  }
 0x5f8   : > { %v2258_v32 = vmul.f32 %v2256_v57, %v2256_v57  ;;  %v2259_v34 = vmul.f32 %v2257_v58, %v2257_v58 }
 0x5fa   : > { %v2260_v59 = vadd.f32 %v2259_v34, %v2258_v32  ;;  %v3404_v32 = vld [vmem:[#allocation15 + $0xb4] ss:$8 sps:$4 sm:$0xff] (!%p2947_p4)   ;;  %v3406_v34 = vld [vmem:[#allocation15 + $0xb0] ss:$8 sps:$4 sm:$0xff] (!%p2947_p4)  }
 0x5fc   : > { %2261 = vadd.xlane.f32.xlu0 %v2260_v59  ;;  %v3407_v59 = vld [vmem:[#allocation15 + $0xc4] ss:$8 sps:$4 sm:$0xff] (!%p2947_p4)  }
 0x689   : > { %v2262_v60 = vpop.xlane.xlu0 %2261 }
 0x68a   : > { %v2263_v61 = vmul.f32 0.00390625, %v2262_v60  ;;  %v3409_v60 = vld [vmem:[#allocation15 + $0xc0] ss:$8 sps:$4 sm:$0xff] (!%p2947_p4)  }
 0x68c   : > { %v2264_v62 = vadd.f32 1e-05, %v2263_v61  ;;  %v3410_v61 = vld [vmem:[#allocation15 + $0xd4] ss:$8 sps:$4 sm:$0xff] (!%p2947_p4)  }
 0x68e   : > { %3361 = vrsqrt.f32 %v2264_v62  ;;  %v3412_v62 = vld [vmem:[#allocation15 + $0xd0] ss:$8 sps:$4 sm:$0xff] (!%p2947_p4)  }
 0x698   : > { %v3362_v9 = vpop.eup %3361 }
 0x699   : > { %v2266_v13 = vmul.f32 %v3362_v9, %v2256_v57  ;;  %v2267_v14 = vmul.f32 %v3362_v9, %v2257_v58  ;;  %v3401_v57 = vld [vmem:[#allocation15 + $0xa4] ss:$8 sps:$4 sm:$0xff] (!%p2947_p4)   ;;  %v3403_v58 = vld [vmem:[#allocation15 + $0xa0] ss:$8 sps:$4 sm:$0xff] (!%p2947_p4)  }
 0x69b   : > { %v2286_v15 = vmul.f32 %v2281_v7, %v2266_v13  ;;  %v2287_v16 = vmul.f32 %v2285_v8, %v2267_v14  ;;  %v2371_v7 = vrot.slane (!%p2947_p4), %v2366_v6, %v4243_v40  ;;  %v2375_v8 = vrot.slane (!%p2947_p4), %v2366_v6, %v4249_v63 }
 0x69d   : > { %v2306_v17 = vadd.f32 %v2301_v10, %v2286_v15  ;;  %v2307_v37 = vadd.f32 %v2305_v11, %v2287_v16 }
 0x69f   : > { %v2308_v18 = vsub.f32 0.0, %v2306_v17  ;;  %v2309_v19 = vsub.f32 0.0, %v2307_v37 }
 0x6a1   : > { %v2310_v20 = vmul.f32 1.442695, %v2308_v18  ;;  %v2312_v21 = vmul.f32 1.442695, %v2309_v19 }
 0x6a3   : > { %3363 = vpow2.f32 %v2310_v20 }
 0x6a4   : > { %3365 = vpow2.f32 %v2312_v21 }
 0x6ad   : > { %v3364_v22 = vpop.eup %3363 }
 0x6ae   : > { %v3366_v23 = vpop.eup %3365  ;;  %v2314_v24 = vadd.f32 1.0, %v3364_v22 }
 0x6af   : > { %v2315_v1 = vadd.f32 1.0, %v3366_v23 }
 0x6b0   : > { %3367 = vrcp.f32 %v2314_v24 }
 0x6b1   : > { %3369 = vrcp.f32 %v2315_v1 }
 0x6ba   : > { %v3368_v25 = vpop.eup %3367  ;;  %2329 = sbr.rel (%p2947_p4) target bundleno = 1993 (0x7c9), region = 128 }
 0x6bb   : > { %v3370_v26 = vpop.eup %3369  ;;  %v2320_v27 = vmul.f32 %v3368_v25, %v2306_v17 }
 0x6bc   : > { %v2321_v28 = vmul.f32 %v3370_v26, %v2307_v37 }
 0x6bd   : > { %v2322_v29 = vadd.f32 %v2320_v27, %v4238_v33  ;;  %v3382_v33 = vld [vmem:[#allocation15 + $0x30] ss:$8 sps:$4 sm:$0xff] (!%p2947_p4)  }
 0x6be   : > { %v2323_v30 = vadd.f32 %v2321_v28, %v4216_v12  ;;  %v3383_v12 = vld [vmem:[#allocation15 + $0x44] ss:$8 sps:$4 sm:$0xff] (!%p2947_p4)   ;;  %2545 = vmatpush1.bf16.msra.mxu0 (!%p2947_p4), %v3382_v33 }
 0x6bf   : > { %2324 = vst [vmem:[#allocation2] sm:$0xff] %v2322_v29  ;;  %2546 = vmatprep.subr.bf16.mxu0 (!%p2947_p4), %v3383_v12 }
 0x6c0   : > { %2325 = vst [vmem:[#allocation2 + $0x8] sm:$0xff] %v2323_v30 }
 0x6c2   : > { %2547 = vmatpush1.bf16.msra.mxu0 %v3385_v44 }
 0x6c3   : > { %2548 = vmatprep.subr.bf16.mxu0 %v3386_v45 }
 0x6c6   : > { %2549 = vmatpush1.bf16.msra.mxu0 %v3388_v46  ;;  %v2330_v4 = vld [vmem:[#allocation2] sm:$0xff] }
 0x6c7   : > { %v2331_v48 = vld [vmem:[#allocation2 + $0x8] sm:$0xff]  ;;  %2550 = vmatprep.subr.bf16.mxu0 %v3389_v47  ;;  %v2332_v5 = vpack.c.bf16 %v2330_v4, %v2330_v4 }
 0x6c8   : > { %v2333_v49 = vpack.c.bf16 %v2331_v48, %v2331_v48 }
 0x6ca   : > { %2570 = vmatprep.mubr.bf16.mxu0 %v2333_v49  ;;  %2551 = vmatpush1.bf16.msra.mxu0 %v3391_v50 }
 0x6cb   : > { %2552 = vmatprep.subr.bf16.mxu0 %v3392_v51 }
 0x6ce   : > { %2553 = vmatpush1.bf16.msra.mxu0 %v3394_v52 }
 0x6cf   : > { %2554 = vmatprep.subr.bf16.mxu0 %v3395_v53 }
 0x6d2   : > { %2555 = vmatpush1.bf16.msra.mxu0 %v3397_v54 }
 0x6d3   : > { %2556 = vmatprep.subr.bf16.mxu0 %v3398_v55 }
 0x6d6   : > { %2557 = vmatpush1.bf16.msra.mxu0 %v3400_v56 }
 0x6d7   : > { %2558 = vmatprep.subr.bf16.mxu0 %v3401_v57 }
 0x6da   : > { %2559 = vmatpush1.bf16.msra.mxu0 %v3403_v58 }
 0x6db   : > { %2560 = vmatprep.subr.bf16.mxu0 %v3404_v32 }
 0x6de   : > { %2561 = vmatpush1.bf16.msra.mxu0 %v3406_v34 }
 0x6df   : > { %2562 = vmatprep.subr.bf16.mxu0 %v3407_v59 }
 0x6e2   : > { %2563 = vmatpush1.bf16.msra.mxu0 %v3409_v60 }
 0x6e3   : > { %2564 = vmatprep.subr.bf16.mxu0 %v3410_v61 }
 0x6e6   : > { %2565 = vmatpush1.bf16.msra.mxu0 %v3412_v62 }
 0x6e7   : > { %2566 = vmatprep.subr.bf16.mxu0 %v3413_v0 }
 0x6ea   : > { %2567 = vmatpush1.bf16.msra.mxu0 %v3415_v2 }
 0x6eb   : > { %2568 = vmatprep.subr.bf16.mxu0 %v3416_v3 }
 0x6ee   : > { %2569 = vmatpush1.bf16.msra.mxu0 %v3418_v42 }
 0x6f1   : > { %2571 = vmatmul.mubr.bf16.vlgmr.msra.gmra.mrb[0].mxu0 %v2332_v5 }
 0x7c4   : > { %v2572_v9 = vpop.f32.mrb[0].mxu0 }
 0x7c5   : > { %v2573_v10 = vadd.f32 %v2572_v9, %v2371_v7  ;;  %v2574_v11 = vpop.f32.mrb[1].mxu0 }
 0x7c6   : > { %v2575_v13 = vadd.f32 %v2574_v11, %v2375_v8  ;;  %v2576_v14 = vpop.f32.mrb[2].mxu0 }
 0x7c7   : > { %2579 = vst [vmem:[#allocation16] sm:$0xff] %v2573_v10  ;;  %v2577_v15 = vpop.f32.mrb[3].mxu0 }
 0x7c8   : > { %2580 = vst [vmem:[#allocation16 + $0x8] sm:$0xff] %v2575_v13 }
 0x7c9 PF: > { %p3056_p1 = scmp.eq.s32.totalorder %s3858_s1, 3  ;;  %s3731_s5 = smov [#allocation16]  }
 0x7ca   : > { %s2591_s25 = sshll.u32 %s3731_s5, 4  ;;  %s2592_s25 = int_to_ptr.vmem [resolvable:$true] %s2591_s25 }
 0x7cb   : > { %s3617_s6 = scalar_lea.vmem %s2592_s25, 256  ;;  %p3624_p13 = scmp.lt.s32.totalorder %s2592_s25, %s2592_s25 }
 0x7cc   : > { %p3618_p3 = scmp.ne.s32.totalorder %s2592_s25, %s3617_s6  ;;  %p3625_p0 = scmp.lt.s32.totalorder %s3617_s6, %s3617_s6 }
 0x7ce   : > { %p3619_p10 = pnand %p3618_p3, %p3056_p1  ;;  %p3626_p2 = por %p3625_p0, %p3624_p13 }
 0x7d0   : > { %p3620_p12 = pneg %p3619_p10 }
 0x7d2   : > { %p3627_p5 = pnand %p3626_p2, %p3620_p12 }
 0x7d4   : > { %3630 = shalt.err (!%p3627_p5)
}
 0x7d5   : > { %s4367_s15 = sld [smem:[#allocation35_spill]] }
 0x7db   : > { %s3631_s20 = scalar_lea.hbm %s4367_s15, 256 }
 0x7dc   : > { %p3632_p8 = scmp.ne.s32.totalorder %s4367_s15, %s3631_s20  ;;  %p3637_p11 = scmp.lt.u32.totalorder %s3631_s20, %s4367_s15 }
 0x7de   : > { %p3633_p6 = pnand %p3632_p8, %p3056_p1 }
 0x7e0   : > { %p3634_p9 = pneg %p3633_p6 }
 0x7e2   : > { %p3639_p7 = pnand %p3637_p11, %p3634_p9 }
 0x7e4   : > { %3642 = shalt.err (!%p3639_p7)
}
 0x7e5   : > { %3017 = dma.vmem_to_hbm [thread:$0]  (%p3056_p1), %s2592_s25, 256, %s4367_s15, [#allocation6]  }
 0x7e6   : > { %3688 = dma.done.wait (%p3056_p1), [#allocation6], 256  }
 0x7e7   : > { %3690 = vsyncadd (%p3056_p1), [#allocation6], 4294967040 }
 0x7e8 PF: > { %s35_s19 = sadd.s32 1, %s3713_s19   ;;  %s4368_s27 = smov %s3697_s28 }
 0x7e9   : > { %p32_p4 = scmp.ge.s32.totalorder %s35_s19, 6   ;;  %s4369_s28 = smov %s3701_s29 }
 0x7ea   : > { %s4370_s29 = smov %s4053_s18  ;;  %s4371_s30 = smov %s3709_s0 }
 0x7eb   : > { %s4372_s0 = smov %s4374_s24  ;;  %34 = sbr.rel (!%p32_p4) target bundleno = 22 (0x16), region = 175 }
 0x7f2   :  { %2604 = vsyncpa [#allocation5], 1 }
 0x7f3   :  { %2606 = vsyncpa [#allocation5 + $0x1], 1 }
 0x7f4   :  { %2607 = vsyncpa [#allocation8], 1 }
 0x7f5   :  { %2608 = vsyncpa [#allocation11], 1 }
 0x7f6   :  { %2609 = vsyncpa [#allocation14], 1 }
 0x7f7   :  { %2611 = vsyncpa [#allocation14 + $0x1], 1 }
 0x7f8   :  { %2612 = vsyncpa [#allocation6], 1 }
 0x7f9   :  { %2614 = vsyncpa [#allocation6 + $0x1], 1 }

// kernel: tpu_custom_call.1
= control target key start
LH: loop header
LB: loop body
LE: loop exit
PB: predicated region body
PF: predicated region fallthrough
CT: control target
= control target key end

     0   :  { %s4303_s0 = inlined_call_operand.vmem [shape: f32[8,1], index: 0, kind: input, shape index: {}]   ;;  %s4304_s1 = inlined_call_operand.vmem [shape: f32[1,128], index: 1, kind: input, shape index: {}]   ;;  %s4305_s2 = inlined_call_operand.vmem [shape: f32[8,128], index: 2, kind: input, shape index: {}]   ;;  %s4306_s3 = inlined_call_operand.vmem [shape: f32[8,256], index: 3, kind: input, shape index: {}]   ;;  %s4307_s4 = inlined_call_operand.hbm [shape: bf16[128,256], index: 4, kind: input, shape index: {}]   ;;  %s4308_s5 = inlined_call_operand.hbm [shape: bf16[128,256], index: 5, kind: input, shape index: {}]   ;;  %s4309_s6 = inlined_call_operand.vmem [shape: f32[1,256], index: 6, kind: input, shape index: {}]   ;;  %s4310_s7 = inlined_call_operand.hbm [shape: bf16[256,256], index: 7, kind: input, shape index: {}]   ;;  %s4311_s8 = inlined_call_operand.hbm [shape: bf16[128,256], index: 8, kind: input, shape index: {}]   ;;  %s4312_s9 = inlined_call_operand.vmem [shape: f32[1,256], index: 9, kind: input, shape index: {}]   ;;  %s4313_s10 = inlined_call_operand.hbm [shape: bf16[256,256], index: 10, kind: input, shape index: {}]   ;;  %s4314_s11 = inlined_call_operand.vmem [shape: f32[1,256], index: 11, kind: input, shape index: {}]   ;;  %s4315_s12 = inlined_call_operand.vmem [shape: f32[1,256], index: 12, kind: input, shape index: {}]   ;;  %s4316_s13 = inlined_call_operand.vmem [shape: f32[1,256], index: 13, kind: input, shape index: {}]   ;;  %s4317_s14 = inlined_call_operand.hbm [shape: bf16[4,256,256], index: 14, kind: input, shape index: {}]   ;;  %s4318_s15 = inlined_call_operand.vmem [shape: f32[4,3,256], index: 15, kind: input, shape index: {}]   ;;  %s4319_s16 = inlined_call_operand.hbm [shape: bf16[256,256], index: 16, kind: input, shape index: {}]   ;;  %s4320_s17 = inlined_call_operand.vmem [shape: f32[1,256], index: 17, kind: input, shape index: {}]   ;;  %s4321_s18 = inlined_call_operand.hbm [shape: f32[8,256], index: 18, kind: output, shape index: {}]  }
   0x1   :  { %4326 = sst [smem:[#allocation23_spill]] %s4303_s0 }
   0x2   :  { %4327 = sst [smem:[#allocation24_spill]] %s4304_s1 }
   0x3   :  { %4328 = sst [smem:[#allocation25_spill]] %s4305_s2 }
   0x4   :  { %4329 = sst [smem:[#allocation26_spill]] %s4306_s3 }
   0x5   :  { %4330 = sst [smem:[#allocation27_spill]] %s4308_s5 }
   0x6   :  { %4331 = sst [smem:[#allocation28_spill]] %s4309_s6 }
   0x7   :  { %4332 = sst [smem:[#allocation29_spill]] %s4312_s9 }
   0x8   :  { %4333 = sst [smem:[#allocation30_spill]] %s4314_s11 }
   0x9   :  { %4334 = sst [smem:[#allocation31_spill]] %s4315_s12 }
   0xa   :  { %4335 = sst [smem:[#allocation32_spill]] %s4316_s13 }
   0xb   :  { %4336 = sst [smem:[#allocation33_spill]] %s4318_s15 }
   0xc   :  { %4337 = sst [smem:[#allocation34_spill]] %s4320_s17 }
   0xd   :  { %4338 = sst [smem:[#allocation35_spill]] %s4321_s18 }
   0xe   :  { %23 = vsyncpa [#allocation5], 0 }
   0xf   :  { %24 = vsyncpa [#allocation8], 0 }
  0x10   :  { %25 = vsyncpa [#allocation11], 0 }
  0x11   :  { %26 = vsyncpa [#allocation14], 0 }
  0x12   :  { %28 = vsyncpa [#allocation14 + $0x1], 0 }
  0x13   :  { %29 = vsyncpa [#allocation6], 0  ;;  %s3827_s27 = smov 0   ;;  %s3829_s28 = smov 0  }
  0x14   :  { %s3831_s29 = smov 0   ;;  %s3833_s30 = smov 0  }
  0x15   :  { %s3835_s0 = smov 0   ;;  %s3837_s19 = smov 0  }
  0x16 LB: > { %s3858_s1 = sadd.s32 4294967295, %s3713_s19   ;;  %p2769_p0 = scmp.ge.s32.totalorder %s3713_s19, 1  ;;  %s3713_s19 = sphi %s3837_s19, %s35_s19   ;;  %s3709_s0 = sphi %s3835_s0, %s4372_s0   ;;  %s3705_s30 = sphi %s3833_s30, %s4371_s30   ;;  %s3701_s29 = sphi %s3831_s29, %s4370_s29   ;;  %s3697_s28 = sphi %s3829_s28, %s4369_s28   ;;  %s3693_s27 = sphi %s3827_s27, %s4368_s27  }
  0x17   : > { %p4324_p1 = scmp.eq.s32.totalorder %s3858_s1, 0  ;;  %p481_p2 = scmp.lt.s32.totalorder %s3713_s19, 5 }
  0x18   : > { %s3715_s21 = smov [#allocation7]   ;;  %s3716_s2 = smov [#allocation10]  }
  0x19   : > { %p3863_p3 = pnand %p2769_p0, %p481_p2  ;;  %s531_s22 = sshll.u32 %s3715_s21, 4  ;;  %s3867_s22 = int_to_ptr.vmem [resolvable:$true] %s531_s22 }
  0x1a   : > { %s560_s23 = sshll.u32 %s3716_s2, 4  ;;  %s3717_s25 = smov [#allocation15]   ;;  %s3877_s23 = int_to_ptr.vmem [resolvable:$true] %s560_s23 }
  0x1b   : > { %s4339_s20 = scalar_select %p3863_p3, 1, 0 }
  0x1c   : > { %p3020_p4 = pneg %p3863_p3  ;;  %s598_s26 = sshll.u32 %s3717_s25, 4  ;;  %s3879_s26 = int_to_ptr.vmem [resolvable:$true] %s598_s26 }
  0x1d   : > { %s4341_s5 = sld [smem:[#allocation27_spill]] }
  0x1e   : > { %p3873_p5 = pnand %p3020_p4, %p4324_p1 }
  0x20   : > { %p3889_p7 = pneg %p3873_p5 }
  0x23   : > { %s3419_s17 = scalar_lea.hbm %s4341_s5, 2048 }
  0x24   : > { %p3420_p6 = scmp.ne.s32.totalorder %s4341_s5, %s3419_s17  ;;  %p3426_p10 = scmp.lt.u32.totalorder %s3419_s17, %s4341_s5 }
  0x26   : > { %p3422_p8 = pnand %p3889_p7, %p3420_p6 }
  0x28   : > { %p3423_p9 = pneg %p3422_p8 }
  0x2a   : > { %p3428_p11 = pnand %p3426_p10, %p3423_p9 }
  0x2c   : > { %3431 = shalt.err (!%p3428_p11)
}
  0x2d   : > { %s3432_s12 = scalar_lea.vmem %s3867_s22, 2048  ;;  %p3440_p2 = scmp.lt.s32.totalorder %s3867_s22, %s3867_s22 }
  0x2e   : > { %p3433_p12 = scmp.ne.s32.totalorder %s3867_s22, %s3432_s12  ;;  %p3441_p4 = scmp.lt.s32.totalorder %s3432_s12, %s3432_s12 }
  0x30   : > { %p3435_p13 = pnand %p3433_p12, %p3889_p7  ;;  %p3442_p6 = por %p3441_p4, %p3440_p2 }
  0x32   : > { %p3436_p0 = pneg %p3435_p13 }
  0x34   : > { %p3443_p8 = pnand %p3442_p6, %p3436_p0 }
  0x36   : > { %3446 = shalt.err (!%p3443_p8)
}
  0x37   : > { %s3718_s13 = smov 128   ;;  %s3719_s9 = smov 8  }
  0x38   : > { %3026 = dma.hbm_to_vmem [thread:$0]  (!%p3873_p5), %s4341_s5, 2048, %s3867_s22, [#allocation8], %s3718_s13, %s3718_s13, %s3719_s9  }
  0x39   : > { %s3447_s12 = scalar_lea.hbm %s4311_s8, 2048 }
  0x3a   : > { %p3448_p9 = scmp.ne.s32.totalorder %s4311_s8, %s3447_s12  ;;  %p3454_p12 = scmp.lt.u32.totalorder %s3447_s12, %s4311_s8 }
  0x3c   : > { %p3450_p10 = pnand %p3448_p9, %p3889_p7 }
  0x3e   : > { %p3451_p11 = pneg %p3450_p10 }
  0x40   : > { %p3456_p13 = pnand %p3454_p12, %p3451_p11 }
  0x42   : > { %3459 = shalt.err (!%p3456_p13)
}
  0x43   : > { %s3460_s22 = scalar_lea.vmem %s3877_s23, 2048  ;;  %p3468_p6 = scmp.lt.s32.totalorder %s3877_s23, %s3877_s23 }
  0x44   : > { %p3461_p0 = scmp.ne.s32.totalorder %s3877_s23, %s3460_s22  ;;  %p3469_p8 = scmp.lt.s32.totalorder %s3460_s22, %s3460_s22 }
  0x46   : > { %p3463_p2 = pnand %p3461_p0, %p3889_p7  ;;  %p3470_p9 = por %p3469_p8, %p3468_p6 }
  0x48   : > { %p3464_p4 = pneg %p3463_p2 }
  0x4a   : > { %p3471_p10 = pnand %p3470_p9, %p3464_p4 }
  0x4c   : > { %3474 = shalt.err (!%p3471_p10)
}
  0x4d   : > { %3032 = dma.hbm_to_vmem [thread:$0]  (!%p3873_p5), %s4311_s8, 2048, %s3877_s23, [#allocation11], %s3718_s13, %s3718_s13, %s3719_s9  }
  0x4e   : > { %s3475_s17 = scalar_lea.hbm %s4319_s16, 4096 }
  0x4f   : > { %p3476_p11 = scmp.ne.s32.totalorder %s4319_s16, %s3475_s17  ;;  %p3482_p0 = scmp.lt.u32.totalorder %s3475_s17, %s4319_s16 }
  0x51   : > { %p3478_p12 = pnand %p3476_p11, %p3889_p7 }
  0x53   : > { %p3479_p13 = pneg %p3478_p12 }
  0x55   : > { %p3484_p2 = pnand %p3482_p0, %p3479_p13 }
  0x57   : > { %3487 = shalt.err (!%p3484_p2)
}
  0x58   : > { %s3488_s23 = scalar_lea.vmem %s3879_s26, 4096  ;;  %p3496_p9 = scmp.lt.s32.totalorder %s3879_s26, %s3879_s26 }
  0x59   : > { %p3489_p4 = scmp.ne.s32.totalorder %s3879_s26, %s3488_s23  ;;  %p3497_p10 = scmp.lt.s32.totalorder %s3488_s23, %s3488_s23 }
  0x5b   : > { %p3491_p6 = pnand %p3489_p4, %p3889_p7  ;;  %p3498_p11 = por %p3497_p10, %p3496_p9 }
  0x5d   : > { %p3492_p8 = pneg %p3491_p6 }
  0x5f   : > { %p3499_p12 = pnand %p3498_p11, %p3492_p8 }
  0x61   : > { %3502 = shalt.err (!%p3499_p12)
}
  0x62   : > { %3038 = dma.hbm_to_vmem [thread:$0]  (!%p3873_p5), %s4319_s16, 4096, %s3879_s26, [#allocation14], %s3718_s13, %s3718_s13, %s3719_s9  }
  0x63   : > { %s3720_s6 = smov [#allocation4]   ;;  %s3721_s15 = smov [#allocation9]  }
  0x64   : > { %s518_s11 = sshll.u32 %s3720_s6, 4  ;;  %s547_s17 = sshll.u32 %s3721_s15, 4  ;;  %s519_s11 = int_to_ptr.vmem [resolvable:$true] %s518_s11  ;;  %s548_s17 = int_to_ptr.vmem [resolvable:$true] %s547_s17 }
  0x65   : > { %s3503_s25 = scalar_lea.hbm %s4307_s4, 2048 }
  0x66   : > { %p3504_p13 = scmp.ne.s32.totalorder %s4307_s4, %s3503_s25  ;;  %p3510_p4 = scmp.lt.u32.totalorder %s3503_s25, %s4307_s4 }
  0x68   : > { %p3506_p0 = pnand %p3504_p13, %p3889_p7 }
  0x6a   : > { %p3507_p2 = pneg %p3506_p0 }
  0x6c   : > { %p3512_p6 = pnand %p3510_p4, %p3507_p2 }
  0x6e   : > { %3515 = shalt.err (!%p3512_p6)
}
  0x6f   : > { %s3516_s26 = scalar_lea.vmem %s519_s11, 2048  ;;  %p3524_p11 = scmp.lt.s32.totalorder %s519_s11, %s519_s11 }
  0x70   : > { %p3517_p8 = scmp.ne.s32.totalorder %s519_s11, %s3516_s26  ;;  %p3525_p12 = scmp.lt.s32.totalorder %s3516_s26, %s3516_s26 }
  0x72   : > { %p3519_p9 = pnand %p3517_p8, %p3889_p7  ;;  %p3526_p1 = por %p3525_p12, %p3524_p11 }
  0x74   : > { %p3520_p10 = pneg %p3519_p9 }
  0x76   : > { %p3527_p3 = pnand %p3526_p1, %p3520_p10 }
  0x78   : > { %3530 = shalt.err (!%p3527_p3)
}
  0x79   : > { %3023 = dma.hbm_to_vmem [thread:$0]  (!%p3873_p5), %s4307_s4, 2048, %s519_s11, [#allocation5], %s3718_s13, %s3718_s13, %s3719_s9  }
  0x7a   : > { %s3531_s18 = scalar_lea.hbm %s4310_s7, 4096 }
  0x7b   : > { %p3532_p1 = scmp.ne.s32.totalorder %s4310_s7, %s3531_s18  ;;  %p3538_p0 = scmp.lt.u32.totalorder %s3531_s18, %s4310_s7 }
  0x7d   : > { %p3534_p3 = pnand %p3532_p1, %p3889_p7 }
  0x7f   : > { %p3535_p13 = pneg %p3534_p3 }
  0x81   : > { %p3540_p2 = pnand %p3538_p0, %p3535_p13 }
  0x83   : > { %3543 = shalt.err (!%p3540_p2)
}
  0x84   : > { %s3544_s22 = scalar_lea.vmem %s548_s17, 4096  ;;  %p3552_p9 = scmp.lt.s32.totalorder %s548_s17, %s548_s17 }
  0x85   : > { %p3545_p4 = scmp.ne.s32.totalorder %s548_s17, %s3544_s22  ;;  %p3553_p10 = scmp.lt.s32.totalorder %s3544_s22, %s3544_s22 }
  0x87   : > { %p3547_p6 = pnand %p3545_p4, %p3889_p7  ;;  %p3554_p11 = por %p3553_p10, %p3552_p9 }
  0x89   : > { %p3548_p8 = pneg %p3547_p6 }
  0x8b   : > { %p3555_p12 = pnand %p3554_p11, %p3548_p8 }
  0x8d   : > { %3558 = shalt.err (!%p3555_p12)
}
  0x8e   : > { %3029 = dma.hbm_to_vmem [thread:$0]  (!%p3873_p5), %s4310_s7, 4096, %s548_s17, [#allocation8], %s3718_s13, %s3718_s13, %s3719_s9  }
  0x8f   : > { %s3722_s5 = smov [#allocation12]   ;;  %s3559_s18 = scalar_lea.hbm %s4313_s10, 4096 }
  0x90   : > { %s576_s3 = sshll.u32 %s3722_s5, 4  ;;  %p3560_p1 = scmp.ne.s32.totalorder %s4313_s10, %s3559_s18  ;;  %s577_s3 = int_to_ptr.vmem [resolvable:$true] %s576_s3 }
  0x91   : > { %p3566_p0 = scmp.lt.u32.totalorder %s3559_s18, %s4313_s10 }
  0x92   : > { %p3562_p3 = pnand %p3560_p1, %p3889_p7 }
  0x94   : > { %p3563_p13 = pneg %p3562_p3 }
  0x96   : > { %p3568_p2 = pnand %p3566_p0, %p3563_p13 }
  0x98   : > { %3571 = shalt.err (!%p3568_p2)
}
  0x99   : > { %s3572_s17 = scalar_lea.vmem %s577_s3, 4096  ;;  %p3580_p9 = scmp.lt.s32.totalorder %s577_s3, %s577_s3 }
  0x9a   : > { %p3573_p4 = scmp.ne.s32.totalorder %s577_s3, %s3572_s17  ;;  %p3581_p10 = scmp.lt.s32.totalorder %s3572_s17, %s3572_s17 }
  0x9c   : > { %p3575_p6 = pnand %p3573_p4, %p3889_p7  ;;  %p3582_p11 = por %p3581_p10, %p3580_p9 }
  0x9e   : > { %p3576_p8 = pneg %p3575_p6 }
  0xa0   : > { %p3583_p12 = pnand %p3582_p11, %p3576_p8 }
  0xa2   : > { %3586 = shalt.err (!%p3583_p12)
}
  0xa3   : > { %3035 = dma.hbm_to_vmem [thread:$0]  (!%p3873_p5), %s4313_s10, 4096, %s577_s3, [#allocation11], %s3718_s13, %s3718_s13, %s3719_s9  }
  0xa4   : > { %s44_s24 = sadd.s32 1, %s3709_s0  ;;  %s363_s2 = sadd.s32 1, %s3701_s29 }
  0xa5   : > { %p45_p7 = scmp.ge.s32.totalorder %s44_s24, 4  ;;  %p370_p1 = scmp.ne.s32.totalorder %s3701_s29, %s3697_s28 }
  0xa6   : > { %p371_p3 = scmp.eq.s32.totalorder %s3713_s19, 0  ;;  %p376_p13 = scmp.ne.s32.totalorder %s3697_s28, %s3693_s27 }
  0xa7   : > { %s4374_s24 = smov (%p45_p7, %s44_s24), 0  ;;  %p4344_p2 = scmp.eq.s32.totalorder %s3858_s1, 0 }
  0xa8   : > { %p4037_p0 = por %p371_p3, %p370_p1  ;;  %s360_s3 = ssub.s32 %s3709_s0, %s4374_s24 }
  0xa9   : > { %p4043_p4 = por %p4344_p2, %p376_p13  ;;  %p3049_p5 = scmp.lt.s32.totalorder %s3713_s19, 4 }
  0xaa   : > { %p361_p6 = scmp.eq.s32.totalorder %s360_s3, 0  ;;  %s615_s6 = sand.u32 1, %s3713_s19  }
  0xab   : > { %s617_s15 = sand.u32 1, %s3701_s29   ;;  %s2984_s21 = sshll.u32 %s3709_s0, 12 }
  0xac   : > { %s4053_s18 = scalar_select %p361_p6, %s3701_s29, %s363_s2  }
  0xad   : > { %s2780_s27 = sshll.u32 %s617_s15, 8  ;;  %s4059_s23 = scalar_lea.hbm %s4317_s14, %s2984_s21 }
  0xae   : > { %s619_s17 = scalar_lea.vmem [#allocation13], %s2780_s27  ;;  %p4063_p8 = pnand %p3049_p5, %p4037_p0 }
  0xaf   : > { %s626_s22 = sshll.u32 %s619_s17, 4  ;;  %s4069_s2 = scalar_lea.sflag [#allocation14], %s615_s6  ;;  %s4067_s22 = int_to_ptr.vmem [resolvable:$true] %s626_s22 }
  0xb0   : > { %s3587_s3 = scalar_lea.hbm %s4059_s23, 4096  ;;  %p3589_p10 = pneg %p4063_p8 }
  0xb1   : > { %p3588_p9 = scmp.ne.s32.totalorder %s4059_s23, %s3587_s3  ;;  %s3592_s27 = scalar_lea.hbm %s4317_s14, 16384 }
  0xb2   : > { %p3593_p7 = scmp.lt.u32.totalorder %s4059_s23, %s4317_s14  ;;  %p3594_p1 = scmp.lt.u32.totalorder %s3592_s27, %s3587_s3 }
  0xb3   : > { %p3590_p11 = pnand %p3589_p10, %p3588_p9  ;;  %p3596_p13 = scmp.lt.u32.totalorder %s3587_s3, %s4059_s23 }
  0xb4   : > { %p3595_p3 = por %p3594_p1, %p3593_p7 }
  0xb5   : > { %p3591_p12 = pneg %p3590_p11 }
  0xb6   : > { %p3597_p0 = por %p3596_p13, %p3595_p3 }
  0xb8   : > { %p3598_p2 = pnand %p3597_p0, %p3591_p12 }
  0xba   : > { %3601 = shalt.err (!%p3598_p2)
}
  0xbb   : > { %s3602_s6 = scalar_lea.vmem %s4067_s22, 4096  ;;  %s3723_s12 = smov [#allocation13]  }
  0xbc   : > { %p3603_p5 = scmp.ne.s32.totalorder %s4067_s22, %s3602_s6  ;;  %s3607_s17 = sshll.u32 %s3723_s12, 4  ;;  %s3608_s17 = int_to_ptr.vmem [resolvable:$false] %s3607_s17 }
  0xbd   : > { %s3609_s15 = scalar_lea.vmem %s3608_s17, 8192  ;;  %p3610_p11 = scmp.lt.s32.totalorder %s4067_s22, %s3608_s17 }
  0xbe   : > { %p3605_p6 = pnand %p3603_p5, %p3589_p10  ;;  %p3611_p7 = scmp.lt.s32.totalorder %s3609_s15, %s3602_s6 }
  0xc0   : > { %p3606_p9 = pneg %p3605_p6  ;;  %p3612_p1 = por %p3611_p7, %p3610_p11 }
  0xc2   : > { %p3613_p3 = pnand %p3612_p1, %p3606_p9 }
  0xc4   : > { %3616 = shalt.err (!%p3613_p3)
}
  0xc5   : > { %3042 = dma.hbm_to_vmem [thread:$0]  (!%p4063_p8), %s4059_s23, 4096, %s4067_s22, %s4069_s2, %s3718_s13, %s3718_s13, %s3719_s9  }
  0xc6   : > { %p4347_p10 = scmp.ne.s32.totalorder %s4339_s20, 0 }
  0xc7   : > { %p4348_p12 = scmp.eq.s32.totalorder (!%p4347_p10), %s3858_s1, 0 }
  0xc8   : > { %646 = sbr.rel (%p4347_p10) target bundleno = 2024 (0x7e8), region = 92 }
  0xcf   : > { %3668 = dma.done.wait (%p4348_p12), [#allocation5], 2048   ;;  %p4349_p13 = pmov %p4348_p12 }
  0xd0   : > { %p4350_p0 = pmov %p4348_p12 }
  0xd1   : > { %3670 = vsyncadd (%p4349_p13), [#allocation5], 4294965248 }
  0xd2   : > { %3672 = dma.done.wait (%p4350_p0), [#allocation8], 6144   ;;  %p4351_p2 = pmov %p4350_p0 }
  0xd3   : > { %p4352_p5 = pmov %p4350_p0 }
  0xd4   : > { %3674 = vsyncadd (%p4351_p2), [#allocation8], 4294961152 }
  0xd5   : > { %3676 = dma.done.wait (%p4352_p5), [#allocation11], 6144   ;;  %p4353_p8 = pmov %p4350_p0 }
  0xd6   : > { %s668_s20 = sand.u32 1, %s3858_s1   ;;  %s670_s13 = sand.u32 1, %s3697_s28  }
  0xd7   : > { %3678 = vsyncadd (%p4353_p8), [#allocation11], 4294961152  ;;  %s2789_s9 = sshll.u32 %s670_s13, 8  ;;  %s669_s23 = scalar_lea.sflag [#allocation14], %s668_s20 }
  0xd8   : > { %s4116_s22 = scalar_lea.vmem [#allocation13], %s2789_s9 }
  0xd9   : > { %3680 = dma.done.wait (%p4043_p4), %s669_s23, 4096  }
  0xda   : > { %3682 = vsyncadd (%p4043_p4), %s669_s23, 4294963200  ;;  %p4354_p6 = pmov %p4350_p0 }
  0xdb   : > { %p4355_p9 = pmov %p4350_p0 }
  0xdc   : > { %3684 = dma.done.wait (%p4354_p6), [#allocation14], 4096  }
  0xdd   : > { %3686 = vsyncadd (%p4355_p9), [#allocation14], 4294963200  ;;  %p755_p11 = scmp.lt.s32.totalorder %s3705_s30, 3  ;;  %s4356_s27 = sld [smem:[#allocation33_spill]] }
  0xde   : > { %p2793_p7 = scmp.ne.s32.totalorder %s3705_s30, 0 }
  0xdf   : > { %s756_s11 = scalar_select %p755_p11, %s3705_s30, 3 }
  0xe0   : > { %764 = sbr.rel (%p2793_p7) target bundleno = 1100 (0x44c), region = 124  ;;  %s4357_s6 = sld [smem:[#allocation23_spill]] (!%p2793_p7)  ;;  %v3724_v1 = vmov (!%p2793_p7), 0   ;;  %v3123_v2 = vld [vmem:[#allocation7 + $0x4] ss:$8 sps:$4 sm:$0xff] (!%p2793_p7)  }
  0xe1   : > { %s2985_s2 = sshll.u32 %s756_s11, 3  ;;  %3122 = vset.pattern.permute.xlu0 (!%p2793_p7), %v3724_v1  ;;  %1132 = vmatprep.mubr.bf16.mxu0 (!%p2793_p7), %v3724_v1  ;;  %v3125_v3 = vld [vmem:[#allocation7] ss:$8 sps:$4 sm:$0xff] (!%p2793_p7)   ;;  %v3126_v4 = vld [vmem:[#allocation4 + $0x4] ss:$8 sps:$4 sm:$0xff] (!%p2793_p7)   ;;  %s4358_s15 = sld [smem:[#allocation24_spill]] (!%p2793_p7) }
  0xe2   : > { %1253 = vmatprep.mubr.bf16.mxu1 (!%p2793_p7), %v3724_v1  ;;  %1100 = vmatprep.subr.bf16.mxu0 (!%p2793_p7), %v3123_v2  ;;  %v3128_v5 = vld [vmem:[#allocation4] ss:$8 sps:$4 sm:$0xff] (!%p2793_p7)   ;;  %v3129_v6 = vld [vmem:[#allocation7 + $0x14] ss:$8 sps:$4 sm:$0xff] (!%p2793_p7)   ;;  %v3131_v7 = vld [vmem:[#allocation7 + $0x10] ss:$8 sps:$4 sm:$0xff] (!%p2793_p7)  }
  0xe3   : > { %s4131_s21 = scalar_lea.vmem %s4356_s27, %s2985_s2  ;;  %1101 = vmatpush1.bf16.msra.mxu0 (!%p2793_p7), %v3125_v3  ;;  %1221 = vmatprep.subr.bf16.mxu1 (!%p2793_p7), %v3126_v4  ;;  %v3132_v8 = vld [vmem:[#allocation4 + $0x14] ss:$8 sps:$4 sm:$0xff] (!%p2793_p7)   ;;  %v3134_v9 = vld [vmem:[#allocation4 + $0x10] ss:$8 sps:$4 sm:$0xff] (!%p2793_p7)   ;;  %v3135_v10 = vld [vmem:[#allocation7 + $0x24] ss:$8 sps:$4 sm:$0xff] (!%p2793_p7)  }
  0xe4   : > { %1222 = vmatpush1.bf16.msra.mxu1 (!%p2793_p7), %v3128_v5  ;;  %1102 = vmatprep.subr.bf16.mxu0 (!%p2793_p7), %v3129_v6  ;;  %v3137_v11 = vld [vmem:[#allocation7 + $0x20] ss:$8 sps:$4 sm:$0xff] (!%p2793_p7)   ;;  %v3138_v12 = vld [vmem:[#allocation4 + $0x24] ss:$8 sps:$4 sm:$0xff] (!%p2793_p7)   ;;  %v3141_v14 = vld [vmem:[#allocation7 + $0x34] ss:$8 sps:$4 sm:$0xff] (!%p2793_p7)  }
  0xe5   : > { %1223 = vmatprep.subr.bf16.mxu1 (!%p2793_p7), %v3132_v8  ;;  %v3140_v13 = vld [vmem:[#allocation4 + $0x20] ss:$8 sps:$4 sm:$0xff] (!%p2793_p7)   ;;  %v3143_v15 = vld [vmem:[#allocation7 + $0x30] ss:$8 sps:$4 sm:$0xff] (!%p2793_p7)   ;;  %v3144_v16 = vld [vmem:[#allocation4 + $0x34] ss:$8 sps:$4 sm:$0xff] (!%p2793_p7)  }
  0xe6   : > { %v765_v0 = vld [vmem:[%s4357_s6] sm:$0xff] (!%p2793_p7)  ;;  %v3146_v17 = vld [vmem:[#allocation4 + $0x30] ss:$8 sps:$4 sm:$0xff] (!%p2793_p7)   ;;  %v3153_v22 = vld [vmem:[#allocation7 + $0x54] ss:$8 sps:$4 sm:$0xff] (!%p2793_p7)   ;;  %s4359_s9 = sld [smem:[#allocation25_spill]] (!%p2793_p7) }
  0xe7   : > { %769 = vperm.xlu0 %3122, %v765_v0   ;;  %1103 = vmatpush1.bf16.msra.mxu0 %v3131_v7  ;;  %v3147_v18 = vld [vmem:[#allocation7 + $0x44] ss:$8 sps:$4 sm:$0xff]   ;;  %v3149_v19 = vld [vmem:[#allocation7 + $0x40] ss:$8 sps:$4 sm:$0xff]   ;;  %v3156_v23 = vld [vmem:[#allocation4 + $0x54] ss:$8 sps:$4 sm:$0xff]  }
  0xe8   : > { %1224 = vmatpush1.bf16.msra.mxu1 %v3134_v9  ;;  %1104 = vmatprep.subr.bf16.mxu0 %v3135_v10  ;;  %v3150_v20 = vld [vmem:[#allocation4 + $0x44] ss:$8 sps:$4 sm:$0xff]   ;;  %v3152_v21 = vld [vmem:[#allocation4 + $0x40] ss:$8 sps:$4 sm:$0xff]   ;;  %v3155_v24 = vld [vmem:[#allocation7 + $0x50] ss:$8 sps:$4 sm:$0xff]  }
  0xe9   : > { %1225 = vmatprep.subr.bf16.mxu1 %v3138_v12  ;;  %v3158_v25 = vld [vmem:[#allocation4 + $0x50] ss:$8 sps:$4 sm:$0xff]   ;;  %v3159_v26 = vld [vmem:[#allocation7 + $0x64] ss:$8 sps:$4 sm:$0xff]   ;;  %v3161_v28 = vld [vmem:[#allocation7 + $0x60] ss:$8 sps:$4 sm:$0xff]  }
  0xea   : > { %v3162_v27 = vld [vmem:[#allocation4 + $0x64] ss:$8 sps:$4 sm:$0xff]   ;;  %v3164_v29 = vld [vmem:[#allocation4 + $0x60] ss:$8 sps:$4 sm:$0xff]   ;;  %v3165_v30 = vld [vmem:[#allocation7 + $0x74] ss:$8 sps:$4 sm:$0xff]  }
  0xeb   : > { %1105 = vmatpush1.bf16.msra.mxu0 %v3137_v11  ;;  %v3168_v31 = vld [vmem:[#allocation4 + $0x74] ss:$8 sps:$4 sm:$0xff]   ;;  %v3167_v32 = vld [vmem:[#allocation7 + $0x70] ss:$8 sps:$4 sm:$0xff]   ;;  %v3173_v34 = vld [vmem:[#allocation10 + $0x4] ss:$8 sps:$4 sm:$0xff]  }
  0xec   : > { %1226 = vmatpush1.bf16.msra.mxu1 %v3140_v13  ;;  %1106 = vmatprep.subr.bf16.mxu0 %v3141_v14  ;;  %v3170_v33 = vld [vmem:[#allocation4 + $0x70] ss:$8 sps:$4 sm:$0xff]   ;;  %v2794_v35 = vld [vmem:[%s4358_s15] ss:$0 sm:$0xff]  ;;  %v3725_v48 = vmov 683565275  }
  0xed   : > { %1227 = vmatprep.subr.bf16.mxu1 %v3144_v16  ;;  %v3726_v50 = vmov 2475754826   ;;  %v3727_v53 = vmov 2131351028   ;;  %v3728_v56 = vmov 2102212464  }
  0xee   : > { %v3729_v59 = vmov 920167782   ;;  %v3730_v62 = vmov 1326507024   ;;  %s4360_s2 = sld [smem:[#allocation26_spill]]  ;;  %s4361_s25 = sld [smem:[#allocation28_spill]] }
  0xef   : > { %1107 = vmatpush1.bf16.msra.mxu0 %v3143_v15  ;;  %s4362_s17 = sld [smem:[#allocation30_spill]]  ;;  %s4363_s13 = sld [smem:[#allocation29_spill]] }
  0xf0   : > { %1228 = vmatpush1.bf16.msra.mxu1 %v3146_v17  ;;  %1108 = vmatprep.subr.bf16.mxu0 %v3147_v18  ;;  %s4364_s11 = sld [smem:[#allocation31_spill]]  ;;  %s4365_s27 = sld [smem:[#allocation32_spill]] }
  0xf1   : > { %1229 = vmatprep.subr.bf16.mxu1 %v3150_v20 }
  0xf3   : > { %1109 = vmatpush1.bf16.msra.mxu0 %v3149_v19 }
  0xf4   : > { %1230 = vmatpush1.bf16.msra.mxu1 %v3152_v21  ;;  %1110 = vmatprep.subr.bf16.mxu0 %v3153_v22 }
  0xf5   : > { %1231 = vmatprep.subr.bf16.mxu1 %v3156_v23 }
  0xf7   : > { %1111 = vmatpush1.bf16.msra.mxu0 %v3155_v24 }
  0xf8   : > { %1232 = vmatpush1.bf16.msra.mxu1 %v3158_v25  ;;  %1112 = vmatprep.subr.bf16.mxu0 %v3159_v26 }
  0xf9   : > { %1233 = vmatprep.subr.bf16.mxu1 %v3162_v27 }
  0xfb   : > { %1113 = vmatpush1.bf16.msra.mxu0 %v3161_v28 }
  0xfc   : > { %1234 = vmatpush1.bf16.msra.mxu1 %v3164_v29  ;;  %1114 = vmatprep.subr.bf16.mxu0 %v3165_v30 }
  0xfd   : > { %1235 = vmatprep.subr.bf16.mxu1 %v3168_v31 }
  0xff   : > { %1115 = vmatpush1.bf16.msra.mxu0 %v3167_v32 }
 0x100   : > { %1236 = vmatpush1.bf16.msra.mxu1 %v3170_v33  ;;  %1422 = vmatprep.subr.bf16.mxu0 %v3173_v34 }
 0x166   : > { %v770_v36 = vpop.permute.xlu0 %769 }
 0x167   : > { %v4143_v37 = vmul.f32 %v2794_v35, %v770_v36 }
 0x169   : > { %v782_v38 = vand.u32 2139095040, %v4143_v37  ;;  %v779_v42 = vand.u32 2147483647, %v4143_v37  ;;  %vm781_vm7 = vcmp.lt.s32.totalorder %v4143_v37, 0  ;;  %vm871_vm15 = vweird.f32 %v4143_v37 }
 0x16b   : > { %v783_v39 = vshrl.u32 %v782_v38, 23  ;;  %v786_v45 = vand.u32 8388607, %v779_v42  ;;  %vm780_vm8 = vcmp.le.f32.partialorder %v779_v42, 0.7853982 }
 0x16d   : > { %v2795_v40 = vadd.s32 4294967169, %v783_v39  ;;  %v787_v0 = vor.u32 8388608, %v786_v45 }
 0x16f   : > { %v789_v41 = vadd.s32 1, %v2795_v40  ;;  %v827_v15 = vshll.u32 %v787_v0, 8 }
 0x171   : > { %vm790_vm0 = vcmp.gt.s32.totalorder %v789_v41, 0 }
 0x172   : > { %v791_v43 = vsel %vm790_vm0, %v789_v41, 0 }
 0x173   : > { %v793_v44 = vand.u32 31, %v791_v43  ;;  %v792_v47 = vshrl.u32 %v791_v43, 5 }
 0x175   : > { %v794_v46 = vsub.s32 32, %v793_v44  ;;  %v796_v49 = vshll.u32 %v3725_v48, %v793_v44  ;;  %v799_v51 = vshll.u32 %v3726_v50, %v793_v44  ;;  %v802_v55 = vshll.u32 %v3727_v53, %v793_v44 }
 0x176   : > { %v805_v58 = vshll.u32 %v3728_v56, %v793_v44  ;;  %v808_v61 = vshll.u32 %v3729_v59, %v793_v44  ;;  %vm811_vm1 = vcmp.lt.s32.totalorder %v792_v47, 1  ;;  %vm814_vm2 = vcmp.lt.s32.totalorder %v792_v47, 4 }
 0x177   : > { %v797_v52 = vshrl.u32 %v3726_v50, %v794_v46  ;;  %v800_v54 = vshrl.u32 %v3727_v53, %v794_v46  ;;  %v803_v57 = vshrl.u32 %v3728_v56, %v794_v46  ;;  %v806_v60 = vshrl.u32 %v3729_v59, %v794_v46 }
 0x178   : > { %v809_v63 = vshrl.u32 %v3730_v62, %v794_v46  ;;  %v795_v10 = vshrl.u32 %v3725_v48, %v794_v46  ;;  %vm813_vm3 = vcmp.lt.s32.totalorder %v792_v47, 3  ;;  %vm812_vm4 = vcmp.lt.s32.totalorder %v792_v47, 2  ;;  %v3245_v46 = vld [vmem:[#allocation9 + $0x4] ss:$8 sps:$4 sm:$0xff]  }
 0x179   : > { %v798_v2 = vor.u32 %v797_v52, %v796_v49  ;;  %v801_v3 = vor.u32 %v800_v54, %v799_v51  ;;  %v804_v4 = vor.u32 %v803_v57, %v802_v55  ;;  %v807_v5 = vor.u32 %v806_v60, %v805_v58  ;;  %1623 = vmatprep.subr.bf16.mxu1 %v3245_v46  ;;  %v3200_v46 = vld [vmem:[#allocation12 + $0x14] ss:$8 sps:$4 sm:$0xff]  }
 0x17a   : > { %v810_v6 = vor.u32 %v809_v63, %v808_v61 }
 0x17b   : > { %v816_v7 = vsel %vm814_vm2, %v804_v4, 2102212464  ;;  %v819_v8 = vsel %vm811_vm1, %v798_v2, %v801_v3  ;;  %v823_v9 = vsel %vm811_vm1, %v801_v3, %v804_v4  ;;  %v820_v11 = vsel %vm814_vm2, %v807_v5, 920167782 }
 0x17c   : > { %v824_v12 = vsel %vm814_vm2, %v810_v6, 1326507024  ;;  %v821_v13 = vsel %vm813_vm3, %v804_v4, %v820_v11  ;;  %v815_v16 = vsel %vm811_vm1, %v795_v10, %v798_v2  ;;  %v817_v17 = vsel %vm813_vm3, %v801_v3, %v816_v7 }
 0x17d   : > { %v825_v14 = vsel %vm813_vm3, %v807_v5, %v824_v12  ;;  %v822_v18 = vsel %vm812_vm4, %v819_v8, %v821_v13  ;;  %v818_v24 = vsel %vm812_vm4, %v815_v16, %v817_v17  ;;  %v3171_v8 = vld [vmem:[#allocation10] ss:$8 sps:$4 sm:$0xff]   ;;  %v3176_v13 = vld [vmem:[#allocation10 + $0x14] ss:$8 sps:$4 sm:$0xff]   ;;  %v3174_v16 = vld [vmem:[#allocation10 + $0x10] ss:$8 sps:$4 sm:$0xff]  }
 0x17e   : > { %v826_v19 = vsel %vm812_vm4, %v823_v9, %v825_v14  ;;  %v4152_v22 = vmul.u32.u64.low %v827_v15, %v822_v18  ;;  %v4153_v23 = vmul.u32.u64.high %v827_v15, %v822_v18, %v4152_v22  ;;  %v834_v26 = vmul.u32 %v827_v15, %v818_v24  ;;  %v3243_v14 = vld [vmem:[#allocation9] ss:$8 sps:$4 sm:$0xff]   ;;  %v3179_v17 = vld [vmem:[#allocation10 + $0x24] ss:$8 sps:$4 sm:$0xff]  }
 0x17f   : > { %v4149_v20 = vmul.u32.u64.low %v827_v15, %v826_v19  ;;  %v4150_v21 = vmul.u32.u64.high %v827_v15, %v826_v19, %v4149_v20  ;;  %v3248_v15 = vld [vmem:[#allocation9 + $0x14] ss:$8 sps:$4 sm:$0xff]   ;;  %v3251_v18 = vld [vmem:[#allocation9 + $0x24] ss:$8 sps:$4 sm:$0xff]   ;;  %v3177_v19 = vld [vmem:[#allocation10 + $0x20] ss:$8 sps:$4 sm:$0xff]  }
 0x180   : > { %v837_v25 = vadd.s32 1, %v4153_v23  ;;  %v3182_v20 = vld [vmem:[#allocation10 + $0x34] ss:$8 sps:$4 sm:$0xff]   ;;  %v3185_v24 = vld [vmem:[#allocation10 + $0x44] ss:$8 sps:$4 sm:$0xff]  }
 0x181   : > { %vm836_vm5 = vc.u32 %v4150_v21, %v4152_v22  ;;  %v835_v39 = vadd.s32 %v4152_v22, %v4150_v21  ;;  %v3249_v21 = vld [vmem:[#allocation9 + $0x20] ss:$8 sps:$4 sm:$0xff]   ;;  %v3254_v22 = vld [vmem:[#allocation9 + $0x34] ss:$8 sps:$4 sm:$0xff]  }
 0x182   : > { %v838_v27 = vsel %vm836_vm5, %v837_v25, %v4153_v23  ;;  %v3180_v23 = vld [vmem:[#allocation10 + $0x30] ss:$8 sps:$4 sm:$0xff]   ;;  %v3257_v25 = vld [vmem:[#allocation9 + $0x44] ss:$8 sps:$4 sm:$0xff]  }
 0x183   : > { %v839_v28 = vadd.s32 %v838_v27, %v834_v26  ;;  %v3183_v26 = vld [vmem:[#allocation10 + $0x40] ss:$8 sps:$4 sm:$0xff]   ;;  %v3188_v27 = vld [vmem:[#allocation10 + $0x54] ss:$8 sps:$4 sm:$0xff]  }
 0x185   : > { %v840_v29 = vadd.s32 536870912, %v839_v28 }
 0x187   : > { %v841_v30 = vshrl.u32 %v840_v29, 30  ;;  %v3260_v29 = vld [vmem:[#allocation9 + $0x54] ss:$8 sps:$4 sm:$0xff]  }
 0x189   : > { %v842_v31 = vshll.u32 %v841_v30, 30  ;;  %v865_v53 = vsub.s32 4, %v841_v30 }
 0x18b   : > { %v843_v32 = vsub.s32 %v839_v28, %v842_v31  ;;  %v866_v56 = vsel %vm781_vm7, %v865_v53, %v841_v30  ;;  %v3255_v28 = vld [vmem:[#allocation9 + $0x40] ss:$8 sps:$4 sm:$0xff]   ;;  %v3186_v30 = vld [vmem:[#allocation10 + $0x50] ss:$8 sps:$4 sm:$0xff]   ;;  %v3191_v31 = vld [vmem:[#allocation10 + $0x64] ss:$8 sps:$4 sm:$0xff]  }
 0x18c   : > { %v868_v58 = vsel %vm780_vm8, 0, %v866_v56  ;;  %v3207_v53 = vld [vmem:[#allocation12 + $0x40] ss:$8 sps:$4 sm:$0xff]   ;;  %v3215_v56 = vld [vmem:[#allocation12 + $0x64] ss:$8 sps:$4 sm:$0xff]  }
 0x18d   : > { %v845_v33 = vsub.s32 0, %v843_v32  ;;  %v992_v59 = vadd.s32 3, %v868_v58  ;;  %v872_v61 = vand.u32 3, %v868_v58  ;;  %v3218_v58 = vld [vmem:[#allocation12 + $0x74] ss:$8 sps:$4 sm:$0xff]  }
 0x18f   : > { %v2796_v34 = vmin.u32 %v845_v33, %v843_v32  ;;  %v993_v60 = vand.u32 3, %v992_v59  ;;  %vm877_vm10 = vcmp.eq.s32.totalorder %v872_v61, 2  ;;  %vm874_vm12 = vcmp.eq.s32.totalorder %v872_v61, 0  ;;  %v3263_v33 = vld [vmem:[#allocation9 + $0x64] ss:$8 sps:$4 sm:$0xff]  }
 0x190   : > { %vm873_vm14 = vcmp.lt.s32.totalorder %v872_v61, 2  ;;  %v3216_v59 = vld [vmem:[#allocation12 + $0x70] ss:$8 sps:$4 sm:$0xff]   ;;  %v3219_v61 = vld [vmem:[#allocation12 + $0x80] ss:$8 sps:$4 sm:$0xff]  }
 0x191   : > { %v847_v35 = vclz %v2796_v34  ;;  %vm998_vm9 = vcmp.eq.s32.totalorder %v993_v60, 2  ;;  %vm995_vm11 = vcmp.eq.s32.totalorder %v993_v60, 0  ;;  %vm994_vm13 = vcmp.lt.s32.totalorder %v993_v60, 2  ;;  %v3189_v34 = vld [vmem:[#allocation10 + $0x60] ss:$8 sps:$4 sm:$0xff]  }
 0x192   : > { %v3221_v60 = vld [vmem:[#allocation12 + $0x84] ss:$8 sps:$4 sm:$0xff]  }
 0x193   : > { %v2797_v36 = vadd.s32 4294967294, %v847_v35  ;;  %v3194_v35 = vld [vmem:[#allocation10 + $0x74] ss:$8 sps:$4 sm:$0xff]  }
 0x195   : > { %vm2798_vm6 = vcmp.lt.s32.totalorder %v2797_v36, 0 }
 0x196   : > { %v850_v38 = vsel %vm2798_vm6, 0, %v2797_v36  ;;  %v3261_v36 = vld [vmem:[#allocation9 + $0x60] ss:$8 sps:$4 sm:$0xff]  }
 0x197   : > { %v851_v40 = vsub.s32 32, %v850_v38  ;;  %v855_v41 = vsub.s32 4294967266, %v850_v38  ;;  %v852_v43 = vshll.u32 %v843_v32, %v850_v38  ;;  %v3258_v32 = vld [vmem:[#allocation9 + $0x50] ss:$8 sps:$4 sm:$0xff]  }
 0x198   : > { %v3192_v38 = vld [vmem:[#allocation10 + $0x70] ss:$8 sps:$4 sm:$0xff]  }
 0x199   : > { %v853_v44 = vshrl.u32 %v835_v39, %v851_v40  ;;  %v856_v45 = vadd.s32 127, %v855_v41  ;;  %v1324_v39 = vld [vmem:[%s4359_s9] sm:$0xff]  ;;  %v1681_v41 = vld [vmem:[%s4360_s2 + $0x8] sm:$0xff] }
 0x19a   : > { %v3197_v40 = vld [vmem:[#allocation12 + $0x4] ss:$8 sps:$4 sm:$0xff]  }
 0x19b   : > { %v854_v47 = vor.u32 %v853_v44, %v852_v43  ;;  %v857_v48 = vshll.u32 %v856_v45, 23  ;;  %v1325_v43 = vpack.c.bf16 %v1324_v39, %v1324_v39  ;;  %v3195_v44 = vld [vmem:[#allocation12] ss:$8 sps:$4 sm:$0xff]   ;;  %v1683_v45 = vpack.c.bf16 %v1681_v41, %v1681_v41 }
 0x19d   : > { %v858_v49 = vor.u32 4788187, %v857_v48  ;;  %v861_v51 = vcvt.s32.f32 %v854_v47  ;;  %v3198_v47 = vld [vmem:[#allocation12 + $0x10] ss:$8 sps:$4 sm:$0xff]   ;;  %v3203_v48 = vld [vmem:[#allocation12 + $0x24] ss:$8 sps:$4 sm:$0xff]  }
 0x19f   : > { %v859_v50 = vand.u32 2147483647, %v858_v49  ;;  %v3201_v49 = vld [vmem:[#allocation12 + $0x20] ss:$8 sps:$4 sm:$0xff]  }
 0x1a1   : > { %v862_v52 = vmul.f32 %v861_v51, %v859_v50  ;;  %v3206_v50 = vld [vmem:[#allocation12 + $0x34] ss:$8 sps:$4 sm:$0xff]   ;;  %v3204_v51 = vld [vmem:[#allocation12 + $0x30] ss:$8 sps:$4 sm:$0xff]  }
 0x1a3   : > { %v863_v54 = vxor.u32 2147483648, %v862_v52 }
 0x1a5   : > { %v864_v55 = vsel %vm781_vm7, %v863_v54, %v862_v52  ;;  %v3209_v52 = vld [vmem:[#allocation12 + $0x44] ss:$8 sps:$4 sm:$0xff]   ;;  %v3212_v54 = vld [vmem:[#allocation12 + $0x54] ss:$8 sps:$4 sm:$0xff]  }
 0x1a6   : > { %v867_v57 = vsel %vm780_vm8, %v4143_v37, %v864_v55  ;;  %v3246_v37 = vld [vmem:[#allocation9 + $0x10] ss:$8 sps:$4 sm:$0xff]  }
 0x1a7   : > { %3291 = vcosq.f32 %v867_v57  ;;  %v3210_v55 = vld [vmem:[#allocation12 + $0x50] ss:$8 sps:$4 sm:$0xff]  }
 0x1a8   : > { %3293 = vsinq.f32 %v867_v57  ;;  %v3213_v57 = vld [vmem:[#allocation12 + $0x60] ss:$8 sps:$4 sm:$0xff]  }
 0x1b1   : > { %v3292_v62 = vpop.eup %3291 }
 0x1b2   : > { %v3294_v63 = vpop.eup %3293  ;;  %v878_v0 = vxor.u32 2147483648, %v3292_v62 }
 0x1b3   : > { %v875_v2 = vxor.u32 2147483648, %v3294_v63 }
 0x1b4   : > { %v1000_v3 = vsel %vm998_vm9, %v878_v0, %v3294_v63  ;;  %v879_v42 = vsel %vm877_vm10, %v878_v0, %v3294_v63  ;;  %v3222_v63 = vld [vmem:[#allocation12 + $0x90] ss:$8 sps:$4 sm:$0xff]   ;;  %v3227_v0 = vld [vmem:[#allocation12 + $0xa4] ss:$8 sps:$4 sm:$0xff]  }
 0x1b5   : > { %v997_v4 = vsel %vm995_vm11, %v3292_v62, %v875_v2  ;;  %v876_v5 = vsel %vm874_vm12, %v3292_v62, %v875_v2  ;;  %v3224_v62 = vld [vmem:[#allocation12 + $0x94] ss:$8 sps:$4 sm:$0xff]   ;;  %v3225_v2 = vld [vmem:[#allocation12 + $0xa0] ss:$8 sps:$4 sm:$0xff]  }
 0x1b6   : > { %v1001_v6 = vsel %vm994_vm13, %v997_v4, %v1000_v3  ;;  %v880_v7 = vsel %vm873_vm14, %v876_v5, %v879_v42  ;;  %v3230_v3 = vld [vmem:[#allocation12 + $0xb4] ss:$8 sps:$4 sm:$0xff]   ;;  %v3228_v42 = vld [vmem:[#allocation12 + $0xb0] ss:$8 sps:$4 sm:$0xff]   ;;  %v3233_v4 = vld [vmem:[#allocation12 + $0xc4] ss:$8 sps:$4 sm:$0xff]  }
 0x1b7   : > { %v1002_v9 = vsel %vm871_vm15, nan, %v1001_v6  ;;  %v881_v10 = vsel %vm871_vm15, nan, %v880_v7  ;;  %v3231_v5 = vld [vmem:[#allocation12 + $0xc0] ss:$8 sps:$4 sm:$0xff]   ;;  %v3236_v6 = vld [vmem:[#allocation12 + $0xd4] ss:$8 sps:$4 sm:$0xff]  }
 0x1b8   : > { %v1003_v11 = vpack.c.bf16 %v1002_v9, %v1002_v9  ;;  %v882_v12 = vpack.c.bf16 %v881_v10, %v881_v10  ;;  %v3234_v7 = vld [vmem:[#allocation12 + $0xd0] ss:$8 sps:$4 sm:$0xff]   ;;  %v3237_v9 = vld [vmem:[#allocation12 + $0xe0] ss:$8 sps:$4 sm:$0xff]   ;;  %v3266_v10 = vld [vmem:[#allocation9 + $0x74] ss:$8 sps:$4 sm:$0xff]  }
 0x1ba   : > { %1133 = vmatmul.mubr.bf16.vlgmr.msra.gmra.mrb[0].mxu0 %v1003_v11  ;;  %1254 = vmatmul.mubr.bf16.vlgmr.msra.gmra.mrb[0].mxu1 %v882_v12  ;;  %v3242_v11 = vld [vmem:[#allocation12 + $0xf4] ss:$8 sps:$4 sm:$0xff]   ;;  %v3264_v12 = vld [vmem:[#allocation9 + $0x70] ss:$8 sps:$4 sm:$0xff]  }
 0x1bb   : > { %1423 = vmatpush1.bf16.msra.mxu0 %v3171_v8  ;;  %1454 = vmatprep.mubr.bf16.mxu0 %v3724_v1  ;;  %v3252_v1 = vld [vmem:[#allocation9 + $0x30] ss:$8 sps:$4 sm:$0xff]   ;;  %v3239_v8 = vld [vmem:[#allocation12 + $0xe4] ss:$8 sps:$4 sm:$0xff]  }
 0x1bc   : > { %1424 = vmatprep.subr.bf16.mxu0 %v3176_v13  ;;  %1624 = vmatpush1.bf16.msra.mxu1 %v3243_v14  ;;  %v3240_v13 = vld [vmem:[#allocation12 + $0xf0] ss:$8 sps:$4 sm:$0xff]   ;;  %v1680_v14 = vld [vmem:[%s4360_s2] sm:$0xff] }
 0x1bd   : > { %1625 = vmatprep.subr.bf16.mxu1 %v3248_v15  ;;  %v3269_v15 = vld [vmem:[#allocation9 + $0x84] ss:$8 sps:$4 sm:$0xff]  }
 0x1bf   : > { %1425 = vmatpush1.bf16.msra.mxu0 %v3174_v16  ;;  %v3267_v16 = vld [vmem:[#allocation9 + $0x80] ss:$8 sps:$4 sm:$0xff]  }
 0x1c0   : > { %1426 = vmatprep.subr.bf16.mxu0 %v3179_v17  ;;  %1626 = vmatpush1.bf16.msra.mxu1 %v3246_v37  ;;  %v1682_v17 = vpack.c.bf16 %v1680_v14, %v1680_v14  ;;  %v3272_v37 = vld [vmem:[#allocation9 + $0x94] ss:$8 sps:$4 sm:$0xff]  }
 0x1c1   : > { %1627 = vmatprep.subr.bf16.mxu1 %v3251_v18  ;;  %v3270_v18 = vld [vmem:[#allocation9 + $0x90] ss:$8 sps:$4 sm:$0xff]  }
 0x1c3   : > { %1427 = vmatpush1.bf16.msra.mxu0 %v3177_v19  ;;  %v3275_v19 = vld [vmem:[#allocation9 + $0xa4] ss:$8 sps:$4 sm:$0xff]  }
 0x1c4   : > { %1428 = vmatprep.subr.bf16.mxu0 %v3182_v20  ;;  %1628 = vmatpush1.bf16.msra.mxu1 %v3249_v21  ;;  %v3273_v20 = vld [vmem:[#allocation9 + $0xa0] ss:$8 sps:$4 sm:$0xff]   ;;  %v3278_v21 = vld [vmem:[#allocation9 + $0xb4] ss:$8 sps:$4 sm:$0xff]  }
 0x1c5   : > { %1629 = vmatprep.subr.bf16.mxu1 %v3254_v22  ;;  %v3276_v22 = vld [vmem:[#allocation9 + $0xb0] ss:$8 sps:$4 sm:$0xff]  }
 0x1c7   : > { %1429 = vmatpush1.bf16.msra.mxu0 %v3180_v23  ;;  %v3281_v23 = vld [vmem:[#allocation9 + $0xc4] ss:$8 sps:$4 sm:$0xff]  }
 0x1c8   : > { %1430 = vmatprep.subr.bf16.mxu0 %v3185_v24  ;;  %1630 = vmatpush1.bf16.msra.mxu1 %v3252_v1  ;;  %v3279_v24 = vld [vmem:[#allocation9 + $0xc0] ss:$8 sps:$4 sm:$0xff]   ;;  %v3284_v1 = vld [vmem:[#allocation9 + $0xd4] ss:$8 sps:$4 sm:$0xff]  }
 0x1c9   : > { %1631 = vmatprep.subr.bf16.mxu1 %v3257_v25  ;;  %v3282_v25 = vld [vmem:[#allocation9 + $0xd0] ss:$8 sps:$4 sm:$0xff]  }
 0x1cb   : > { %1431 = vmatpush1.bf16.msra.mxu0 %v3183_v26  ;;  %v3287_v26 = vld [vmem:[#allocation9 + $0xe4] ss:$8 sps:$4 sm:$0xff]  }
 0x1cc   : > { %1432 = vmatprep.subr.bf16.mxu0 %v3188_v27  ;;  %1632 = vmatpush1.bf16.msra.mxu1 %v3255_v28  ;;  %v3285_v27 = vld [vmem:[#allocation9 + $0xe0] ss:$8 sps:$4 sm:$0xff]   ;;  %v3290_v28 = vld [vmem:[#allocation9 + $0xf4] ss:$8 sps:$4 sm:$0xff]  }
 0x1cd   : > { %1633 = vmatprep.subr.bf16.mxu1 %v3260_v29  ;;  %v3288_v29 = vld [vmem:[#allocation9 + $0xf0] ss:$8 sps:$4 sm:$0xff]  }
 0x1cf   : > { %1433 = vmatpush1.bf16.msra.mxu0 %v3186_v30  ;;  %v1264_v30 = vlaneseq }
 0x1d0   : > { %1434 = vmatprep.subr.bf16.mxu0 %v3191_v31  ;;  %1634 = vmatpush1.bf16.msra.mxu1 %v3258_v32 }
 0x1d1   : > { %1635 = vmatprep.subr.bf16.mxu1 %v3263_v33  ;;  %v1265_v31 = vshrl.u32 %v1264_v30, 7  ;;  %v1262_v33 = vld [vmem:[%s4361_s25] sm:$0x3] }
 0x1d3   : > { %1435 = vmatpush1.bf16.msra.mxu0 %v3189_v34  ;;  %v4174_v32 = vsub.s32 0, %v1265_v31  ;;  %v4179_v34 = vsub.s32 1, %v1265_v31 }
 0x1d4   : > { %1436 = vmatprep.subr.bf16.mxu0 %v3194_v35  ;;  %1636 = vmatpush1.bf16.msra.mxu1 %v3261_v36 }
 0x1d5   : > { %1637 = vmatprep.subr.bf16.mxu1 %v3266_v10  ;;  %v1267_v35 = vrot.slane %v1262_v33, %v4174_v32  ;;  %v1271_v39 = vrot.slane %v1262_v33, %v4179_v34 }
 0x1d7   : > { %1437 = vmatpush1.bf16.msra.mxu0 %v3192_v38 }
 0x1d8   : > { %1888 = vmatprep.subr.bf16.mxu0 %v3197_v40  ;;  %1638 = vmatpush1.bf16.msra.mxu1 %v3264_v12 }
 0x1d9   : > { %1639 = vmatprep.subr.bf16.mxu1 %v3269_v15 }
 0x1da   : > { %1455 = vmatmul.mubr.bf16.vlgmr.msra.gmra.mrb[4].mxu0 %v1325_v43 }
 0x1db   : > { %1889 = vmatpush1.bf16.msra.mxu0 %v3195_v44  ;;  %1920 = vmatprep.mubr.bf16.mxu0 %v1683_v45 }
 0x1dc   : > { %1890 = vmatprep.subr.bf16.mxu0 %v3200_v46  ;;  %1640 = vmatpush1.bf16.msra.mxu1 %v3267_v16 }
 0x1dd   : > { %1641 = vmatprep.subr.bf16.mxu1 %v3272_v37 }
 0x1df   : > { %1891 = vmatpush1.bf16.msra.mxu0 %v3198_v47 }
 0x1e0   : > { %1892 = vmatprep.subr.bf16.mxu0 %v3203_v48  ;;  %1642 = vmatpush1.bf16.msra.mxu1 %v3270_v18  ;;  %v1664_v18 = vld [vmem:[%s4363_s13] sm:$0x3] }
 0x1e1   : > { %1643 = vmatprep.subr.bf16.mxu1 %v3275_v19 }
 0x1e3   : > { %1893 = vmatpush1.bf16.msra.mxu0 %v3201_v49 }
 0x1e4   : > { %1894 = vmatprep.subr.bf16.mxu0 %v3206_v50  ;;  %1644 = vmatpush1.bf16.msra.mxu1 %v3273_v20 }
 0x1e5   : > { %1645 = vmatprep.subr.bf16.mxu1 %v3278_v21  ;;  %v1669_v21 = vrot.slane %v1664_v18, %v4174_v32 }
 0x1e7   : > { %1895 = vmatpush1.bf16.msra.mxu0 %v3204_v51 }
 0x1e8   : > { %1896 = vmatprep.subr.bf16.mxu0 %v3209_v52  ;;  %1646 = vmatpush1.bf16.msra.mxu1 %v3276_v22 }
 0x1e9   : > { %1647 = vmatprep.subr.bf16.mxu1 %v3281_v23 }
 0x1eb   : > { %1897 = vmatpush1.bf16.msra.mxu0 %v3207_v53 }
 0x1ec   : > { %1898 = vmatprep.subr.bf16.mxu0 %v3212_v54  ;;  %1648 = vmatpush1.bf16.msra.mxu1 %v3279_v24  ;;  %v1673_v24 = vrot.slane %v1664_v18, %v4179_v34 }
 0x1ed   : > { %1649 = vmatprep.subr.bf16.mxu1 %v3284_v1 }
 0x1ef   : > { %1899 = vmatpush1.bf16.msra.mxu0 %v3210_v55 }
 0x1f0   : > { %1900 = vmatprep.subr.bf16.mxu0 %v3215_v56  ;;  %1650 = vmatpush1.bf16.msra.mxu1 %v3282_v25 }
 0x1f1   : > { %1651 = vmatprep.subr.bf16.mxu1 %v3287_v26 }
 0x1f3   : > { %1901 = vmatpush1.bf16.msra.mxu0 %v3213_v57 }
 0x1f4   : > { %1902 = vmatprep.subr.bf16.mxu0 %v3218_v58  ;;  %1652 = vmatpush1.bf16.msra.mxu1 %v3285_v27 }
 0x1f5   : > { %1653 = vmatprep.subr.bf16.mxu1 %v3290_v28 }
 0x1f7   : > { %1903 = vmatpush1.bf16.msra.mxu0 %v3216_v59 }
 0x1f8   : > { %1904 = vmatprep.subr.bf16.mxu0 %v3221_v60  ;;  %1654 = vmatpush1.bf16.msra.mxu1 %v3288_v29 }
 0x1fb   : > { %1905 = vmatpush1.bf16.msra.mxu0 %v3219_v61 }
 0x1fc   : > { %1906 = vmatprep.subr.bf16.mxu0 %v3224_v62 }
 0x1ff   : > { %1907 = vmatpush1.bf16.msra.mxu0 %v3222_v63 }
 0x200   : > { %1908 = vmatprep.subr.bf16.mxu0 %v3227_v0 }
 0x203   : > { %1909 = vmatpush1.bf16.msra.mxu0 %v3225_v2 }
 0x204   : > { %1910 = vmatprep.subr.bf16.mxu0 %v3230_v3 }
 0x207   : > { %1911 = vmatpush1.bf16.msra.mxu0 %v3228_v42 }
 0x208   : > { %1912 = vmatprep.subr.bf16.mxu0 %v3233_v4 }
 0x20b   : > { %1913 = vmatpush1.bf16.msra.mxu0 %v3231_v5  ;;  %v1716_v5 = vld [vmem:[%s4362_s17] sm:$0x3] }
 0x20c   : > { %1914 = vmatprep.subr.bf16.mxu0 %v3236_v6  ;;  %v1721_v6 = vrot.slane %v1716_v5, %v4174_v32 }
 0x20f   : > { %1915 = vmatpush1.bf16.msra.mxu0 %v3234_v7  ;;  %v1725_v7 = vrot.slane %v1716_v5, %v4179_v34 }
 0x210   : > { %1916 = vmatprep.subr.bf16.mxu0 %v3239_v8 }
 0x213   : > { %1917 = vmatpush1.bf16.msra.mxu0 %v3237_v9 }
 0x214   : > { %1918 = vmatprep.subr.bf16.mxu0 %v3242_v11 }
 0x217   : > { %1919 = vmatpush1.bf16.msra.mxu0 %v3240_v13 }
 0x21a   : > { %1921 = vmatmul.mubr.bf16.vlgmr.msra.gmra.mrb[8].mxu0 %v1682_v17 }
 0x28d   : > { %v1134_v36 = vpop.f32.mrb[0].mxu0  ;;  %v1255_v38 = vpop.f32.mrb[0].mxu1 }
 0x28e   : > { %v1256_v40 = vadd.f32 %v1255_v38, %v1134_v36  ;;  %v1136_v41 = vpop.f32.mrb[1].mxu0  ;;  %v1257_v43 = vpop.f32.mrb[1].mxu1  ;;  %v1929_v36 = vld [vmem:[%s4364_s11] sm:$0x3] }
 0x28f   : > { %v1258_v44 = vadd.f32 %v1257_v43, %v1136_v41  ;;  %v1138_v45 = vpop.f32.mrb[2].mxu0  ;;  %v1259_v46 = vpop.f32.mrb[2].mxu1  ;;  %v1930_v38 = vld [vmem:[%s4365_s27] sm:$0x3] }
 0x290   : > { %v1274_v47 = vadd.f32 %v1267_v35, %v1256_v40  ;;  %v1139_v48 = vpop.f32.mrb[3].mxu0  ;;  %v1260_v49 = vpop.f32.mrb[3].mxu1  ;;  %v1956_v40 = vrot.slane %v1929_v36, %v4179_v34  ;;  %v1965_v43 = vrot.slane %v1930_v38, %v4174_v32 }
 0x291   : > { %v1275_v50 = vadd.f32 %v1271_v39, %v1258_v44  ;;  %v1952_v39 = vrot.slane %v1929_v36, %v4174_v32  ;;  %v1969_v44 = vrot.slane %v1930_v38, %v4179_v34 }
 0x292   : > { %v1276_v51 = vsub.f32 0.0, %v1274_v47 }
 0x293   : > { %v1277_v52 = vsub.f32 0.0, %v1275_v50 }
 0x294   : > { %v1278_v53 = vmul.f32 1.442695, %v1276_v51 }
 0x295   : > { %v1280_v54 = vmul.f32 1.442695, %v1277_v52 }
 0x296   : > { %3295 = vpow2.f32 %v1278_v53 }
 0x297   : > { %3297 = vpow2.f32 %v1280_v54 }
 0x2a0   : > { %v3296_v55 = vpop.eup %3295 }
 0x2a1   : > { %v3298_v56 = vpop.eup %3297  ;;  %v1282_v57 = vadd.f32 1.0, %v3296_v55 }
 0x2a2   : > { %v1283_v58 = vadd.f32 1.0, %v3298_v56 }
 0x2a3   : > { %3299 = vrcp.f32 %v1282_v57 }
 0x2a4   : > { %3301 = vrcp.f32 %v1283_v58 }
 0x2ad   : > { %v3300_v59 = vpop.eup %3299  ;;  %v1456_v60 = vpop.f32.mrb[4].mxu0 }
 0x2ae   : > { %v3302_v61 = vpop.eup %3301  ;;  %v1288_v62 = vmul.f32 %v3300_v59, %v1274_v47  ;;  %v1458_v63 = vpop.f32.mrb[5].mxu0 }
 0x2af   : > { %v1460_v0 = vpop.f32.mrb[6].mxu0  ;;  %v1289_v2 = vmul.f32 %v3302_v61, %v1275_v50 }
 0x2b0   : > { %v1461_v3 = vpop.f32.mrb[7].mxu0  ;;  %v1290_v4 = vpack.c.bf16 %v1288_v62, %v1288_v62 }
 0x2b1   : > { %v1291_v42 = vpack.c.bf16 %v1289_v2, %v1289_v2 }
 0x2b3   : > { %1655 = vmatprep.mubr.bf16.mxu1 %v1291_v42 }
 0x2b4   : > { %1656 = vmatmul.mubr.bf16.vlgmr.msra.gmra.mrb[4].mxu1 %v1290_v4 }
 0x2ed   : > { %v1922_v8 = vpop.f32.mrb[8].mxu0 }
 0x2ee   : > { %v1923_v9 = vadd.f32 %v1922_v8, %v1721_v6  ;;  %v1924_v10 = vpop.f32.mrb[9].mxu0 }
 0x2ef   : > { %v1925_v11 = vadd.f32 %v1924_v10, %v1725_v7  ;;  %v1926_v12 = vpop.f32.mrb[10].mxu0 }
 0x2f0   : > { %v1927_v13 = vpop.f32.mrb[11].mxu0 }
 0x2f1   : > { %v1931_v14 = vadd.f32 %v1925_v11, %v1923_v9 }
 0x2f3   : > { %1932 = vadd.xlane.f32.xlu0 %v1931_v14 }
 0x380   : > { %v1933_v15 = vpop.xlane.xlu0 %1932 }
 0x381   : > { %v1935_v16 = vmul.f32 0.00390625, %v1933_v15 }
 0x383   : > { %v1936_v17 = vsub.f32 %v1923_v9, %v1935_v16  ;;  %v1937_v37 = vsub.f32 %v1925_v11, %v1935_v16 }
 0x385   : > { %v1938_v19 = vmul.f32 %v1936_v17, %v1936_v17  ;;  %v1939_v20 = vmul.f32 %v1937_v37, %v1937_v37 }
 0x387   : > { %v1657_v22 = vpop.f32.mrb[4].mxu1  ;;  %v1940_v23 = vadd.f32 %v1939_v20, %v1938_v19 }
 0x388   : > { %v1658_v1 = vadd.f32 %v1657_v22, %v1456_v60  ;;  %v1659_v25 = vpop.f32.mrb[5].mxu1 }
 0x389   : > { %1941 = vadd.xlane.f32.xlu1 %v1940_v23  ;;  %v1660_v26 = vadd.f32 %v1659_v25, %v1458_v63  ;;  %v1661_v27 = vpop.f32.mrb[6].mxu1 }
 0x38a   : > { %v1676_v28 = vadd.f32 %v1669_v21, %v1658_v1  ;;  %v1662_v29 = vpop.f32.mrb[7].mxu1 }
 0x38b   : > { %v1677_v30 = vadd.f32 %v1673_v24, %v1660_v26 }
 0x38c   : > { %1678 = vst [vmem:[#allocation3] sm:$0xff] %v1676_v28 }
 0x38d   : > { %1679 = vst [vmem:[#allocation3 + $0x8] sm:$0xff] %v1677_v30 }
 0x416   : > { %v1942_v31 = vpop.xlane.xlu1 %1941 }
 0x417   : > { %v1943_v33 = vmul.f32 0.00390625, %v1942_v31 }
 0x419   : > { %v1944_v35 = vadd.f32 1e-05, %v1943_v33 }
 0x41b   : > { %3303 = vrsqrt.f32 %v1944_v35 }
 0x425   : > { %v3304_v41 = vpop.eup %3303 }
 0x426   : > { %v1946_v45 = vmul.f32 %v3304_v41, %v1936_v17  ;;  %v1947_v46 = vmul.f32 %v3304_v41, %v1937_v37 }
 0x428   : > { %v1959_v47 = vmul.f32 %v1952_v39, %v1946_v45  ;;  %v1960_v48 = vmul.f32 %v1956_v40, %v1947_v46 }
 0x42a   : > { %v1972_v49 = vadd.f32 %v1965_v43, %v1959_v47  ;;  %v1973_v50 = vadd.f32 %v1969_v44, %v1960_v48 }
 0x42c   : > { %v1974_v51 = vsub.f32 0.0, %v1972_v49  ;;  %v1975_v52 = vsub.f32 0.0, %v1973_v50 }
 0x42e   : > { %v1976_v53 = vmul.f32 1.442695, %v1974_v51  ;;  %v1978_v54 = vmul.f32 1.442695, %v1975_v52 }
 0x430   : > { %3305 = vpow2.f32 %v1976_v53 }
 0x431   : > { %3307 = vpow2.f32 %v1978_v54 }
 0x43a   : > { %v3306_v55 = vpop.eup %3305 }
 0x43b   : > { %v3308_v56 = vpop.eup %3307  ;;  %v1980_v57 = vadd.f32 1.0, %v3306_v55 }
 0x43c   : > { %v1981_v58 = vadd.f32 1.0, %v3308_v56 }
 0x43d   : > { %3309 = vrcp.f32 %v1980_v57 }
 0x43e   : > { %3311 = vrcp.f32 %v1981_v58 }
 0x447   : > { %v3310_v32 = vpop.eup %3309 }
 0x448   : > { %v3312_v34 = vpop.eup %3311  ;;  %v1986_v59 = vmul.f32 %v3310_v32, %v1972_v49 }
 0x449   : > { %v1987_v60 = vmul.f32 %v3312_v34, %v1973_v50 }
 0x44a   : > { %1988 = vst [vmem:[#allocation2] sm:$0xff] %v1986_v59 }
 0x44b   : > { %1989 = vst [vmem:[#allocation2 + $0x8] sm:$0xff] %v1987_v60 }
 0x44c PF: > { %v3313_v61 = vld [vmem:[%s4116_s22 + $0x4] ss:$8 sps:$4 sm:$0xff]   ;;  %v3315_v62 = vld [vmem:[%s4116_s22] ss:$8 sps:$4 sm:$0xff]   ;;  %v3316_v63 = vld [vmem:[%s4116_s22 + $0x14] ss:$8 sps:$4 sm:$0xff]   ;;  %v2032_v38 = vlaneseq }
 0x44d   : > { %2210 = vmatprep.subr.bf16.mxu0 %v3313_v61  ;;  %v3318_v0 = vld [vmem:[%s4116_s22 + $0x10] ss:$8 sps:$4 sm:$0xff]   ;;  %v3319_v2 = vld [vmem:[%s4116_s22 + $0x24] ss:$8 sps:$4 sm:$0xff]   ;;  %v3321_v3 = vld [vmem:[%s4116_s22 + $0x20] ss:$8 sps:$4 sm:$0xff]  }
 0x44e   : > { %2211 = vmatpush1.bf16.msra.mxu0 %v3315_v62  ;;  %v3322_v42 = vld [vmem:[%s4116_s22 + $0x34] ss:$8 sps:$4 sm:$0xff]   ;;  %v3324_v4 = vld [vmem:[%s4116_s22 + $0x30] ss:$8 sps:$4 sm:$0xff]   ;;  %v3325_v5 = vld [vmem:[%s4116_s22 + $0x44] ss:$8 sps:$4 sm:$0xff]  }
 0x44f   : > { %2212 = vmatprep.subr.bf16.mxu0 %v3316_v63  ;;  %v3327_v6 = vld [vmem:[%s4116_s22 + $0x40] ss:$8 sps:$4 sm:$0xff]   ;;  %v3328_v7 = vld [vmem:[%s4116_s22 + $0x54] ss:$8 sps:$4 sm:$0xff]   ;;  %v3330_v8 = vld [vmem:[%s4116_s22 + $0x50] ss:$8 sps:$4 sm:$0xff]  }
 0x450   : > { %v3331_v9 = vld [vmem:[%s4116_s22 + $0x64] ss:$8 sps:$4 sm:$0xff]   ;;  %v2026_v11 = vld [vmem:[#allocation3 + $0x8] sm:$0xff]  ;;  %v3333_v13 = vld [vmem:[%s4116_s22 + $0x60] ss:$8 sps:$4 sm:$0xff]   ;;  %v2033_v39 = vshrl.u32 %v2032_v38, 7 }
 0x451   : > { %v3334_v14 = vld [vmem:[%s4116_s22 + $0x74] ss:$8 sps:$4 sm:$0xff]   ;;  %v3336_v16 = vld [vmem:[%s4116_s22 + $0x70] ss:$8 sps:$4 sm:$0xff]   ;;  %v3337_v17 = vld [vmem:[%s4116_s22 + $0x84] ss:$8 sps:$4 sm:$0xff]  }
 0x452   : > { %2213 = vmatpush1.bf16.msra.mxu0 %v3318_v0  ;;  %v2024_v10 = vld [vmem:[#allocation2 + $0x8] sm:$0xff]  ;;  %v3340_v18 = vld [vmem:[%s4116_s22 + $0x94] ss:$8 sps:$4 sm:$0xff]   ;;  %v3342_v19 = vld [vmem:[%s4116_s22 + $0x90] ss:$8 sps:$4 sm:$0xff]   ;;  %v4243_v40 = vsub.s32 0, %v2033_v39 }
 0x453   : > { %2214 = vmatprep.subr.bf16.mxu0 %v3319_v2  ;;  %v4216_v12 = vadd.f32 %v2026_v11, %v2024_v10  ;;  %v3339_v37 = vld [vmem:[%s4116_s22 + $0x80] ss:$8 sps:$4 sm:$0xff]   ;;  %v3343_v20 = vld [vmem:[%s4116_s22 + $0xa4] ss:$8 sps:$4 sm:$0xff]   ;;  %v3346_v22 = vld [vmem:[%s4116_s22 + $0xb4] ss:$8 sps:$4 sm:$0xff]  }
 0x454   : > { %v3345_v21 = vld [vmem:[%s4116_s22 + $0xa0] ss:$8 sps:$4 sm:$0xff]   ;;  %v3348_v23 = vld [vmem:[%s4116_s22 + $0xb0] ss:$8 sps:$4 sm:$0xff]   ;;  %v3349_v24 = vld [vmem:[%s4116_s22 + $0xc4] ss:$8 sps:$4 sm:$0xff]  }
 0x455   : > { %v2030_v15 = vpack.c.bf16 %v4216_v12, %v4216_v12  ;;  %v3351_v1 = vld [vmem:[%s4116_s22 + $0xc0] ss:$8 sps:$4 sm:$0xff]   ;;  %v3352_v25 = vld [vmem:[%s4116_s22 + $0xd4] ss:$8 sps:$4 sm:$0xff]   ;;  %v3354_v26 = vld [vmem:[%s4116_s22 + $0xd0] ss:$8 sps:$4 sm:$0xff]  }
 0x456   : > { %2215 = vmatpush1.bf16.msra.mxu0 %v3321_v3  ;;  %v3355_v27 = vld [vmem:[%s4116_s22 + $0xe4] ss:$8 sps:$4 sm:$0xff]   ;;  %v3357_v28 = vld [vmem:[%s4116_s22 + $0xe0] ss:$8 sps:$4 sm:$0xff]   ;;  %v2025_v30 = vld [vmem:[#allocation3] sm:$0xff]  ;;  %v2038_v43 = vsub.s32 4, %v2033_v39 }
 0x457   : > { %2216 = vmatprep.subr.bf16.mxu0 %v3322_v42  ;;  %2242 = vmatprep.mubr.bf16.mxu0 %v2030_v15  ;;  %v2023_v29 = vld [vmem:[#allocation2] sm:$0xff]  ;;  %v3358_v31 = vld [vmem:[%s4116_s22 + $0xf4] ss:$8 sps:$4 sm:$0xff]   ;;  %v3360_v35 = vld [vmem:[%s4116_s22 + $0xf0] ss:$8 sps:$4 sm:$0xff]   ;;  %v4249_v63 = vsub.s32 1, %v2033_v39 }
 0x458   : > { %v4238_v33 = vadd.f32 %v2025_v30, %v2023_v29  ;;  %v2022_v41 = vld [vmem:[%s4131_s21] sm:$0x77]  ;;  %v2274_v0 = vsub.s32 5, %v2033_v39  ;;  %v2290_v2 = vsub.s32 2, %v2033_v39  ;;  %v2294_v3 = vsub.s32 6, %v2033_v39  ;;  %p2947_p4 = scmp.ne.s32.totalorder %s3705_s30, 3 }
 0x459   : > { %v2035_v44 = vrot.slane %v2022_v41, %v4243_v40  ;;  %v2039_v45 = vrot.slane %v2022_v41, %v2038_v43  ;;  %v2271_v42 = vrot.slane %v2022_v41, %v4249_v63  ;;  %v3376_v38 = vld [vmem:[#allocation15 + $0x10] ss:$8 sps:$4 sm:$0xff] (!%p2947_p4)   ;;  %v3377_v39 = vld [vmem:[#allocation15 + $0x24] ss:$8 sps:$4 sm:$0xff] (!%p2947_p4)   ;;  %v3380_v43 = vld [vmem:[#allocation15 + $0x34] ss:$8 sps:$4 sm:$0xff] (!%p2947_p4)  }
 0x45a   : > { %2217 = vmatpush1.bf16.msra.mxu0 %v3324_v4  ;;  %v2029_v36 = vpack.c.bf16 %v4238_v33, %v4238_v33  ;;  %v2275_v4 = vrot.slane %v2022_v41, %v2274_v0  ;;  %v3413_v0 = vld [vmem:[#allocation15 + $0xe4] ss:$8 sps:$4 sm:$0xff] (!%p2947_p4)   ;;  %s4366_s21 = sld [smem:[#allocation34_spill]] (!%p2947_p4) }
 0x45b   : > { %2218 = vmatprep.subr.bf16.mxu0 %v3325_v5  ;;  %v2045_v46 = vrot.slane %v2035_v44, %v4243_v40  ;;  %v2049_v47 = vrot.slane %v2039_v45, %v4243_v40  ;;  %v2291_v5 = vrot.slane %v2022_v41, %v2290_v2  ;;  %v3385_v44 = vld [vmem:[#allocation15 + $0x40] ss:$8 sps:$4 sm:$0xff] (!%p2947_p4)   ;;  %v3386_v45 = vld [vmem:[#allocation15 + $0x54] ss:$8 sps:$4 sm:$0xff] (!%p2947_p4)  }
 0x45d   : > { %v2301_v10 = vrot.slane %v2291_v5, %v2290_v2 }
 0x45e   : > { %2219 = vmatpush1.bf16.msra.mxu0 %v3327_v6  ;;  %v2295_v6 = vrot.slane %v2022_v41, %v2294_v3  ;;  %v3379_v41 = vld [vmem:[#allocation15 + $0x20] ss:$8 sps:$4 sm:$0xff] (!%p2947_p4)   ;;  %v3416_v3 = vld [vmem:[#allocation15 + $0xf4] ss:$8 sps:$4 sm:$0xff] (!%p2947_p4)  }
 0x45f   : > { %2220 = vmatprep.subr.bf16.mxu0 %v3328_v7  ;;  %v2281_v7 = vrot.slane %v2271_v42, %v4249_v63  ;;  %v3418_v42 = vld [vmem:[#allocation15 + $0xf0] ss:$8 sps:$4 sm:$0xff] (!%p2947_p4)  }
 0x460   : > { %v2305_v11 = vrot.slane %v2295_v6, %v2290_v2  ;;  %v3415_v2 = vld [vmem:[#allocation15 + $0xe0] ss:$8 sps:$4 sm:$0xff] (!%p2947_p4)  }
 0x461   : > { %v2366_v6 = vld [vmem:[%s4366_s21] sm:$0x3] (!%p2947_p4) }
 0x462   : > { %2221 = vmatpush1.bf16.msra.mxu0 %v3330_v8  ;;  %v2285_v8 = vrot.slane %v2275_v4, %v4249_v63 }
 0x463   : > { %2222 = vmatprep.subr.bf16.mxu0 %v3331_v9 }
 0x466   : > { %2223 = vmatpush1.bf16.msra.mxu0 %v3333_v13 }
 0x467   : > { %2224 = vmatprep.subr.bf16.mxu0 %v3334_v14 }
 0x46a   : > { %2225 = vmatpush1.bf16.msra.mxu0 %v3336_v16 }
 0x46b   : > { %2226 = vmatprep.subr.bf16.mxu0 %v3337_v17 }
 0x46e   : > { %2227 = vmatpush1.bf16.msra.mxu0 %v3339_v37 }
 0x46f   : > { %2228 = vmatprep.subr.bf16.mxu0 %v3340_v18 }
 0x472   : > { %2229 = vmatpush1.bf16.msra.mxu0 %v3342_v19 }
 0x473   : > { %2230 = vmatprep.subr.bf16.mxu0 %v3343_v20 }
 0x476   : > { %2231 = vmatpush1.bf16.msra.mxu0 %v3345_v21 }
 0x477   : > { %2232 = vmatprep.subr.bf16.mxu0 %v3346_v22 }
 0x47a   : > { %2233 = vmatpush1.bf16.msra.mxu0 %v3348_v23 }
 0x47b   : > { %2234 = vmatprep.subr.bf16.mxu0 %v3349_v24 }
 0x47e   : > { %2235 = vmatpush1.bf16.msra.mxu0 %v3351_v1 }
 0x47f   : > { %2236 = vmatprep.subr.bf16.mxu0 %v3352_v25 }
 0x482   : > { %2237 = vmatpush1.bf16.msra.mxu0 %v3354_v26 }
 0x483   : > { %2238 = vmatprep.subr.bf16.mxu0 %v3355_v27 }
 0x486   : > { %2239 = vmatpush1.bf16.msra.mxu0 %v3357_v28 }
 0x487   : > { %2240 = vmatprep.subr.bf16.mxu0 %v3358_v31  ;;  %v3371_v31 = vld [vmem:[#allocation15 + $0x4] ss:$8 sps:$4 sm:$0xff] (!%p2947_p4)  }
 0x48a   : > { %2241 = vmatpush1.bf16.msra.mxu0 %v3360_v35  ;;  %v3373_v35 = vld [vmem:[#allocation15] ss:$8 sps:$4 sm:$0xff] (!%p2947_p4)  }
 0x48b   : > { %2538 = vmatprep.subr.bf16.mxu0 (!%p2947_p4), %v3371_v31 }
 0x48d   : > { %2243 = vmatmul.mubr.bf16.vlgmr.msra.gmra.mrb[0].mxu0 %v2029_v36  ;;  %v3374_v36 = vld [vmem:[#allocation15 + $0x14] ss:$8 sps:$4 sm:$0xff] (!%p2947_p4)  }
 0x48e   : > { %2539 = vmatpush1.bf16.msra.mxu0 (!%p2947_p4), %v3373_v35 }
 0x48f   : > { %2540 = vmatprep.subr.bf16.mxu0 (!%p2947_p4), %v3374_v36 }
 0x492   : > { %2541 = vmatpush1.bf16.msra.mxu0 (!%p2947_p4), %v3376_v38 }
 0x493   : > { %2542 = vmatprep.subr.bf16.mxu0 (!%p2947_p4), %v3377_v39 }
 0x496   : > { %2543 = vmatpush1.bf16.msra.mxu0 (!%p2947_p4), %v3379_v41 }
 0x497   : > { %2544 = vmatprep.subr.bf16.mxu0 (!%p2947_p4), %v3380_v43 }
 0x560   : > { %v2244_v48 = vpop.f32.mrb[0].mxu0 }
 0x561   : > { %v2245_v49 = vadd.f32 %v2244_v48, %v2045_v46  ;;  %v2246_v50 = vpop.f32.mrb[1].mxu0  ;;  %v3388_v46 = vld [vmem:[#allocation15 + $0x50] ss:$8 sps:$4 sm:$0xff] (!%p2947_p4)  }
 0x562   : > { %v2247_v51 = vadd.f32 %v2246_v50, %v2049_v47  ;;  %v2248_v52 = vpop.f32.mrb[2].mxu0  ;;  %v3389_v47 = vld [vmem:[#allocation15 + $0x64] ss:$8 sps:$4 sm:$0xff] (!%p2947_p4)   ;;  %v3391_v50 = vld [vmem:[#allocation15 + $0x60] ss:$8 sps:$4 sm:$0xff] (!%p2947_p4)  }
 0x563   : > { %v2249_v53 = vpop.f32.mrb[3].mxu0  ;;  %v3394_v52 = vld [vmem:[#allocation15 + $0x70] ss:$8 sps:$4 sm:$0xff] (!%p2947_p4)  }
 0x564   : > { %v2251_v54 = vadd.f32 %v2247_v51, %v2245_v49  ;;  %v3395_v53 = vld [vmem:[#allocation15 + $0x84] ss:$8 sps:$4 sm:$0xff] (!%p2947_p4)  }
 0x566   : > { %2252 = vadd.xlane.f32.xlu0 %v2251_v54  ;;  %v3397_v54 = vld [vmem:[#allocation15 + $0x80] ss:$8 sps:$4 sm:$0xff] (!%p2947_p4)  }
 0x5f3   : > { %v2253_v55 = vpop.xlane.xlu0 %2252 }
 0x5f4   : > { %v2255_v56 = vmul.f32 0.00390625, %v2253_v55  ;;  %v3398_v55 = vld [vmem:[#allocation15 + $0x94] ss:$8 sps:$4 sm:$0xff] (!%p2947_p4)  }
 0x5f6   : > { %v2256_v57 = vsub.f32 %v2245_v49, %v2255_v56  ;;  %v2257_v58 = vsub.f32 %v2247_v51, %v2255_v56  ;;  %v3392_v51 = vld [vmem:[#allocation15 + $0x74] ss:$8 sps:$4 sm:$0xff] (!%p2947_p4)   ;;  %v3400_v56 = vld [vmem:[#allocation15 + $0x90] ss:$8 sps:$4 sm:$0xff] (!%p2947_p4)  }
 0x5f8   : > { %v2258_v32 = vmul.f32 %v2256_v57, %v2256_v57  ;;  %v2259_v34 = vmul.f32 %v2257_v58, %v2257_v58 }
 0x5fa   : > { %v2260_v59 = vadd.f32 %v2259_v34, %v2258_v32  ;;  %v3404_v32 = vld [vmem:[#allocation15 + $0xb4] ss:$8 sps:$4 sm:$0xff] (!%p2947_p4)   ;;  %v3406_v34 = vld [vmem:[#allocation15 + $0xb0] ss:$8 sps:$4 sm:$0xff] (!%p2947_p4)  }
 0x5fc   : > { %2261 = vadd.xlane.f32.xlu0 %v2260_v59  ;;  %v3407_v59 = vld [vmem:[#allocation15 + $0xc4] ss:$8 sps:$4 sm:$0xff] (!%p2947_p4)  }
 0x689   : > { %v2262_v60 = vpop.xlane.xlu0 %2261 }
 0x68a   : > { %v2263_v61 = vmul.f32 0.00390625, %v2262_v60  ;;  %v3409_v60 = vld [vmem:[#allocation15 + $0xc0] ss:$8 sps:$4 sm:$0xff] (!%p2947_p4)  }
 0x68c   : > { %v2264_v62 = vadd.f32 1e-05, %v2263_v61  ;;  %v3410_v61 = vld [vmem:[#allocation15 + $0xd4] ss:$8 sps:$4 sm:$0xff] (!%p2947_p4)  }
 0x68e   : > { %3361 = vrsqrt.f32 %v2264_v62  ;;  %v3412_v62 = vld [vmem:[#allocation15 + $0xd0] ss:$8 sps:$4 sm:$0xff] (!%p2947_p4)  }
 0x698   : > { %v3362_v9 = vpop.eup %3361 }
 0x699   : > { %v2266_v13 = vmul.f32 %v3362_v9, %v2256_v57  ;;  %v2267_v14 = vmul.f32 %v3362_v9, %v2257_v58  ;;  %v3401_v57 = vld [vmem:[#allocation15 + $0xa4] ss:$8 sps:$4 sm:$0xff] (!%p2947_p4)   ;;  %v3403_v58 = vld [vmem:[#allocation15 + $0xa0] ss:$8 sps:$4 sm:$0xff] (!%p2947_p4)  }
 0x69b   : > { %v2286_v15 = vmul.f32 %v2281_v7, %v2266_v13  ;;  %v2287_v16 = vmul.f32 %v2285_v8, %v2267_v14  ;;  %v2371_v7 = vrot.slane (!%p2947_p4), %v2366_v6, %v4243_v40  ;;  %v2375_v8 = vrot.slane (!%p2947_p4), %v2366_v6, %v4249_v63 }
 0x69d   : > { %v2306_v17 = vadd.f32 %v2301_v10, %v2286_v15  ;;  %v2307_v37 = vadd.f32 %v2305_v11, %v2287_v16 }
 0x69f   : > { %v2308_v18 = vsub.f32 0.0, %v2306_v17  ;;  %v2309_v19 = vsub.f32 0.0, %v2307_v37 }
 0x6a1   : > { %v2310_v20 = vmul.f32 1.442695, %v2308_v18  ;;  %v2312_v21 = vmul.f32 1.442695, %v2309_v19 }
 0x6a3   : > { %3363 = vpow2.f32 %v2310_v20 }
 0x6a4   : > { %3365 = vpow2.f32 %v2312_v21 }
 0x6ad   : > { %v3364_v22 = vpop.eup %3363 }
 0x6ae   : > { %v3366_v23 = vpop.eup %3365  ;;  %v2314_v24 = vadd.f32 1.0, %v3364_v22 }
 0x6af   : > { %v2315_v1 = vadd.f32 1.0, %v3366_v23 }
 0x6b0   : > { %3367 = vrcp.f32 %v2314_v24 }
 0x6b1   : > { %3369 = vrcp.f32 %v2315_v1 }
 0x6ba   : > { %v3368_v25 = vpop.eup %3367  ;;  %2329 = sbr.rel (%p2947_p4) target bundleno = 1993 (0x7c9), region = 128 }
 0x6bb   : > { %v3370_v26 = vpop.eup %3369  ;;  %v2320_v27 = vmul.f32 %v3368_v25, %v2306_v17 }
 0x6bc   : > { %v2321_v28 = vmul.f32 %v3370_v26, %v2307_v37 }
 0x6bd   : > { %v2322_v29 = vadd.f32 %v2320_v27, %v4238_v33  ;;  %v3382_v33 = vld [vmem:[#allocation15 + $0x30] ss:$8 sps:$4 sm:$0xff] (!%p2947_p4)  }
 0x6be   : > { %v2323_v30 = vadd.f32 %v2321_v28, %v4216_v12  ;;  %v3383_v12 = vld [vmem:[#allocation15 + $0x44] ss:$8 sps:$4 sm:$0xff] (!%p2947_p4)   ;;  %2545 = vmatpush1.bf16.msra.mxu0 (!%p2947_p4), %v3382_v33 }
 0x6bf   : > { %2324 = vst [vmem:[#allocation2] sm:$0xff] %v2322_v29  ;;  %2546 = vmatprep.subr.bf16.mxu0 (!%p2947_p4), %v3383_v12 }
 0x6c0   : > { %2325 = vst [vmem:[#allocation2 + $0x8] sm:$0xff] %v2323_v30 }
 0x6c2   : > { %2547 = vmatpush1.bf16.msra.mxu0 %v3385_v44 }
 0x6c3   : > { %2548 = vmatprep.subr.bf16.mxu0 %v3386_v45 }
 0x6c6   : > { %2549 = vmatpush1.bf16.msra.mxu0 %v3388_v46  ;;  %v2330_v4 = vld [vmem:[#allocation2] sm:$0xff] }
 0x6c7   : > { %v2331_v48 = vld [vmem:[#allocation2 + $0x8] sm:$0xff]  ;;  %2550 = vmatprep.subr.bf16.mxu0 %v3389_v47  ;;  %v2332_v5 = vpack.c.bf16 %v2330_v4, %v2330_v4 }
 0x6c8   : > { %v2333_v49 = vpack.c.bf16 %v2331_v48, %v2331_v48 }
 0x6ca   : > { %2570 = vmatprep.mubr.bf16.mxu0 %v2333_v49  ;;  %2551 = vmatpush1.bf16.msra.mxu0 %v3391_v50 }
 0x6cb   : > { %2552 = vmatprep.subr.bf16.mxu0 %v3392_v51 }
 0x6ce   : > { %2553 = vmatpush1.bf16.msra.mxu0 %v3394_v52 }
 0x6cf   : > { %2554 = vmatprep.subr.bf16.mxu0 %v3395_v53 }
 0x6d2   : > { %2555 = vmatpush1.bf16.msra.mxu0 %v3397_v54 }
 0x6d3   : > { %2556 = vmatprep.subr.bf16.mxu0 %v3398_v55 }
 0x6d6   : > { %2557 = vmatpush1.bf16.msra.mxu0 %v3400_v56 }
 0x6d7   : > { %2558 = vmatprep.subr.bf16.mxu0 %v3401_v57 }
 0x6da   : > { %2559 = vmatpush1.bf16.msra.mxu0 %v3403_v58 }
 0x6db   : > { %2560 = vmatprep.subr.bf16.mxu0 %v3404_v32 }
 0x6de   : > { %2561 = vmatpush1.bf16.msra.mxu0 %v3406_v34 }
 0x6df   : > { %2562 = vmatprep.subr.bf16.mxu0 %v3407_v59 }
 0x6e2   : > { %2563 = vmatpush1.bf16.msra.mxu0 %v3409_v60 }
 0x6e3   : > { %2564 = vmatprep.subr.bf16.mxu0 %v3410_v61 }
 0x6e6   : > { %2565 = vmatpush1.bf16.msra.mxu0 %v3412_v62 }
 0x6e7   : > { %2566 = vmatprep.subr.bf16.mxu0 %v3413_v0 }
 0x6ea   : > { %2567 = vmatpush1.bf16.msra.mxu0 %v3415_v2 }
 0x6eb   : > { %2568 = vmatprep.subr.bf16.mxu0 %v3416_v3 }
 0x6ee   : > { %2569 = vmatpush1.bf16.msra.mxu0 %v3418_v42 }
 0x6f1   : > { %2571 = vmatmul.mubr.bf16.vlgmr.msra.gmra.mrb[0].mxu0 %v2332_v5 }
 0x7c4   : > { %v2572_v9 = vpop.f32.mrb[0].mxu0 }
 0x7c5   : > { %v2573_v10 = vadd.f32 %v2572_v9, %v2371_v7  ;;  %v2574_v11 = vpop.f32.mrb[1].mxu0 }
 0x7c6   : > { %v2575_v13 = vadd.f32 %v2574_v11, %v2375_v8  ;;  %v2576_v14 = vpop.f32.mrb[2].mxu0 }
 0x7c7   : > { %2579 = vst [vmem:[#allocation16] sm:$0xff] %v2573_v10  ;;  %v2577_v15 = vpop.f32.mrb[3].mxu0 }
 0x7c8   : > { %2580 = vst [vmem:[#allocation16 + $0x8] sm:$0xff] %v2575_v13 }
 0x7c9 PF: > { %p3056_p1 = scmp.eq.s32.totalorder %s3858_s1, 3  ;;  %s3731_s5 = smov [#allocation16]  }
 0x7ca   : > { %s2591_s25 = sshll.u32 %s3731_s5, 4  ;;  %s2592_s25 = int_to_ptr.vmem [resolvable:$true] %s2591_s25 }
 0x7cb   : > { %s3617_s6 = scalar_lea.vmem %s2592_s25, 256  ;;  %p3624_p13 = scmp.lt.s32.totalorder %s2592_s25, %s2592_s25 }
 0x7cc   : > { %p3618_p3 = scmp.ne.s32.totalorder %s2592_s25, %s3617_s6  ;;  %p3625_p0 = scmp.lt.s32.totalorder %s3617_s6, %s3617_s6 }
 0x7ce   : > { %p3619_p10 = pnand %p3618_p3, %p3056_p1  ;;  %p3626_p2 = por %p3625_p0, %p3624_p13 }
 0x7d0   : > { %p3620_p12 = pneg %p3619_p10 }
 0x7d2   : > { %p3627_p5 = pnand %p3626_p2, %p3620_p12 }
 0x7d4   : > { %3630 = shalt.err (!%p3627_p5)
}
 0x7d5   : > { %s4367_s15 = sld [smem:[#allocation35_spill]] }
 0x7db   : > { %s3631_s20 = scalar_lea.hbm %s4367_s15, 256 }
 0x7dc   : > { %p3632_p8 = scmp.ne.s32.totalorder %s4367_s15, %s3631_s20  ;;  %p3637_p11 = scmp.lt.u32.totalorder %s3631_s20, %s4367_s15 }
 0x7de   : > { %p3633_p6 = pnand %p3632_p8, %p3056_p1 }
 0x7e0   : > { %p3634_p9 = pneg %p3633_p6 }
 0x7e2   : > { %p3639_p7 = pnand %p3637_p11, %p3634_p9 }
 0x7e4   : > { %3642 = shalt.err (!%p3639_p7)
}
 0x7e5   : > { %3017 = dma.vmem_to_hbm [thread:$0]  (%p3056_p1), %s2592_s25, 256, %s4367_s15, [#allocation6]  }
 0x7e6   : > { %3688 = dma.done.wait (%p3056_p1), [#allocation6], 256  }
 0x7e7   : > { %3690 = vsyncadd (%p3056_p1), [#allocation6], 4294967040 }
 0x7e8 PF: > { %s35_s19 = sadd.s32 1, %s3713_s19   ;;  %s4368_s27 = smov %s3697_s28 }
 0x7e9   : > { %p32_p4 = scmp.ge.s32.totalorder %s35_s19, 6   ;;  %s4369_s28 = smov %s3701_s29 }
 0x7ea   : > { %s4370_s29 = smov %s4053_s18  ;;  %s4371_s30 = smov %s3709_s0 }
 0x7eb   : > { %s4372_s0 = smov %s4374_s24  ;;  %34 = sbr.rel (!%p32_p4) target bundleno = 22 (0x16), region = 175 }
 0x7f2   :  { %2604 = vsyncpa [#allocation5], 1 }
 0x7f3   :  { %2606 = vsyncpa [#allocation5 + $0x1], 1 }
 0x7f4   :  { %2607 = vsyncpa [#allocation8], 1 }
 0x7f5   :  { %2608 = vsyncpa [#allocation11], 1 }
 0x7f6   :  { %2609 = vsyncpa [#allocation14], 1 }
 0x7f7   :  { %2611 = vsyncpa [#allocation14 + $0x1], 1 }
 0x7f8   :  { %2612 = vsyncpa [#allocation6], 1 }
 0x7f9   :  { %2614 = vsyncpa [#allocation6 + $0x1], 1 }

</bundles_post_ra>
